<compile_context>
chip_gen: v7x
topology: tpu7x:2x2x1
jax: 0.10.0
libtpu: 0.0.40
codegen_flags: <defaults>
</compile_context>

<pallas_src>
import functools

import jax
import jax.numpy as jnp
from jax.experimental import pallas as pl
from jax.experimental.pallas import tpu as pltpu


def _softplus(x):
    # numerically-stable softplus; lowers cleanly both in Mosaic and plain XLA
    return jnp.maximum(x, 0.0) + jnp.log(1.0 + jnp.exp(-jnp.abs(x)))


# ----------------------------- Pallas kernel ---------------------------------
def cgcnn_kernel(node_ref, edge_ref, s_ref, rt_ref,
                 wn_ref, bn_ref, we_ref, be_ref,
                 wsn_ref, wed_ref, bce_ref, alpha_ref, out_ref,
                 *, n_conv, node_len, m_nbrs):
    f32, bf16 = jnp.float32, jnp.bfloat16

    def mm(x, w):  # bf16 MXU matmul, f32 accumulation
        return jnp.dot(x.astype(bf16), w, preferred_element_type=f32)

    # ----- embeddings on the whole batch-block of rows (one MXU pass each) ---
    node = mm(node_ref[...], wn_ref[...]) + bn_ref[...]       # [BN,  node_len]       f32
    edge = mm(edge_ref[...], we_ref[...]) + be_ref[...]       # [BNM, edge_len]       f32

    # edge contribution of fc_full for ALL layers in one wide matmul (+ per-layer bias)
    edge_proj = mm(edge, wed_ref[...]) + bce_ref[...]         # [BNM, n_conv*node_len] f32

    s = s_ref[...]    # [BNM, BN] bf16 block-diag one-hot gather (zero rows where idx < 0)
    rt = rt_ref[...]  # [BN, BNM] bf16 block-diag neighbor-sum with the mask folded in

    bn_rows = node.shape[0]                                   # Bblk * N
    for l in range(n_conv):
        # project node features BEFORE the NM expansion: [BN,128] @ [128,256]
        sn = mm(node, wsn_ref[l])                             # [BN, 2*node_len] f32
        self_proj = sn[:, :node_len]
        nbr_proj = sn[:, node_len:]

        # gather neighbor projections through the block-diagonal one-hot (MXU, K=BN)
        gate = jnp.dot(s, nbr_proj.astype(bf16), preferred_element_type=f32)  # [BNM, node_len]
        # expand self projections to the edge rows via sublane broadcast (no R matmul)
        gate = gate + jnp.broadcast_to(
            self_proj[:, None, :], (bn_rows, m_nbrs, node_len)
        ).reshape(bn_rows * m_nbrs, node_len)
        gate = gate + edge_proj[:, l * node_len:(l + 1) * node_len]

        # sigmoid via EUP approx-reciprocal; the neighbor mask lives inside rt, so
        # prod = sigmoid(gate)^2 == nbr_filter * nbr_core of the original module
        g = pl.reciprocal(1.0 + jnp.exp(-gate), approx=True)
        prod = g * g

        summed = jnp.dot(rt, prod.astype(bf16), preferred_element_type=f32)   # [BN, node_len]
        node = _softplus(alpha_ref[l] * node + summed)

    out_ref[...] = node.astype(out_ref.dtype)


# ------------------------------- wrapper --------------------------------------
def cgcnn_forward(node_fea, edge_fea, edge_fea_idx, params, *, crystals_per_step=None):
    """Batched CGCNN forward; each batch element == CrystalGraphConvNet.forward.

    node_fea:     [B, N, orig_node_fea_len] f32
    edge_fea:     [B, N, M, orig_edge_fea_len] f32
    edge_fea_idx: [B, N, M] int32, negative => missing neighbor
    returns       [B, N, node_fea_len] f32
    """
    f32, bf16 = jnp.float32, jnp.bfloat16
    B, N, orig_node = node_fea.shape
    M, orig_edge = edge_fea.shape[2], edge_fea.shape[3]
    NM = N * M
    node_len = params["w_n"].shape[1]
    edge_len = params["w_e"].shape[1]
    n_conv = params["w_self"].shape[0]

    # Batch-block the grid: keep >=2 steps so both v7x TensorCores get work while
    # still amortizing the ~0.35us/step overhead. On single-TC v5e/v6e pass
    # crystals_per_step=B to collapse to a single step.
    if crystals_per_step is None:
        crystals_per_step = B // 2 if (B >= 2 and B % 2 == 0) else B
    Bblk = crystals_per_step
    assert B % Bblk == 0
    G = B // Bblk
    BN, BNM = Bblk * N, Bblk * NM

    # --- host-side staging (layout plumbing only, no compute hoisting) --------
    node2d = node_fea.reshape(B * N, orig_node)
    edge2d = edge_fea.reshape(B * NM, orig_edge)

    idx = edge_fea_idx.reshape(B, NM)
    s_full = jax.nn.one_hot(idx, N, dtype=f32)                    # zero row where idx < 0
    mask = (idx >= 0).astype(f32)                                 # [B, NM]
    rt = jnp.repeat(jnp.eye(N, dtype=f32), M, axis=0).T           # [N, NM] sum over neighbors
    rt_masked = rt[None] * mask[:, None, :]                       # mask folded into R^T

    eye_b = jnp.eye(Bblk, dtype=f32)                              # block-diag per grid step
    s_bd = jnp.einsum('gbmn,bc->gbmcn', s_full.reshape(G, Bblk, NM, N),
                      eye_b).reshape(B * NM, BN).astype(bf16)
    rt_bd = jnp.einsum('gbnm,bc->gbncm', rt_masked.reshape(G, Bblk, N, NM),
                       eye_b).reshape(B * N, BNM).astype(bf16)

    # only the sigmoid/"filter" half of fc_full is live in the forward pass
    w_sn = jnp.concatenate([params["w_self"][:, :, :node_len],
                            params["w_nbr"][:, :, :node_len]], axis=2).astype(bf16)
    wed_all = jnp.moveaxis(params["w_edge"][:, :, :node_len], 0, 1
                           ).reshape(edge_len, n_conv * node_len).astype(bf16)
    bc_all = params["b_full"][:, :, :node_len].reshape(1, n_conv * node_len)

    def fixed(shape):   # weights: constant block index -> stay VMEM-resident
        nd = len(shape)
        return pl.BlockSpec(shape, lambda g, nd=nd: (0,) * nd)

    in_specs = [
        pl.BlockSpec((BN, orig_node), lambda g: (g, 0)),           # node features
        pl.BlockSpec((BNM, orig_edge), lambda g: (g, 0)),          # edge features
        pl.BlockSpec((BNM, BN), lambda g: (g, 0)),                 # block-diag gather S
        pl.BlockSpec((BN, BNM), lambda g: (g, 0)),                 # block-diag masked R^T
        fixed((orig_node, node_len)), fixed((1, node_len)),        # embedding_n
        fixed((orig_edge, edge_len)), fixed((1, edge_len)),        # embedding_e
        fixed((n_conv, node_len, 2 * node_len)),                   # fused [Ws | Wnb] (filter half)
        fixed((edge_len, n_conv * node_len)),                      # all-layer edge weights
        fixed((1, n_conv * node_len)),                             # all-layer filter bias
        pl.BlockSpec(memory_space=pltpu.MemorySpace.SMEM),         # alphas (scalars)
    ]

    operands = (node2d, edge2d, s_bd, rt_bd,
                params["w_n"].astype(bf16), params["b_n"],
                params["w_e"].astype(bf16), params["b_e"],
                w_sn, wed_all, bc_all, params["alpha"])

    macs = (B * N * orig_node * node_len
            + B * NM * orig_edge * edge_len
            + B * NM * edge_len * n_conv * node_len
            + n_conv * (B * N * node_len * 2 * node_len
                        + B * NM * BN * node_len
                        + B * N * BNM * node_len))
    bytes_accessed = (sum(int(a.size) * a.dtype.itemsize for a in operands)
                      + B * N * node_len * 4)
    cost = pl.CostEstimate(flops=2 * macs,
                           transcendentals=n_conv * B * (NM + 2 * N) * node_len,
                           bytes_accessed=bytes_accessed)

    out2d = pl.pallas_call(
        functools.partial(cgcnn_kernel, n_conv=n_conv, node_len=node_len, m_nbrs=M),
        out_shape=jax.ShapeDtypeStruct((B * N, node_len), f32),
        grid=(G,),
        in_specs=in_specs,
        out_specs=pl.BlockSpec((BN, node_len), lambda g: (g, 0)),
        compiler_params=pltpu.CompilerParams(
            dimension_semantics=("parallel",)),    # v7x: shard grid steps over both TCs
        cost_estimate=cost,
    )(*operands)
    return out2d.reshape(B, N, node_len)


# ------------------------------ params init -----------------------------------
def init_cgcnn_params(key, orig_node_fea_len, orig_edge_fea_len,
                      node_fea_len, edge_fea_len, n_conv=3):
    """Matches the module's initialize_weights(): kaiming_uniform_(mode='fan_in',
    nonlinearity='relu') for Linear weights, zero biases, alpha = 0.7.
    Weights are stored [in, out] (transposed vs PyTorch) so y = x @ W + b."""
    def kaiming(k, fan_in, fan_out):
        bound = (6.0 / fan_in) ** 0.5
        return jax.random.uniform(k, (fan_in, fan_out), jnp.float32, -bound, bound)

    in_full = 2 * node_fea_len + edge_fea_len
    keys = jax.random.split(key, 2 + n_conv)
    w_full = jnp.stack([kaiming(keys[2 + l], in_full, 2 * node_fea_len)
                        for l in range(n_conv)])            # [n_conv, 2n+e, 2n]
    return dict(
        w_n=kaiming(keys[0], orig_node_fea_len, node_fea_len),
        b_n=jnp.zeros((1, node_fea_len), jnp.float32),
        w_e=kaiming(keys[1], orig_edge_fea_len, edge_fea_len),
        b_e=jnp.zeros((1, edge_fea_len), jnp.float32),
        # fc_full split along its input (concat) axis: [self | neighbor | edge]
        w_self=w_full[:, :node_fea_len, :],
        w_nbr=w_full[:, node_fea_len:2 * node_fea_len, :],
        w_edge=w_full[:, 2 * node_fea_len:, :],
        b_full=jnp.zeros((n_conv, 1, 2 * node_fea_len), jnp.float32),
        alpha=jnp.full((n_conv,), 0.7, jnp.float32),
    )


# --------------------------- plain-JAX reference -------------------------------
def cgcnn_reference(node_fea, edge_fea, edge_fea_idx, params):
    """Mirrors the PyTorch module structure (gather -> expand -> concat -> fc_full
    -> chunk -> sigmoid -> mask -> sum -> softplus residual), using the same
    bf16-at-the-matmul quantization as the kernel so the comparison is tight."""
    f32, bf16 = jnp.float32, jnp.bfloat16
    n_conv = params["w_self"].shape[0]
    node_len = params["w_n"].shape[1]
    w_full = jnp.concatenate([params["w_self"], params["w_nbr"],
                              params["w_edge"]], axis=1)     # [n_conv, 2n+e, 2n]

    def lin(x, w, b):
        return jnp.dot(x.astype(bf16), w.astype(bf16),
                       preferred_element_type=f32) + b

    def one_crystal(node, edge, idx):
        N, M = idx.shape
        node = lin(node, params["w_n"], params["b_n"])               # [N, n]
        edge = lin(edge, params["w_e"], params["b_e"])               # [N, M, e]
        mask = (idx >= 0).astype(f32)[..., None]
        for l in range(n_conv):
            nbr = node[idx]                                          # negative idx wraps (masked below)
            self_exp = jnp.broadcast_to(node[:, None, :], (N, M, node_len))
            total = jnp.concatenate([self_exp, nbr, edge], axis=-1)  # [N, M, 2n+e]
            gated = (jnp.dot(total.reshape(N * M, -1).astype(bf16),
                             w_full[l].astype(bf16),
                             preferred_element_type=f32).reshape(N, M, -1)
                     + params["b_full"][l])
            nbr_filter = 1.0 / (1.0 + jnp.exp(-gated[..., :node_len]))
            # softplus(nbr_core) is dead in the original module (overwritten)
            nbr_filter = nbr_filter * mask
            nbr_core = nbr_filter * mask
            prod = (nbr_filter * nbr_core).astype(bf16).astype(f32)
            nbr_sumed = prod.sum(axis=1)
            node = _softplus(params["alpha"][l] * node + nbr_sumed)
        return node

    return jax.vmap(one_crystal)(node_fea, edge_fea, edge_fea_idx)


# ---------------------------------- main ---------------------------------------
if __name__ == "__main__":
    key = jax.random.PRNGKey(0)
    k_node, k_edge, k_idx, k_drop, k_param = jax.random.split(key, 5)

    # small but lane-friendly shapes
    B = 4                 # batch of independent crystals (2 crystals per grid step)
    N = 16                # atoms per crystal
    M = 8                 # neighbors per atom  (N*M = 128)
    orig_node_fea_len = 32
    orig_edge_fea_len = 16
    node_fea_len = 128    # lane-aligned hidden widths
    edge_fea_len = 128

    node_fea = jax.random.normal(k_node, (B, N, orig_node_fea_len), jnp.float32)
    edge_fea = jax.random.normal(k_edge, (B, N, M, orig_edge_fea_len), jnp.float32)
    edge_fea_idx = jax.random.randint(k_idx, (B, N, M), 0, N, dtype=jnp.int32)
    # mark ~20% of the neighbor slots as missing (idx = -1) to exercise the mask
    drop = jax.random.uniform(k_drop, (B, N, M)) < 0.2
    edge_fea_idx = jnp.where(drop, -1, edge_fea_idx)

    params = init_cgcnn_params(k_param, orig_node_fea_len, orig_edge_fea_len,
                               node_fea_len, edge_fea_len)

    out = cgcnn_forward(node_fea, edge_fea, edge_fea_idx, params)
    out = jax.block_until_ready(out)

    ref = cgcnn_reference(node_fea, edge_fea, edge_fea_idx, params)
    assert out.shape == (B, N, node_fea_len)
    assert bool(jnp.all(jnp.isfinite(out)))
    # tolerance covers bf16 matmul quantization + the EUP approx-reciprocal sigmoid
    assert jnp.allclose(out, ref, atol=2e-2, rtol=2e-2), \
        float(jnp.max(jnp.abs(out - ref)))

    # TODO(synk): readout()/final_layer/conv_to_fc/fc_out pooling path and the
    # DA_weight/DA_bias/ELU heads are not part of forward() and are not implemented here.
    print("KERNEL_OK")
</pallas_src>

<mosaic_0001>
module attributes {stable_mosaic.version = 11 : i64} {
  func.func @cgcnn_kernel(%arg0: i32, %arg1: memref<32x32xf32, #tpu.memory_space<vmem>>, %arg2: memref<256x16xf32, #tpu.memory_space<vmem>>, %arg3: memref<256x32xbf16, #tpu.memory_space<vmem>>, %arg4: memref<32x256xbf16, #tpu.memory_space<vmem>>, %arg5: memref<32x128xbf16, #tpu.memory_space<vmem>>, %arg6: memref<1x128xf32, #tpu.memory_space<vmem>>, %arg7: memref<16x128xbf16, #tpu.memory_space<vmem>>, %arg8: memref<1x128xf32, #tpu.memory_space<vmem>>, %arg9: memref<3x128x256xbf16, #tpu.memory_space<vmem>>, %arg10: memref<128x384xbf16, #tpu.memory_space<vmem>>, %arg11: memref<1x384xf32, #tpu.memory_space<vmem>>, %arg12: memref<3xf32, #tpu.memory_space<smem>>, %arg13: memref<32x128xf32, #tpu.memory_space<vmem>>) attributes {dimension_semantics = [#tpu.dimension_semantics<parallel>], iteration_bounds = array<i64: 2>, scalar_prefetch = 0 : i64, scratch_operands = 0 : i64, tpu.core_type = #tpu.core_type<tc>, window_params = [{transform_indices = @transform_0, window_bounds = array<i64: 32, 32>}, {transform_indices = @transform_1, window_bounds = array<i64: 256, 16>}, {transform_indices = @transform_2, window_bounds = array<i64: 256, 32>}, {transform_indices = @transform_3, window_bounds = array<i64: 32, 256>}, {pipeline_mode = #tpu.pipeline_mode<synchronous>, transform_indices = @transform_4, window_bounds = array<i64: 32, 128>}, {pipeline_mode = #tpu.pipeline_mode<synchronous>, transform_indices = @transform_5, window_bounds = array<i64: 1, 128>}, {pipeline_mode = #tpu.pipeline_mode<synchronous>, transform_indices = @transform_6, window_bounds = array<i64: 16, 128>}, {pipeline_mode = #tpu.pipeline_mode<synchronous>, transform_indices = @transform_7, window_bounds = array<i64: 1, 128>}, {pipeline_mode = #tpu.pipeline_mode<synchronous>, transform_indices = @transform_8, window_bounds = array<i64: 3, 128, 256>}, {pipeline_mode = #tpu.pipeline_mode<synchronous>, transform_indices = @transform_9, window_bounds = array<i64: 128, 384>}, {pipeline_mode = #tpu.pipeline_mode<synchronous>, transform_indices = @transform_10, window_bounds = array<i64: 1, 384>}, {transform_indices = @transform_11, window_bounds = array<i64: 3>}, {transform_indices = @transform_12, window_bounds = array<i64: 32, 128>}]} {
    %c0 = arith.constant 0 : index
    %c0_0 = arith.constant 0 : index
    %0 = vector.load %arg1[%c0, %c0_0] : memref<32x32xf32, #tpu.memory_space<vmem>>, vector<32x32xf32>
    %c0_1 = arith.constant 0 : index
    %c0_2 = arith.constant 0 : index
    %1 = vector.load %arg5[%c0_1, %c0_2] : memref<32x128xbf16, #tpu.memory_space<vmem>>, vector<32x128xbf16>
    %2 = arith.truncf %0 : vector<32x32xf32> to vector<32x32xbf16>
    %cst = arith.constant dense<0.000000e+00> : vector<32x128xf32>
    %3 = tpu.matmul %2, %1, %cst {dimension_numbers = #tpu.dot_dimension_numbers<[1], [0], [0], [1], [0, 0, 1, 1], [], []>} : vector<32x32xbf16>, vector<32x128xbf16>, vector<32x128xf32> -> vector<32x128xf32>
    %c0_3 = arith.constant 0 : index
    %c0_4 = arith.constant 0 : index
    %4 = vector.load %arg6[%c0_3, %c0_4] : memref<1x128xf32, #tpu.memory_space<vmem>>, vector<1x128xf32>
    %5 = vector.broadcast %4 : vector<1x128xf32> to vector<32x128xf32>
    %6 = arith.addf %3, %5 : vector<32x128xf32>
    %c0_5 = arith.constant 0 : index
    %c0_6 = arith.constant 0 : index
    %7 = vector.load %arg2[%c0_5, %c0_6] : memref<256x16xf32, #tpu.memory_space<vmem>>, vector<256x16xf32>
    %c0_7 = arith.constant 0 : index
    %c0_8 = arith.constant 0 : index
    %8 = vector.load %arg7[%c0_7, %c0_8] : memref<16x128xbf16, #tpu.memory_space<vmem>>, vector<16x128xbf16>
    %9 = arith.truncf %7 : vector<256x16xf32> to vector<256x16xbf16>
    %cst_9 = arith.constant dense<0.000000e+00> : vector<256x128xf32>
    %10 = tpu.matmul %9, %8, %cst_9 {dimension_numbers = #tpu.dot_dimension_numbers<[1], [0], [0], [1], [0, 0, 1, 1], [], []>} : vector<256x16xbf16>, vector<16x128xbf16>, vector<256x128xf32> -> vector<256x128xf32>
    %c0_10 = arith.constant 0 : index
    %c0_11 = arith.constant 0 : index
    %11 = vector.load %arg8[%c0_10, %c0_11] : memref<1x128xf32, #tpu.memory_space<vmem>>, vector<1x128xf32>
    %12 = vector.broadcast %11 : vector<1x128xf32> to vector<256x128xf32>
    %13 = arith.addf %10, %12 : vector<256x128xf32>
    %c0_12 = arith.constant 0 : index
    %c0_13 = arith.constant 0 : index
    %14 = vector.load %arg10[%c0_12, %c0_13] : memref<128x384xbf16, #tpu.memory_space<vmem>>, vector<128x384xbf16>
    %15 = arith.truncf %13 : vector<256x128xf32> to vector<256x128xbf16>
    %cst_14 = arith.constant dense<0.000000e+00> : vector<256x384xf32>
    %16 = tpu.matmul %15, %14, %cst_14 {dimension_numbers = #tpu.dot_dimension_numbers<[1], [0], [0], [1], [0, 0, 1, 1], [], []>} : vector<256x128xbf16>, vector<128x384xbf16>, vector<256x384xf32> -> vector<256x384xf32>
    %c0_15 = arith.constant 0 : index
    %c0_16 = arith.constant 0 : index
    %17 = vector.load %arg11[%c0_15, %c0_16] : memref<1x384xf32, #tpu.memory_space<vmem>>, vector<1x384xf32>
    %18 = vector.broadcast %17 : vector<1x384xf32> to vector<256x384xf32>
    %19 = arith.addf %16, %18 : vector<256x384xf32>
    %c0_17 = arith.constant 0 : index
    %c0_18 = arith.constant 0 : index
    %20 = vector.load %arg3[%c0_17, %c0_18] : memref<256x32xbf16, #tpu.memory_space<vmem>>, vector<256x32xbf16>
    %c0_19 = arith.constant 0 : index
    %c0_20 = arith.constant 0 : index
    %21 = vector.load %arg4[%c0_19, %c0_20] : memref<32x256xbf16, #tpu.memory_space<vmem>>, vector<32x256xbf16>
    %c0_21 = arith.constant 0 : index
    %c0_22 = arith.constant 0 : index
    %c0_23 = arith.constant 0 : index
    %22 = vector.load %arg9[%c0_21, %c0_22, %c0_23] : memref<3x128x256xbf16, #tpu.memory_space<vmem>>, vector<1x128x256xbf16>
    %23 = vector.shape_cast %22 : vector<1x128x256xbf16> to vector<128x256xbf16>
    %24 = arith.truncf %6 : vector<32x128xf32> to vector<32x128xbf16>
    %cst_24 = arith.constant dense<0.000000e+00> : vector<32x256xf32>
    %25 = tpu.matmul %24, %23, %cst_24 {dimension_numbers = #tpu.dot_dimension_numbers<[1], [0], [0], [1], [0, 0, 1, 1], [], []>} : vector<32x128xbf16>, vector<128x256xbf16>, vector<32x256xf32> -> vector<32x256xf32>
    %26 = vector.extract_strided_slice %25 {offsets = [0, 0], sizes = [32, 128], strides = [1, 1]} : vector<32x256xf32> to vector<32x128xf32>
    %27 = vector.extract_strided_slice %25 {offsets = [0, 128], sizes = [32, 128], strides = [1, 1]} : vector<32x256xf32> to vector<32x128xf32>
    %28 = arith.truncf %27 : vector<32x128xf32> to vector<32x128xbf16>
    %cst_25 = arith.constant dense<0.000000e+00> : vector<256x128xf32>
    %29 = tpu.matmul %20, %28, %cst_25 {dimension_numbers = #tpu.dot_dimension_numbers<[1], [0], [0], [1], [0, 0, 1, 1], [], []>} : vector<256x32xbf16>, vector<32x128xbf16>, vector<256x128xf32> -> vector<256x128xf32>
    %30 = vector.shape_cast %26 : vector<32x128xf32> to vector<32x1x128xf32>
    %31 = vector.shape_cast %30 : vector<32x1x128xf32> to vector<32x1x128xf32>
    %32 = vector.broadcast %31 : vector<32x1x128xf32> to vector<32x8x128xf32>
    %33 = vector.shape_cast %32 : vector<32x8x128xf32> to vector<256x128xf32>
    %34 = arith.addf %29, %33 : vector<256x128xf32>
    %35 = vector.extract_strided_slice %19 {offsets = [0, 0], sizes = [256, 128], strides = [1, 1]} : vector<256x384xf32> to vector<256x128xf32>
    %36 = arith.addf %34, %35 : vector<256x128xf32>
    %cst_26 = arith.constant 0.000000e+00 : f32
    %37 = vector.broadcast %cst_26 : f32 to vector<256x128xf32>
    %38 = arith.subf %37, %36 : vector<256x128xf32>
    %39 = math.exp %38 : vector<256x128xf32>
    %cst_27 = arith.constant 1.000000e+00 : f32
    %40 = vector.broadcast %cst_27 : f32 to vector<256x128xf32>
    %41 = arith.addf %40, %39 : vector<256x128xf32>
    %42 = tpu.reciprocal %41 {approx = true} : vector<256x128xf32> -> vector<256x128xf32>
    %43 = arith.mulf %42, %42 : vector<256x128xf32>
    %44 = arith.truncf %43 : vector<256x128xf32> to vector<256x128xbf16>
    %cst_28 = arith.constant dense<0.000000e+00> : vector<32x128xf32>
    %45 = tpu.matmul %21, %44, %cst_28 {dimension_numbers = #tpu.dot_dimension_numbers<[1], [0], [0], [1], [0, 0, 1, 1], [], []>} : vector<32x256xbf16>, vector<256x128xbf16>, vector<32x128xf32> -> vector<32x128xf32>
    %c0_29 = arith.constant 0 : index
    %46 = memref.load %arg12[%c0_29] : memref<3xf32, #tpu.memory_space<smem>>
    %47 = vector.broadcast %46 : f32 to vector<32x128xf32>
    %48 = arith.mulf %47, %6 : vector<32x128xf32>
    %49 = arith.addf %48, %45 : vector<32x128xf32>
    %cst_30 = arith.constant 0.000000e+00 : f32
    %50 = vector.broadcast %cst_30 : f32 to vector<32x128xf32>
    %51 = arith.maximumf %49, %50 : vector<32x128xf32>
    %52 = math.absf %49 : vector<32x128xf32>
    %cst_31 = arith.constant 0.000000e+00 : f32
    %53 = vector.broadcast %cst_31 : f32 to vector<32x128xf32>
    %54 = arith.subf %53, %52 : vector<32x128xf32>
    %55 = math.exp %54 : vector<32x128xf32>
    %cst_32 = arith.constant 1.000000e+00 : f32
    %56 = vector.broadcast %cst_32 : f32 to vector<32x128xf32>
    %57 = arith.addf %56, %55 : vector<32x128xf32>
    %58 = math.log %57 : vector<32x128xf32>
    %59 = arith.addf %51, %58 : vector<32x128xf32>
    %c1 = arith.constant 1 : index
    %c0_33 = arith.constant 0 : index
    %c0_34 = arith.constant 0 : index
    %60 = vector.load %arg9[%c1, %c0_33, %c0_34] : memref<3x128x256xbf16, #tpu.memory_space<vmem>>, vector<1x128x256xbf16>
    %61 = vector.shape_cast %60 : vector<1x128x256xbf16> to vector<128x256xbf16>
    %62 = arith.truncf %59 : vector<32x128xf32> to vector<32x128xbf16>
    %cst_35 = arith.constant dense<0.000000e+00> : vector<32x256xf32>
    %63 = tpu.matmul %62, %61, %cst_35 {dimension_numbers = #tpu.dot_dimension_numbers<[1], [0], [0], [1], [0, 0, 1, 1], [], []>} : vector<32x128xbf16>, vector<128x256xbf16>, vector<32x256xf32> -> vector<32x256xf32>
    %64 = vector.extract_strided_slice %63 {offsets = [0, 0], sizes = [32, 128], strides = [1, 1]} : vector<32x256xf32> to vector<32x128xf32>
    %65 = vector.extract_strided_slice %63 {offsets = [0, 128], sizes = [32, 128], strides = [1, 1]} : vector<32x256xf32> to vector<32x128xf32>
    %66 = arith.truncf %65 : vector<32x128xf32> to vector<32x128xbf16>
    %cst_36 = arith.constant dense<0.000000e+00> : vector<256x128xf32>
    %67 = tpu.matmul %20, %66, %cst_36 {dimension_numbers = #tpu.dot_dimension_numbers<[1], [0], [0], [1], [0, 0, 1, 1], [], []>} : vector<256x32xbf16>, vector<32x128xbf16>, vector<256x128xf32> -> vector<256x128xf32>
    %68 = vector.shape_cast %64 : vector<32x128xf32> to vector<32x1x128xf32>
    %69 = vector.shape_cast %68 : vector<32x1x128xf32> to vector<32x1x128xf32>
    %70 = vector.broadcast %69 : vector<32x1x128xf32> to vector<32x8x128xf32>
    %71 = vector.shape_cast %70 : vector<32x8x128xf32> to vector<256x128xf32>
    %72 = arith.addf %67, %71 : vector<256x128xf32>
    %73 = vector.extract_strided_slice %19 {offsets = [0, 128], sizes = [256, 128], strides = [1, 1]} : vector<256x384xf32> to vector<256x128xf32>
    %74 = arith.addf %72, %73 : vector<256x128xf32>
    %cst_37 = arith.constant 0.000000e+00 : f32
    %75 = vector.broadcast %cst_37 : f32 to vector<256x128xf32>
    %76 = arith.subf %75, %74 : vector<256x128xf32>
    %77 = math.exp %76 : vector<256x128xf32>
    %cst_38 = arith.constant 1.000000e+00 : f32
    %78 = vector.broadcast %cst_38 : f32 to vector<256x128xf32>
    %79 = arith.addf %78, %77 : vector<256x128xf32>
    %80 = tpu.reciprocal %79 {approx = true} : vector<256x128xf32> -> vector<256x128xf32>
    %81 = arith.mulf %80, %80 : vector<256x128xf32>
    %82 = arith.truncf %81 : vector<256x128xf32> to vector<256x128xbf16>
    %cst_39 = arith.constant dense<0.000000e+00> : vector<32x128xf32>
    %83 = tpu.matmul %21, %82, %cst_39 {dimension_numbers = #tpu.dot_dimension_numbers<[1], [0], [0], [1], [0, 0, 1, 1], [], []>} : vector<32x256xbf16>, vector<256x128xbf16>, vector<32x128xf32> -> vector<32x128xf32>
    %c1_40 = arith.constant 1 : index
    %84 = memref.load %arg12[%c1_40] : memref<3xf32, #tpu.memory_space<smem>>
    %85 = vector.broadcast %84 : f32 to vector<32x128xf32>
    %86 = arith.mulf %85, %59 : vector<32x128xf32>
    %87 = arith.addf %86, %83 : vector<32x128xf32>
    %cst_41 = arith.constant 0.000000e+00 : f32
    %88 = vector.broadcast %cst_41 : f32 to vector<32x128xf32>
    %89 = arith.maximumf %87, %88 : vector<32x128xf32>
    %90 = math.absf %87 : vector<32x128xf32>
    %cst_42 = arith.constant 0.000000e+00 : f32
    %91 = vector.broadcast %cst_42 : f32 to vector<32x128xf32>
    %92 = arith.subf %91, %90 : vector<32x128xf32>
    %93 = math.exp %92 : vector<32x128xf32>
    %cst_43 = arith.constant 1.000000e+00 : f32
    %94 = vector.broadcast %cst_43 : f32 to vector<32x128xf32>
    %95 = arith.addf %94, %93 : vector<32x128xf32>
    %96 = math.log %95 : vector<32x128xf32>
    %97 = arith.addf %89, %96 : vector<32x128xf32>
    %c2 = arith.constant 2 : index
    %c0_44 = arith.constant 0 : index
    %c0_45 = arith.constant 0 : index
    %98 = vector.load %arg9[%c2, %c0_44, %c0_45] : memref<3x128x256xbf16, #tpu.memory_space<vmem>>, vector<1x128x256xbf16>
    %99 = vector.shape_cast %98 : vector<1x128x256xbf16> to vector<128x256xbf16>
    %100 = arith.truncf %97 : vector<32x128xf32> to vector<32x128xbf16>
    %cst_46 = arith.constant dense<0.000000e+00> : vector<32x256xf32>
    %101 = tpu.matmul %100, %99, %cst_46 {dimension_numbers = #tpu.dot_dimension_numbers<[1], [0], [0], [1], [0, 0, 1, 1], [], []>} : vector<32x128xbf16>, vector<128x256xbf16>, vector<32x256xf32> -> vector<32x256xf32>
    %102 = vector.extract_strided_slice %101 {offsets = [0, 0], sizes = [32, 128], strides = [1, 1]} : vector<32x256xf32> to vector<32x128xf32>
    %103 = vector.extract_strided_slice %101 {offsets = [0, 128], sizes = [32, 128], strides = [1, 1]} : vector<32x256xf32> to vector<32x128xf32>
    %104 = arith.truncf %103 : vector<32x128xf32> to vector<32x128xbf16>
    %cst_47 = arith.constant dense<0.000000e+00> : vector<256x128xf32>
    %105 = tpu.matmul %20, %104, %cst_47 {dimension_numbers = #tpu.dot_dimension_numbers<[1], [0], [0], [1], [0, 0, 1, 1], [], []>} : vector<256x32xbf16>, vector<32x128xbf16>, vector<256x128xf32> -> vector<256x128xf32>
    %106 = vector.shape_cast %102 : vector<32x128xf32> to vector<32x1x128xf32>
    %107 = vector.shape_cast %106 : vector<32x1x128xf32> to vector<32x1x128xf32>
    %108 = vector.broadcast %107 : vector<32x1x128xf32> to vector<32x8x128xf32>
    %109 = vector.shape_cast %108 : vector<32x8x128xf32> to vector<256x128xf32>
    %110 = arith.addf %105, %109 : vector<256x128xf32>
    %111 = vector.extract_strided_slice %19 {offsets = [0, 256], sizes = [256, 128], strides = [1, 1]} : vector<256x384xf32> to vector<256x128xf32>
    %112 = arith.addf %110, %111 : vector<256x128xf32>
    %cst_48 = arith.constant 0.000000e+00 : f32
    %113 = vector.broadcast %cst_48 : f32 to vector<256x128xf32>
    %114 = arith.subf %113, %112 : vector<256x128xf32>
    %115 = math.exp %114 : vector<256x128xf32>
    %cst_49 = arith.constant 1.000000e+00 : f32
    %116 = vector.broadcast %cst_49 : f32 to vector<256x128xf32>
    %117 = arith.addf %116, %115 : vector<256x128xf32>
    %118 = tpu.reciprocal %117 {approx = true} : vector<256x128xf32> -> vector<256x128xf32>
    %119 = arith.mulf %118, %118 : vector<256x128xf32>
    %120 = arith.truncf %119 : vector<256x128xf32> to vector<256x128xbf16>
    %cst_50 = arith.constant dense<0.000000e+00> : vector<32x128xf32>
    %121 = tpu.matmul %21, %120, %cst_50 {dimension_numbers = #tpu.dot_dimension_numbers<[1], [0], [0], [1], [0, 0, 1, 1], [], []>} : vector<32x256xbf16>, vector<256x128xbf16>, vector<32x128xf32> -> vector<32x128xf32>
    %c2_51 = arith.constant 2 : index
    %122 = memref.load %arg12[%c2_51] : memref<3xf32, #tpu.memory_space<smem>>
    %123 = vector.broadcast %122 : f32 to vector<32x128xf32>
    %124 = arith.mulf %123, %97 : vector<32x128xf32>
    %125 = arith.addf %124, %121 : vector<32x128xf32>
    %cst_52 = arith.constant 0.000000e+00 : f32
    %126 = vector.broadcast %cst_52 : f32 to vector<32x128xf32>
    %127 = arith.maximumf %125, %126 : vector<32x128xf32>
    %128 = math.absf %125 : vector<32x128xf32>
    %cst_53 = arith.constant 0.000000e+00 : f32
    %129 = vector.broadcast %cst_53 : f32 to vector<32x128xf32>
    %130 = arith.subf %129, %128 : vector<32x128xf32>
    %131 = math.exp %130 : vector<32x128xf32>
    %cst_54 = arith.constant 1.000000e+00 : f32
    %132 = vector.broadcast %cst_54 : f32 to vector<32x128xf32>
    %133 = arith.addf %132, %131 : vector<32x128xf32>
    %134 = math.log %133 : vector<32x128xf32>
    %135 = arith.addf %127, %134 : vector<32x128xf32>
    %c0_55 = arith.constant 0 : index
    %c0_56 = arith.constant 0 : index
    %136 = vector.load %arg13[%c0_55, %c0_56] : memref<32x128xf32, #tpu.memory_space<vmem>>, vector<32x128xf32>
    tpu.vector_store %arg13[%c0_55, %c0_56], %135 {strides = array<i32>} : memref<32x128xf32, #tpu.memory_space<vmem>>, vector<32x128xf32>,
    return
  }
  func.func @transform_0(%arg0: i32) -> (i32, i32) {
    %c0_i32 = arith.constant 0 : i32
    %c0_i32_0 = arith.constant 0 : i32
    return %arg0, %c0_i32 : i32, i32
  }
  func.func @transform_1(%arg0: i32) -> (i32, i32) {
    %c0_i32 = arith.constant 0 : i32
    %c0_i32_0 = arith.constant 0 : i32
    return %arg0, %c0_i32 : i32, i32
  }
  func.func @transform_2(%arg0: i32) -> (i32, i32) {
    %c0_i32 = arith.constant 0 : i32
    %c0_i32_0 = arith.constant 0 : i32
    return %arg0, %c0_i32 : i32, i32
  }
  func.func @transform_3(%arg0: i32) -> (i32, i32) {
    %c0_i32 = arith.constant 0 : i32
    %c0_i32_0 = arith.constant 0 : i32
    return %arg0, %c0_i32 : i32, i32
  }
  func.func @transform_4(%arg0: i32) -> (i32, i32) {
    %c0_i32 = arith.constant 0 : i32
    %c0_i32_0 = arith.constant 0 : i32
    %c0_i32_1 = arith.constant 0 : i32
    return %c0_i32, %c0_i32_0 : i32, i32
  }
  func.func @transform_5(%arg0: i32) -> (i32, i32) {
    %c0_i32 = arith.constant 0 : i32
    %c0_i32_0 = arith.constant 0 : i32
    %c0_i32_1 = arith.constant 0 : i32
    return %c0_i32, %c0_i32_0 : i32, i32
  }
  func.func @transform_6(%arg0: i32) -> (i32, i32) {
    %c0_i32 = arith.constant 0 : i32
    %c0_i32_0 = arith.constant 0 : i32
    %c0_i32_1 = arith.constant 0 : i32
    return %c0_i32, %c0_i32_0 : i32, i32
  }
  func.func @transform_7(%arg0: i32) -> (i32, i32) {
    %c0_i32 = arith.constant 0 : i32
    %c0_i32_0 = arith.constant 0 : i32
    %c0_i32_1 = arith.constant 0 : i32
    return %c0_i32, %c0_i32_0 : i32, i32
  }
  func.func @transform_8(%arg0: i32) -> (i32, i32, i32) {
    %c0_i32 = arith.constant 0 : i32
    %c0_i32_0 = arith.constant 0 : i32
    %c0_i32_1 = arith.constant 0 : i32
    %c0_i32_2 = arith.constant 0 : i32
    return %c0_i32, %c0_i32_0, %c0_i32_1 : i32, i32, i32
  }
  func.func @transform_9(%arg0: i32) -> (i32, i32) {
    %c0_i32 = arith.constant 0 : i32
    %c0_i32_0 = arith.constant 0 : i32
    %c0_i32_1 = arith.constant 0 : i32
    return %c0_i32, %c0_i32_0 : i32, i32
  }
  func.func @transform_10(%arg0: i32) -> (i32, i32) {
    %c0_i32 = arith.constant 0 : i32
    %c0_i32_0 = arith.constant 0 : i32
    %c0_i32_1 = arith.constant 0 : i32
    return %c0_i32, %c0_i32_0 : i32, i32
  }
  func.func @transform_11(%arg0: i32) -> i32 {
    %c0_i32 = arith.constant 0 : i32
    %c0_i32_0 = arith.constant 0 : i32
    return %c0_i32 : i32
  }
  func.func @transform_12(%arg0: i32) -> (i32, i32) {
    %c0_i32 = arith.constant 0 : i32
    %c0_i32_0 = arith.constant 0 : i32
    return %arg0, %c0_i32 : i32, i32
  }
}

</mosaic_0001>

<bundles_post_ra>
// kernel: tpu_custom_call.1
= control target key start
LH: loop header
LB: loop body
LE: loop exit
PB: predicated region body
PF: predicated region fallthrough
CT: control target
= control target key end

     0   :  { %s8263_s0 = inlined_call_operand.vmem [shape: f32[64,32], index: 0, kind: input, shape index: {}]   ;;  %s8264_s1 = inlined_call_operand.vmem [shape: f32[512,16], index: 1, kind: input, shape index: {}]   ;;  %s8265_s2 = inlined_call_operand.vmem [shape: bf16[512,32], index: 2, kind: input, shape index: {}]   ;;  %s8266_s3 = inlined_call_operand.vmem [shape: bf16[64,256], index: 3, kind: input, shape index: {}]   ;;  %s8267_s4 = inlined_call_operand.vmem [shape: bf16[32,128], index: 4, kind: input, shape index: {}]   ;;  %s8268_s5 = inlined_call_operand.vmem [shape: f32[1,128], index: 5, kind: input, shape index: {}]   ;;  %s8269_s6 = inlined_call_operand.vmem [shape: bf16[16,128], index: 6, kind: input, shape index: {}]   ;;  %s8270_s7 = inlined_call_operand.vmem [shape: f32[1,128], index: 7, kind: input, shape index: {}]   ;;  %s8271_s8 = inlined_call_operand.vmem [shape: bf16[3,128,256], index: 8, kind: input, shape index: {}]   ;;  %s8272_s9 = inlined_call_operand.vmem [shape: bf16[128,384], index: 9, kind: input, shape index: {}]   ;;  %s8273_s10 = inlined_call_operand.vmem [shape: f32[1,384], index: 10, kind: input, shape index: {}]   ;;  %s8274_s11 = inlined_call_operand.vmem [shape: f32[3], index: 11, kind: input, shape index: {}]   ;;  %s8275_s12 = inlined_call_operand.hbm [shape: f32[64,128], index: 12, kind: output, shape index: {}]  }
   0x1   :  { %8291 = sst [smem:[#allocation53_spill]] %s8263_s0 }
   0x2   :  { %8292 = sst [smem:[#allocation54_spill]] %s8264_s1 }
   0x3   :  { %8293 = sst [smem:[#allocation55_spill]] %s8266_s3 }
   0x4   :  { %17 = vsyncpa [#allocation4], 0 }
   0x5   :  { %18 = vsyncpa [#allocation3], 0 }
   0x6   :  { %20 = vsyncpa [#allocation3 + $0x1], 0  ;;  %s6269_s21 = smov 0   ;;  %s6271_s22 = smov 0  }
   0x7   :  { %s6273_s23 = smov 0   ;;  %s6275_s24 = smov 0  }
   0x8 LB: > { %s6290_s25 = sadd.s32 4294967295, %s6196_s24   ;;  %s4745_s26 = sadd.s32 4294967294, %s6196_s24   ;;  %s6196_s24 = sphi %s6275_s24, %s8432_s24   ;;  %s6192_s23 = sphi %s6273_s23, %s8431_s23   ;;  %s6188_s22 = sphi %s6271_s22, %s8430_s22   ;;  %s6184_s21 = sphi %s6269_s21, %s8429_s21  }
   0x9   : > { %s6294_s27 = sadd.s32 1, %s6196_s24   ;;  %s305_s28 = sadd.s32 1, %s6192_s23 }
   0xa   : > { %s302_s29 = ssub.s32 %s6196_s24, %s6294_s27  ;;  %p315_p0 = scmp.ne.s32.totalorder %s6192_s23, %s6188_s22 }
   0xb   : > { %p303_p1 = scmp.eq.s32.totalorder %s302_s29, 0  ;;  %p316_p2 = scmp.eq.s32.totalorder %s6290_s25, 1 }
   0xc   : > { %p321_p3 = scmp.ne.s32.totalorder %s6188_s22, %s6184_s21  ;;  %p322_p4 = scmp.eq.s32.totalorder %s4745_s26, 1 }
   0xd   : > { %s6305_s30 = scalar_select %p303_p1, %s6192_s23, %s305_s28  }
   0xe   : > { %p6307_p5 = por %p316_p2, %p315_p0  ;;  %p6311_p6 = por %p322_p4, %p321_p3 }
   0xf   : > { %p4746_p7 = scmp.ge.s32.totalorder %s6196_s24, 1  ;;  %p329_p8 = scmp.lt.s32.totalorder %s6196_s24, 3 }
  0x10   : > { %p5474_p9 = scmp.eq.s32.totalorder %s6290_s25, 0  ;;  %s363_s18 = sshll.u32 %s8274_s11, 4  ;;  %s364_s18 = int_to_ptr.vmem [resolvable:$true] %s363_s18 }
  0x11   : > { %p6318_p10 = pnand %p4746_p7, %p329_p8  ;;  %s6115_s19 = scalar_lea.vmem %s364_s18, 16 }
  0x12   : > { %p6116_p13 = scmp.ne.s32.totalorder %s364_s18, %s6115_s19  ;;  %p6123_p3 = scmp.lt.s32.totalorder %s364_s18, %s364_s18 }
  0x13   : > { %p5466_p11 = pneg %p6318_p10  ;;  %p6124_p4 = scmp.lt.s32.totalorder %s6115_s19, %s6115_s19 }
  0x15   : > { %p5467_p12 = pnand %p5474_p9, %p5466_p11  ;;  %p6125_p7 = por %p6124_p4, %p6123_p3 }
  0x17   : > { %p6117_p0 = pneg %p5467_p12 }
  0x19   : > { %p6118_p1 = pnand %p6117_p0, %p6116_p13 }
  0x1b   : > { %p6119_p2 = pneg %p6118_p1 }
  0x1d   : > { %p6126_p8 = pnand %p6125_p7, %p6119_p2 }
  0x1f   : > { %6129 = shalt.err (!%p6126_p8)
}
  0x20   : > { %s6198_s20 = smov [#allocation2]   ;;  %413 = sbr.rel (%p6318_p10) target bundleno = 2767 (0xacf), region = 68 }
  0x21   : > { %5469 = dma.vmem_to_smem (!%p5467_p12), %s364_s18, 16, %s6198_s20, [#allocation4]  }
  0x27   : > { %6175 = dma.done.wait (%p5474_p9), [#allocation4], 16  }
  0x28   : > { %6177 = vsyncadd (%p5474_p9), [#allocation4], 4294967280 }
  0x29   : > { %419 = sfence }
  0x2a   : > { %v5514_v0 = vld [vmem:[%s8267_s4] sm:$0xff]   ;;  %s4752_s29 = sshll.u32 %s6290_s25, 2  ;;  %v5515_v1 = vld [vmem:[%s8267_s4 + $0x8] sm:$0xff]   ;;  %s4754_s19 = sshll.u32 %s6290_s25, 5  ;;  %vm528_vm0 = vcmask 261120   ;;  %vm647_vm1 = vcmask 130048  }
  0x2b   : > { %p473_p11 = scmp.lt.s32.totalorder %s4752_s29, 7  ;;  %5148 = vmatprep.subr.bf16.mxu0 %v5514_v0  ;;  %v5516_v2 = vld [vmem:[%s8269_s6] sm:$0xff]   ;;  %p479_p9 = scmp.lt.s32.totalorder %s4754_s19, 63  ;;  %v5520_v3 = vld [vmem:[%s8272_s9 + $0x8] ss:$12 sps:$4 sm:$0xff]  }
  0x2c   : > { %5149 = vmatpush3.bf16.msra.mxu0 %v5514_v0  ;;  %5346 = vmatprep.subr.bf16.mxu1 %v5516_v2  ;;  %s8297_s0 = sld [smem:[#allocation53_spill]]  ;;  %v5519_v10 = vld [vmem:[%s8272_s9 + $0x4] ss:$12 sps:$4 sm:$0xff]   ;;  %s8298_s1 = sld [smem:[#allocation54_spill]]  ;;  %v5517_v22 = vld [vmem:[%s8272_s9] ss:$12 sps:$4 sm:$0xff]  }
  0x2d   : > { %s8434_s29 = smov (!%p473_p11, %s4752_s29), 7  ;;  %5150 = vmatprep.subr.bf16.mxu0 %v5515_v1  ;;  %5347 = vmatpush3.bf16.msra.mxu1 %v5516_v2  ;;  %s8436_s19 = smov (!%p479_p9, %s4754_s19), 63  ;;  %v5523_v29 = vld [vmem:[%s8272_s9 + $0x1c] ss:$12 sps:$4 sm:$0xff]   ;;  %v5521_v33 = vld [vmem:[%s8272_s9 + $0x18] ss:$12 sps:$4 sm:$0xff]  }
  0x2e   : > { %s8276_s20 = sshll.u32 %s8434_s29, 3  ;;  %5190 = vmatprep.subr.bf16.mxu1 %v5520_v3  ;;  %s4755_s18 = sshll.u32 %s8436_s19, 3  ;;  %v5524_v34 = vld [vmem:[%s8272_s9 + $0x20] ss:$12 sps:$4 sm:$0xff]   ;;  %v5525_v43 = vld [vmem:[%s8272_s9 + $0x30] ss:$12 sps:$4 sm:$0xff]  }
  0x2f   : > { %v5527_v38 = vld [vmem:[%s8272_s9 + $0x34] ss:$12 sps:$4 sm:$0xff]   ;;  %v5528_v44 = vld [vmem:[%s8272_s9 + $0x38] ss:$12 sps:$4 sm:$0xff]   ;;  %v5532_v49 = vld [vmem:[%s8272_s9 + $0x50] ss:$12 sps:$4 sm:$0xff]  }
  0x30   : > { %5151 = vmatpush3.bf16.msra.mxu0 %v5515_v1  ;;  %v5531_v47 = vld [vmem:[%s8272_s9 + $0x4c] ss:$12 sps:$4 sm:$0xff]   ;;  %v5529_v56 = vld [vmem:[%s8272_s9 + $0x48] ss:$12 sps:$4 sm:$0xff]   ;;  %s8300_s3 = sld [smem:[#allocation55_spill]]  ;;  %s4908_s28 = sld [smem:[#allocation2 + $0x1]] }
  0x31   : > { %5156 = vmatprep.subr.bf16.mxu0 %v5516_v2 }
  0x32   : > { %s476_s15 = scalar_lea.vmem %s8297_s0, %s8276_s20  ;;  %s6367_s20 = scalar_lea.vmem %s8298_s1, %s4755_s18 }
  0x33   : > { %v499_v4 = vld [vmem:[%s476_s15] sm:$0xff]  ;;  %v500_v5 = vld [vmem:[%s476_s15 + $0x8] sm:$0xff]  ;;  %v501_v6 = vld [vmem:[%s476_s15 + $0x10] sm:$0xff]  ;;  %s8299_s0 = sshll.u32 %s8434_s29, 3  ;;  %s4757_s29 = sshll.u32 %s8436_s19, 2 }
  0x34   : > { %v507_v7 = vpack.c.bf16 %v500_v5, %v499_v4  ;;  %v502_v8 = vld [vmem:[%s476_s15 + $0x18] sm:$0xff]  ;;  %v584_v11 = vld [vmem:[%s6367_s20] sm:$0xff]  ;;  %v585_v12 = vld [vmem:[%s6367_s20 + $0x8] sm:$0xff]  ;;  %s6647_s16 = scalar_lea.vmem %s8265_s2, %s4757_s29  ;;  %s2551_s1 = sld [smem:[#allocation2]] }
  0x35   : > { %v508_v9 = vpack.c.bf16 %v502_v8, %v501_v6  ;;  %v618_v13 = vpack.c.bf16 %v585_v12, %v584_v11  ;;  %v586_v14 = vld [vmem:[%s6367_s20 + $0x10] sm:$0xff]  ;;  %v587_v15 = vld [vmem:[%s6367_s20 + $0x18] sm:$0xff]  ;;  %v588_v16 = vld [vmem:[%s6367_s20 + $0x20] sm:$0xff] }
  0x36   : > { %5152 = vmatprep.mubr.msk.bf16.mxu0 %vm528_vm0, %v507_v7  ;;  %v589_v17 = vld [vmem:[%s6367_s20 + $0x28] sm:$0xff]  ;;  %v619_v18 = vpack.c.bf16 %v587_v15, %v586_v14  ;;  %v600_v20 = vld [vmem:[%s6367_s20 + $0x80] sm:$0xff]  ;;  %v602_v24 = vld [vmem:[%s6367_s20 + $0x90] sm:$0xff]  ;;  %s6443_s18 = scalar_lea.vmem %s8300_s3, %s8299_s0  ;;  %s4964_s0 = sshll.u32 %s6290_s25, 9 }
  0x37   : > { %5153 = vmatmul.mubr.msk.bf16.vlgmr.msra.gmra.mrb[0].mxu0 %vm528_vm0, %v508_v9  ;;  %v620_v19 = vpack.c.bf16 %v589_v17, %v588_v16  ;;  %v601_v21 = vld [vmem:[%s6367_s20 + $0x88] sm:$0xff]  ;;  %v603_v25 = vld [vmem:[%s6367_s20 + $0x98] sm:$0xff]  ;;  %v604_v26 = vld [vmem:[%s6367_s20 + $0xa0] sm:$0xff]  ;;  %v8277_v17 = vmov 0   ;;  %s8218_s26 = scalar_lea.hbm %s8275_s12, %s4964_s0 }
  0x38   : > { %5157 = vmatpush3.bf16.msra.mxu0 %v5516_v2  ;;  %5158 = vmatprep.mubr.msk.bf16.mxu0 %vm647_vm1, %v618_v13  ;;  %v626_v23 = vpack.c.bf16 %v601_v21, %v600_v20  ;;  %v627_v27 = vpack.c.bf16 %v603_v25, %v602_v24  ;;  %v605_v28 = vld [vmem:[%s6367_s20 + $0xa8] sm:$0xff]  ;;  %v590_v30 = vld [vmem:[%s6367_s20 + $0x30] sm:$0xff]  ;;  %v591_v31 = vld [vmem:[%s6367_s20 + $0x38] sm:$0xff] }
  0x39   : > { %1050 = vmatprep.subr.bf16.mxu0 %v5519_v10  ;;  %v628_v32 = vpack.c.bf16 %v605_v28, %v604_v26  ;;  %v592_v35 = vld [vmem:[%s6367_s20 + $0x40] sm:$0xff]  ;;  %v593_v36 = vld [vmem:[%s6367_s20 + $0x48] sm:$0xff]  ;;  %v606_v37 = vld [vmem:[%s6367_s20 + $0xb0] sm:$0xff]  ;;  %v621_v42 = vpack.c.bf16 %v591_v31, %v590_v30 }
  0x3a   : > { %5174 = vmatprep.mubr.msk.bf16.mxu1 %vm647_vm1, %v626_v23  ;;  %v607_v39 = vld [vmem:[%s6367_s20 + $0xb8] sm:$0xff]  ;;  %v608_v40 = vld [vmem:[%s6367_s20 + $0xc0] sm:$0xff]  ;;  %v609_v41 = vld [vmem:[%s6367_s20 + $0xc8] sm:$0xff]  ;;  %v622_v45 = vpack.c.bf16 %v593_v36, %v592_v35 }
  0x3b   : > { %5175 = vmatmul.mubr.msk.bf16.vlgmr.msra.gmra.mrb[0].mxu1 %vm647_vm1, %v627_v27  ;;  %v629_v46 = vpack.c.bf16 %v607_v39, %v606_v37  ;;  %v630_v48 = vpack.c.bf16 %v609_v41, %v608_v40  ;;  %v594_v50 = vld [vmem:[%s6367_s20 + $0x50] sm:$0xff]  ;;  %v595_v51 = vld [vmem:[%s6367_s20 + $0x58] sm:$0xff]  ;;  %v596_v52 = vld [vmem:[%s6367_s20 + $0x60] sm:$0xff] }
  0x3c   : > { %5178 = vmatprep.mubr.msk.bf16.mxu1 %vm647_vm1, %v628_v32  ;;  %5191 = vmatpush3.bf16.msra.mxu1 %v5520_v3  ;;  %v597_v53 = vld [vmem:[%s6367_s20 + $0x68] sm:$0xff]  ;;  %v610_v54 = vld [vmem:[%s6367_s20 + $0xd0] sm:$0xff]  ;;  %v611_v55 = vld [vmem:[%s6367_s20 + $0xd8] sm:$0xff]  ;;  %v623_v59 = vpack.c.bf16 %v595_v51, %v594_v50 }
  0x3d   : > { %5192 = vmatprep.subr.bf16.mxu1 %v5524_v34  ;;  %v612_v57 = vld [vmem:[%s6367_s20 + $0xe0] sm:$0xff]  ;;  %v613_v58 = vld [vmem:[%s6367_s20 + $0xe8] sm:$0xff]  ;;  %v624_v60 = vpack.c.bf16 %v597_v53, %v596_v52  ;;  %v631_v61 = vpack.c.bf16 %v611_v55, %v610_v54  ;;  %v598_v63 = vld [vmem:[%s6367_s20 + $0x70] sm:$0xff] }
  0x3e   : > { %v632_v62 = vpack.c.bf16 %v613_v58, %v612_v57  ;;  %v599_v0 = vld [vmem:[%s6367_s20 + $0x78] sm:$0xff]  ;;  %v614_v1 = vld [vmem:[%s6367_s20 + $0xf0] sm:$0xff]  ;;  %v5533_v6 = vld [vmem:[%s8272_s9 + $0x60] ss:$12 sps:$4 sm:$0xff]  }
  0x3f   : > { %5159 = vmatmul.mubr.msk.bf16.vlgmr.msra.gmra.mrb[4].mxu0 %vm647_vm1, %v619_v18  ;;  %v615_v2 = vld [vmem:[%s6367_s20 + $0xf8] sm:$0xff]  ;;  %v625_v3 = vpack.c.bf16 %v599_v0, %v598_v63  ;;  %v5535_v5 = vld [vmem:[%s8272_s9 + $0x64] ss:$12 sps:$4 sm:$0xff]   ;;  %v5536_v7 = vld [vmem:[%s8272_s9 + $0x68] ss:$12 sps:$4 sm:$0xff]   ;;  %s4957_s20 = sld [smem:[#allocation2 + $0x2]] }
  0x40   : > { %5162 = vmatprep.mubr.msk.bf16.mxu0 %vm647_vm1, %v620_v19  ;;  %1051 = vmatpush1.bf16.msra.mxu0 %v5517_v22  ;;  %v633_v4 = vpack.c.bf16 %v615_v2, %v614_v1  ;;  %v5539_v8 = vld [vmem:[%s8272_s9 + $0x7c] ss:$12 sps:$4 sm:$0xff]   ;;  %v5537_v9 = vld [vmem:[%s8272_s9 + $0x78] ss:$12 sps:$4 sm:$0xff]   ;;  %v5540_v10 = vld [vmem:[%s8272_s9 + $0x80] ss:$12 sps:$4 sm:$0xff]  }
  0x41   : > { %1052 = vmatprep.subr.bf16.mxu0 %v5523_v29  ;;  %5193 = vmatpush3.bf16.msra.mxu1 %v5524_v34  ;;  %v5543_v11 = vld [vmem:[%s8272_s9 + $0x94] ss:$12 sps:$4 sm:$0xff]   ;;  %v5541_v12 = vld [vmem:[%s8272_s9 + $0x90] ss:$12 sps:$4 sm:$0xff]   ;;  %v5544_v13 = vld [vmem:[%s8272_s9 + $0x98] ss:$12 sps:$4 sm:$0xff]  }
  0x42   : > { %5194 = vmatprep.subr.bf16.mxu1 %v5528_v44  ;;  %v5547_v14 = vld [vmem:[%s8272_s9 + $0xac] ss:$12 sps:$4 sm:$0xff]   ;;  %v5545_v15 = vld [vmem:[%s8272_s9 + $0xa8] ss:$12 sps:$4 sm:$0xff]   ;;  %v5548_v16 = vld [vmem:[%s8272_s9 + $0xb0] ss:$12 sps:$4 sm:$0xff]  }
  0x43   : > { %5179 = vmatmul.mubr.msk.bf16.gmra.mrb[4].mxu1 %vm647_vm1, %v629_v46  ;;  %v5551_v18 = vld [vmem:[%s8271_s8 + $0x4] ss:$8 sps:$4 sm:$0xff]   ;;  %v4761_v20 = vld [vmem:[%s8268_s5] ss:$0 sm:$0xff]  ;;  %v5554_v52 = vld [vmem:[%s8271_s8 + $0x14] ss:$8 sps:$4 sm:$0xff]  }
  0x44   : > { %1053 = vmatpush1.bf16.msra.mxu0 %v5521_v33  ;;  %5182 = vmatprep.mubr.msk.bf16.mxu1 %vm647_vm1, %v630_v48  ;;  %v6513_v31 = vld [vmem:[%s8270_s7] ss:$0 sm:$0xff]  ;;  %v5557_v1 = vld [vmem:[%s8271_s8 + $0x24] ss:$8 sps:$4 sm:$0xff]  }
  0x45   : > { %1054 = vmatprep.subr.bf16.mxu0 %v5527_v38  ;;  %5195 = vmatpush3.bf16.msra.mxu1 %v5528_v44  ;;  %v5549_v50 = vld [vmem:[%s8271_s8] ss:$8 sps:$4 sm:$0xff]  }
  0x46   : > { %5196 = vmatprep.subr.bf16.mxu1 %v5532_v49 }
  0x47   : > { %5163 = vmatmul.mubr.msk.bf16.gmra.mrb[8].mxu0 %vm647_vm1, %v621_v42 }
  0x48   : > { %5166 = vmatprep.mubr.msk.bf16.mxu0 %vm647_vm1, %v622_v45  ;;  %1055 = vmatpush1.bf16.msra.mxu0 %v5525_v43 }
  0x49   : > { %1056 = vmatprep.subr.bf16.mxu0 %v5531_v47  ;;  %5197 = vmatpush3.bf16.msra.mxu1 %v5532_v49 }
  0x4a   : > { %5198 = vmatprep.subr.bf16.mxu1 %v5536_v7 }
  0x4b   : > { %5183 = vmatmul.mubr.msk.bf16.gmra.mrb[8].mxu1 %vm647_vm1, %v631_v61 }
  0x4c   : > { %1057 = vmatpush1.bf16.msra.mxu0 %v5529_v56  ;;  %5186 = vmatprep.mubr.msk.bf16.mxu1 %vm647_vm1, %v632_v62 }
  0x4d   : > { %1058 = vmatprep.subr.bf16.mxu0 %v5535_v5  ;;  %5199 = vmatpush3.bf16.msra.mxu1 %v5536_v7 }
  0x4e   : > { %5200 = vmatprep.subr.bf16.mxu1 %v5540_v10 }
  0x4f   : > { %5167 = vmatmul.mubr.msk.bf16.gmra.mrb[12].mxu0 %vm647_vm1, %v623_v59  ;;  %v5552_v59 = vld [vmem:[%s8271_s8 + $0x10] ss:$8 sps:$4 sm:$0xff]  }
  0x50   : > { %5170 = vmatprep.mubr.msk.bf16.mxu0 %vm647_vm1, %v624_v60  ;;  %1059 = vmatpush1.bf16.msra.mxu0 %v5533_v6 }
  0x51   : > { %1060 = vmatprep.subr.bf16.mxu0 %v5539_v8  ;;  %5201 = vmatpush3.bf16.msra.mxu1 %v5540_v10  ;;  %v5555_v10 = vld [vmem:[%s8271_s8 + $0x20] ss:$8 sps:$4 sm:$0xff]  }
  0x52   : > { %5202 = vmatprep.subr.bf16.mxu1 %v5544_v13 }
  0x53   : > { %5187 = vmatmul.mubr.msk.bf16.gmra.mrb[12].mxu1 %vm647_vm1, %v633_v4 }
  0x54   : > { %1061 = vmatpush1.bf16.msra.mxu0 %v5537_v9 }
  0x55   : > { %1062 = vmatprep.subr.bf16.mxu0 %v5543_v11  ;;  %5203 = vmatpush3.bf16.msra.mxu1 %v5544_v13 }
  0x56   : > { %5204 = vmatprep.subr.bf16.mxu1 %v5548_v16 }
  0x57   : > { %5171 = vmatmul.mubr.msk.bf16.gmra.mrb[16].mxu0 %vm647_vm1, %v625_v3 }
  0x58   : > { %1063 = vmatpush1.bf16.msra.mxu0 %v5541_v12  ;;  %1082 = vmatprep.mubr.bf16.mxu0 %v8277_v17  ;;  %v5560_v12 = vld [vmem:[%s8271_s8 + $0x34] ss:$8 sps:$4 sm:$0xff]  }
  0x59   : > { %1064 = vmatprep.subr.bf16.mxu0 %v5547_v14  ;;  %5205 = vmatpush3.bf16.msra.mxu1 %v5548_v16 }
  0x5a   : > { %1538 = vmatprep.subr.bf16.mxu1 %v5551_v18 }
  0x5c   : > { %1065 = vmatpush1.bf16.msra.mxu0 %v5545_v15 }
 0x10a   : > { %v5154_v19 = vpop.f32.mrb[0].mxu0 }
 0x10b   : > { %v569_v21 = vpop.f32.mrb[1].mxu0  ;;  %v6498_v23 = vadd.f32 %v5154_v19, %v4761_v20 }
 0x10c   : > { %v5155_v22 = vpop.f32.mrb[2].mxu0  ;;  %v6502_v26 = vadd.f32 %v4761_v20, %v569_v21 }
 0x10d   : > { %8301 = vst [vmem:[#allocation8_spill] sm:$0xff] %v6498_v23  ;;  %v6500_v24 = vadd.f32 %v5155_v22, %v4761_v20  ;;  %v572_v25 = vpop.f32.mrb[3].mxu0 }
 0x10e   : > { %8303 = vst [vmem:[#allocation10_spill] sm:$0xff] %v6502_v26  ;;  %v6504_v27 = vadd.f32 %v4761_v20, %v572_v25  ;;  %v5176_v33 = vpop.f32.mrb[0].mxu1  ;;  %v5558_v20 = vld [vmem:[%s8271_s8 + $0x30] ss:$8 sps:$4 sm:$0xff]  }
 0x10f   : > { %8302 = vst [vmem:[#allocation9_spill] sm:$0xff] %v6500_v24  ;;  %v1457_v28 = vpack.c.bf16 %v6500_v24, %v6498_v23  ;;  %v803_v35 = vadd.f32 %v5176_v33, %v6513_v31  ;;  %v794_v36 = vpop.f32.mrb[1].mxu1  ;;  %v5563_v33 = vld [vmem:[%s8271_s8 + $0x44] ss:$8 sps:$4 sm:$0xff]  }
 0x110   : > { %8304 = vst [vmem:[#allocation11_spill] sm:$0xff] %v6504_v27  ;;  %v1456_v29 = vpack.c.bf16 %v6504_v27, %v6502_v26  ;;  %v795_v40 = vadd.f32 %v6513_v31, %v794_v36  ;;  %v5177_v41 = vpop.f32.mrb[2].mxu1 }
 0x111   : > { %v806_v44 = vadd.f32 %v5177_v41, %v6513_v31  ;;  %v797_v45 = vpop.f32.mrb[3].mxu1 }
 0x112   : > { %v5160_v30 = vpop.f32.mrb[4].mxu0  ;;  %v798_v47 = vadd.f32 %v6513_v31, %v797_v45 }
 0x113   : > { %v730_v32 = vpop.f32.mrb[5].mxu0  ;;  %v739_v37 = vadd.f32 %v5160_v30, %v6513_v31  ;;  %v6523_v49 = vpack.c.bf16 %v806_v44, %v803_v35  ;;  %v5566_v44 = vld [vmem:[%s8271_s8 + $0x54] ss:$8 sps:$4 sm:$0xff]  }
 0x114   : > { %v5161_v34 = vpop.f32.mrb[6].mxu0  ;;  %v731_v42 = vadd.f32 %v6513_v31, %v730_v32  ;;  %v6528_v51 = vpack.c.bf16 %v798_v47, %v795_v40 }
 0x115   : > { %v742_v38 = vadd.f32 %v5161_v34, %v6513_v31  ;;  %v733_v39 = vpop.f32.mrb[7].mxu0 }
 0x116   : > { %v734_v43 = vadd.f32 %v6513_v31, %v733_v39  ;;  %v5180_v55 = vpop.f32.mrb[4].mxu1 }
 0x117   : > { %v890_v46 = vpack.c.bf16 %v742_v38, %v739_v37  ;;  %v819_v57 = vadd.f32 %v5180_v55, %v6513_v31  ;;  %v810_v58 = vpop.f32.mrb[5].mxu1 }
 0x118   : > { %v889_v48 = vpack.c.bf16 %v734_v43, %v731_v42  ;;  %v811_v63 = vadd.f32 %v6513_v31, %v810_v58  ;;  %v5181_v0 = vpop.f32.mrb[6].mxu1  ;;  %v5561_v42 = vld [vmem:[%s8271_s8 + $0x40] ss:$8 sps:$4 sm:$0xff]  }
 0x119   : > { %v822_v4 = vadd.f32 %v5181_v0, %v6513_v31  ;;  %v813_v5 = vpop.f32.mrb[7].mxu1 }
 0x11a   : > { %v5164_v53 = vpop.f32.mrb[8].mxu0  ;;  %1083 = vmatmul.mubr.bf16.vlgmr.msra.gmra.mrb[20].mxu0 %v889_v48  ;;  %5206 = vmatprep.mubr.bf16.mxu1 %v889_v48  ;;  %v814_v7 = vadd.f32 %v6513_v31, %v813_v5 }
 0x11b   : > { %v746_v54 = vpop.f32.mrb[9].mxu0  ;;  %5207 = vmatmul.mubr.bf16.vlgmr.msra.gmra.mrb[16].mxu1 %v890_v46  ;;  %1092 = vmatprep.mubr.bf16.mxu0 %v8277_v17  ;;  %v755_v60 = vadd.f32 %v5164_v53, %v6513_v31  ;;  %v6550_v9 = vpack.c.bf16 %v822_v4, %v819_v57  ;;  %v5564_v53 = vld [vmem:[%s8271_s8 + $0x50] ss:$8 sps:$4 sm:$0xff]   ;;  %v5567_v4 = vld [vmem:[%s8271_s8 + $0x60] ss:$8 sps:$4 sm:$0xff]  }
 0x11c   : > { %v5165_v56 = vpop.f32.mrb[10].mxu0  ;;  %1539 = vmatpush1.bf16.msra.mxu1 %v5549_v50  ;;  %v747_v2 = vadd.f32 %v6513_v31, %v746_v54  ;;  %v6555_v11 = vpack.c.bf16 %v814_v7, %v811_v63  ;;  %v5572_v7 = vld [vmem:[%s8271_s8 + $0x74] ss:$8 sps:$4 sm:$0xff]  }
 0x11d   : > { %v758_v61 = vadd.f32 %v5165_v56, %v6513_v31  ;;  %v749_v62 = vpop.f32.mrb[11].mxu0  ;;  %1540 = vmatprep.subr.bf16.mxu1 %v5554_v52 }
 0x11e   : > { %v750_v3 = vadd.f32 %v6513_v31, %v749_v62  ;;  %v5184_v15 = vpop.f32.mrb[8].mxu1 }
 0x11f   : > { %v6547_v6 = vpack.c.bf16 %v758_v61, %v755_v60  ;;  %v835_v18 = vadd.f32 %v5184_v15, %v6513_v31  ;;  %v826_v19 = vpop.f32.mrb[9].mxu1 }
 0x120   : > { %v891_v8 = vpack.c.bf16 %v750_v3, %v747_v2  ;;  %1541 = vmatpush1.bf16.msra.mxu1 %v5552_v59  ;;  %v827_v30 = vadd.f32 %v6513_v31, %v826_v19  ;;  %v5185_v32 = vpop.f32.mrb[10].mxu1  ;;  %v5569_v59 = vld [vmem:[%s8271_s8 + $0x64] ss:$8 sps:$4 sm:$0xff]  }
 0x121   : > { %1542 = vmatprep.subr.bf16.mxu1 %v5557_v1  ;;  %v838_v36 = vadd.f32 %v5185_v32, %v6513_v31  ;;  %v829_v37 = vpop.f32.mrb[11].mxu1 }
 0x122   : > { %v5168_v13 = vpop.f32.mrb[12].mxu0  ;;  %1093 = vmatmul.mubr.bf16.gmra.mrb[24].mxu0 %v890_v46  ;;  %5210 = vmatprep.mubr.bf16.mxu1 %v891_v8  ;;  %v830_v39 = vadd.f32 %v6513_v31, %v829_v37 }
 0x123   : > { %v762_v14 = vpop.f32.mrb[13].mxu0  ;;  %5211 = vmatmul.mubr.bf16.gmra.mrb[20].mxu1 %v6547_v6  ;;  %1102 = vmatprep.mubr.bf16.mxu0 %v8277_v17  ;;  %v771_v21 = vadd.f32 %v5168_v13, %v6513_v31  ;;  %v6576_v41 = vpack.c.bf16 %v838_v36, %v835_v18 }
 0x124   : > { %v5169_v16 = vpop.f32.mrb[14].mxu0  ;;  %1543 = vmatpush1.bf16.msra.mxu1 %v5555_v10  ;;  %v763_v34 = vadd.f32 %v6513_v31, %v762_v14  ;;  %v6581_v43 = vpack.c.bf16 %v830_v39, %v827_v30 }
 0x125   : > { %v774_v22 = vadd.f32 %v5169_v16, %v6513_v31  ;;  %v765_v25 = vpop.f32.mrb[15].mxu0  ;;  %1544 = vmatprep.subr.bf16.mxu1 %v5560_v12 }
 0x126   : > { %v766_v35 = vadd.f32 %v6513_v31, %v765_v25  ;;  %v5188_v47 = vpop.f32.mrb[12].mxu1 }
 0x127   : > { %v894_v38 = vpack.c.bf16 %v774_v22, %v771_v21  ;;  %v851_v50 = vadd.f32 %v5188_v47, %v6513_v31  ;;  %v842_v52 = vpop.f32.mrb[13].mxu1 }
 0x128   : > { %v893_v40 = vpack.c.bf16 %v766_v35, %v763_v34  ;;  %1545 = vmatpush1.bf16.msra.mxu1 %v5558_v20  ;;  %v843_v57 = vadd.f32 %v6513_v31, %v842_v52  ;;  %v5189_v58 = vpop.f32.mrb[14].mxu1 }
 0x129   : > { %1546 = vmatprep.subr.bf16.mxu1 %v5563_v33  ;;  %v854_v62 = vadd.f32 %v5189_v58, %v6513_v31  ;;  %v845_v63 = vpop.f32.mrb[15].mxu1 }
 0x12a   : > { %v5172_v45 = vpop.f32.mrb[16].mxu0  ;;  %1103 = vmatmul.mubr.bf16.gmra.mrb[28].mxu0 %v891_v8  ;;  %5214 = vmatprep.mubr.bf16.mxu1 %v893_v40  ;;  %v846_v1 = vadd.f32 %v6513_v31, %v845_v63 }
 0x12b   : > { %v778_v46 = vpop.f32.mrb[17].mxu0  ;;  %5215 = vmatmul.mubr.bf16.gmra.mrb[24].mxu1 %v894_v38  ;;  %1112 = vmatprep.mubr.bf16.mxu0 %v8277_v17  ;;  %v787_v54 = vadd.f32 %v5172_v45, %v6513_v31  ;;  %v904_v3 = vpack.c.bf16 %v854_v62, %v851_v50 }
 0x12c   : > { %v5173_v48 = vpop.f32.mrb[18].mxu0  ;;  %1547 = vmatpush1.bf16.msra.mxu1 %v5561_v42  ;;  %v779_v60 = vadd.f32 %v6513_v31, %v778_v46  ;;  %v903_v5 = vpack.c.bf16 %v846_v1, %v843_v57 }
 0x12d   : > { %v790_v55 = vadd.f32 %v5173_v48, %v6513_v31  ;;  %v781_v56 = vpop.f32.mrb[19].mxu0  ;;  %1548 = vmatprep.subr.bf16.mxu1 %v5566_v44 }
 0x12e   : > { %v782_v61 = vadd.f32 %v6513_v31, %v781_v56  ;;  %v5570_v31 = vld [vmem:[%s8271_s8 + $0x70] ss:$8 sps:$4 sm:$0xff]  }
 0x12f   : > { %v896_v0 = vpack.c.bf16 %v790_v55, %v787_v54 }
 0x130   : > { %v895_v2 = vpack.c.bf16 %v782_v61, %v779_v60  ;;  %1549 = vmatpush1.bf16.msra.mxu1 %v5564_v53 }
 0x131   : > { %1550 = vmatprep.subr.bf16.mxu1 %v5569_v59 }
 0x132   : > { %1113 = vmatmul.mubr.bf16.gmra.mrb[32].mxu0 %v6547_v6  ;;  %5218 = vmatprep.mubr.bf16.mxu1 %v895_v2 }
 0x133   : > { %5219 = vmatmul.mubr.bf16.gmra.mrb[28].mxu1 %v896_v0  ;;  %1122 = vmatprep.mubr.bf16.mxu0 %v8277_v17 }
 0x134   : > { %5222 = vmatprep.mubr.bf16.mxu1 %v6528_v51  ;;  %1551 = vmatpush1.bf16.msra.mxu1 %v5567_v4 }
 0x135   : > { %1552 = vmatprep.subr.bf16.mxu1 %v5572_v7  ;;  %v5576_v7 = vld [vmem:[%s6647_s16 + $0x18] sm:$0xff]  }
 0x138   : > { %1553 = vmatpush1.bf16.msra.mxu1 %v5570_v31 }
 0x13a   : > { %1123 = vmatmul.mubr.bf16.gmra.mrb[36].mxu0 %v893_v40 }
 0x13b   : > { %5223 = vmatmul.mubr.bf16.gmra.mrb[32].mxu1 %v6523_v49  ;;  %1132 = vmatprep.mubr.bf16.mxu0 %v8277_v17 }
 0x13c   : > { %5226 = vmatprep.mubr.bf16.mxu1 %v6555_v11 }
 0x142   : > { %1133 = vmatmul.mubr.bf16.gmra.mrb[40].mxu0 %v894_v38 }
 0x143   : > { %5227 = vmatmul.mubr.bf16.gmra.mrb[36].mxu1 %v6550_v9  ;;  %1142 = vmatprep.mubr.bf16.mxu0 %v8277_v17 }
 0x144   : > { %5230 = vmatprep.mubr.bf16.mxu1 %v6581_v43 }
 0x14a   : > { %1143 = vmatmul.mubr.bf16.gmra.mrb[44].mxu0 %v895_v2  ;;  %v5575_v2 = vld [vmem:[%s6647_s16 + $0x10] sm:$0xff]  }
 0x14b   : > { %5231 = vmatmul.mubr.bf16.gmra.mrb[40].mxu1 %v6576_v41  ;;  %1152 = vmatprep.mubr.bf16.mxu0 %v8277_v17 }
 0x14c   : > { %5234 = vmatprep.mubr.bf16.mxu1 %v903_v5 }
 0x152   : > { %1153 = vmatmul.mubr.bf16.gmra.mrb[48].mxu0 %v896_v0  ;;  %v5574_v0 = vld [vmem:[%s6647_s16 + $0x8] sm:$0xff]  }
 0x153   : > { %5235 = vmatmul.mubr.bf16.gmra.mrb[44].mxu1 %v904_v3  ;;  %1162 = vmatprep.mubr.bf16.mxu0 %v8277_v17 }
 0x154   : > { %1570 = vmatprep.mubr.bf16.mxu1 %v8277_v17 }
 0x15a   : > { %1163 = vmatmul.mubr.bf16.gmra.mrb[52].mxu0 %v6528_v51 }
 0x15b   : > { %1571 = vmatmul.mubr.bf16.vlgmr.msra.gmra.mrb[48].mxu1 %v1456_v29  ;;  %1172 = vmatprep.mubr.bf16.mxu0 %v8277_v17 }
 0x15c   : > { %1580 = vmatprep.mubr.bf16.mxu1 %v8277_v17 }
 0x162   : > { %1173 = vmatmul.mubr.bf16.gmra.mrb[56].mxu0 %v6523_v49 }
 0x163   : > { %1581 = vmatmul.mubr.bf16.gmra.mrb[52].mxu1 %v1457_v28  ;;  %1182 = vmatprep.mubr.bf16.mxu0 %v8277_v17  ;;  %v6650_v28 = vld [vmem:[%s6647_s16] sm:$0xff]  }
 0x164   : > { %5242 = vmatprep.mubr.msk.bf16.mxu1 %vm528_vm0, %v6650_v28 }
 0x16a   : > { %1183 = vmatmul.mubr.bf16.gmra.mrb[60].mxu0 %v6555_v11 }
 0x16b   : > { %1192 = vmatprep.mubr.bf16.mxu0 %v8277_v17 }
 0x172   : > { %1193 = vmatmul.mubr.bf16.gmra.mrb[64].mxu0 %v6550_v9 }
 0x173   : > { %1202 = vmatprep.mubr.bf16.mxu0 %v8277_v17 }
 0x17a   : > { %1203 = vmatmul.mubr.bf16.gmra.mrb[68].mxu0 %v6581_v43 }
 0x17b   : > { %1212 = vmatprep.mubr.bf16.mxu0 %v8277_v17 }
 0x182   : > { %1213 = vmatmul.mubr.bf16.gmra.mrb[72].mxu0 %v6576_v41 }
 0x183   : > { %1222 = vmatprep.mubr.bf16.mxu0 %v8277_v17 }
 0x18a   : > { %1223 = vmatmul.mubr.bf16.gmra.mrb[76].mxu0 %v903_v5 }
 0x18b   : > { %1232 = vmatprep.mubr.bf16.mxu0 %v8277_v17 }
 0x192   : > { %1233 = vmatmul.mubr.bf16.gmra.mrb[80].mxu0 %v904_v3 }
 0x1ed   : > { %v6654_v29 = vpop.f32.mrb[20].mxu0 }
 0x1ee   : > { %v6656_v49 = vpop.f32.mrb[21].mxu0 }
 0x1ef   : > { %8305 = vst [vmem:[#allocation12_spill] sm:$0xff] %v6656_v49  ;;  %v6658_v51 = vpop.f32.mrb[22].mxu0 }
 0x1f0   : > { %v6660_v6 = vpop.f32.mrb[23].mxu0 }
 0x1f1   : > { %8306 = vst [vmem:[#allocation13_spill] sm:$0xff] %v6660_v6 }
 0x1f5   : > { %v6662_v8 = vpop.f32.mrb[24].mxu0 }
 0x1f6   : > { %v6664_v9 = vpop.f32.mrb[25].mxu0 }
 0x1f7   : > { %8307 = vst [vmem:[#allocation14_spill] sm:$0xff] %v6664_v9  ;;  %v6666_v10 = vpop.f32.mrb[26].mxu0 }
 0x1f8   : > { %v6668_v11 = vpop.f32.mrb[27].mxu0 }
 0x1f9   : > { %8308 = vst [vmem:[#allocation15_spill] sm:$0xff] %v6668_v11 }
 0x1fd   : > { %v6670_v12 = vpop.f32.mrb[28].mxu0 }
 0x1fe   : > { %v6672_v13 = vpop.f32.mrb[29].mxu0 }
 0x1ff   : > { %8309 = vst [vmem:[#allocation16_spill] sm:$0xff] %v6672_v13  ;;  %v6674_v14 = vpop.f32.mrb[30].mxu0 }
 0x200   : > { %v6676_v15 = vpop.f32.mrb[31].mxu0 }
 0x201   : > { %8310 = vst [vmem:[#allocation17_spill] sm:$0xff] %v6676_v15 }
 0x205   : > { %v6678_v16 = vpop.f32.mrb[32].mxu0 }
 0x206   : > { %v6680_v18 = vpop.f32.mrb[33].mxu0 }
 0x207   : > { %8311 = vst [vmem:[#allocation18_spill] sm:$0xff] %v6680_v18  ;;  %v6682_v19 = vpop.f32.mrb[34].mxu0 }
 0x208   : > { %v6684_v20 = vpop.f32.mrb[35].mxu0 }
 0x209   : > { %8312 = vst [vmem:[#allocation19_spill] sm:$0xff] %v6684_v20 }
 0x20d   : > { %v6686_v21 = vpop.f32.mrb[36].mxu0 }
 0x20e   : > { %v6688_v22 = vpop.f32.mrb[37].mxu0 }
 0x20f   : > { %8313 = vst [vmem:[#allocation20_spill] sm:$0xff] %v6688_v22  ;;  %v6690_v25 = vpop.f32.mrb[38].mxu0 }
 0x210   : > { %v6692_v30 = vpop.f32.mrb[39].mxu0 }
 0x211   : > { %8314 = vst [vmem:[#allocation21_spill] sm:$0xff] %v6692_v30 }
 0x215   : > { %v6694_v32 = vpop.f32.mrb[40].mxu0 }
 0x216   : > { %v6696_v33 = vpop.f32.mrb[41].mxu0 }
 0x217   : > { %8315 = vst [vmem:[#allocation22_spill] sm:$0xff] %v6696_v33  ;;  %v6698_v34 = vpop.f32.mrb[42].mxu0 }
 0x218   : > { %v6700_v35 = vpop.f32.mrb[43].mxu0 }
 0x219   : > { %8316 = vst [vmem:[#allocation23_spill] sm:$0xff] %v6700_v35 }
 0x21d   : > { %v6702_v36 = vpop.f32.mrb[44].mxu0 }
 0x21e   : > { %v6704_v37 = vpop.f32.mrb[45].mxu0 }
 0x21f   : > { %8317 = vst [vmem:[#allocation24_spill] sm:$0xff] %v6704_v37  ;;  %v6706_v38 = vpop.f32.mrb[46].mxu0 }
 0x220   : > { %v6708_v39 = vpop.f32.mrb[47].mxu0 }
 0x221   : > { %8318 = vst [vmem:[#allocation25_spill] sm:$0xff] %v6708_v39 }
 0x225   : > { %v6710_v40 = vpop.f32.mrb[48].mxu0 }
 0x226   : > { %v6712_v41 = vpop.f32.mrb[49].mxu0 }
 0x227   : > { %8319 = vst [vmem:[#allocation26_spill] sm:$0xff] %v6712_v41  ;;  %v6714_v42 = vpop.f32.mrb[50].mxu0 }
 0x228   : > { %v6716_v43 = vpop.f32.mrb[51].mxu0 }
 0x229   : > { %8320 = vst [vmem:[#allocation27_spill] sm:$0xff] %v6716_v43 }
 0x22d   : > { %v6718_v44 = vpop.f32.mrb[52].mxu0 }
 0x22e   : > { %v6720_v45 = vpop.f32.mrb[53].mxu0  ;;  %v6722_v46 = vpop.f32.mrb[48].mxu1 }
 0x22f   : > { %8321 = vst [vmem:[#allocation28_spill] sm:$0xff] %v6720_v45  ;;  %v6724_v47 = vpop.f32.mrb[54].mxu0  ;;  %v1574_v48 = vpop.f32.mrb[49].mxu1 }
 0x230   : > { %v6726_v50 = vpop.f32.mrb[55].mxu0  ;;  %v6728_v52 = vpop.f32.mrb[50].mxu1 }
 0x231   : > { %8322 = vst [vmem:[#allocation29_spill] sm:$0xff] %v6726_v50  ;;  %v1578_v53 = vpop.f32.mrb[51].mxu1 }
 0x232   : > { %v1591_v54 = vpack.c.bf16 %v1578_v53, %v1574_v48  ;;  %v5577_v48 = vld [vmem:[%s6647_s16 + $0x20] sm:$0xff]  }
 0x234   : > { %5238 = vmatprep.subr.bf16.mxu1 %v1591_v54 }
 0x235   : > { %v6730_v55 = vpop.f32.mrb[56].mxu0  ;;  %5239 = vmatpush3.bf16.msra.mxu1 %v1591_v54 }
 0x236   : > { %v6732_v56 = vpop.f32.mrb[57].mxu0  ;;  %v6734_v57 = vpop.f32.mrb[52].mxu1 }
 0x237   : > { %8323 = vst [vmem:[#allocation30_spill] sm:$0xff] %v6732_v56  ;;  %v6736_v58 = vpop.f32.mrb[58].mxu0  ;;  %v1584_v59 = vpop.f32.mrb[53].mxu1 }
 0x238   : > { %v6738_v60 = vpop.f32.mrb[59].mxu0  ;;  %v6740_v61 = vpop.f32.mrb[54].mxu1 }
 0x239   : > { %8324 = vst [vmem:[#allocation31_spill] sm:$0xff] %v6738_v60  ;;  %v1588_v62 = vpop.f32.mrb[55].mxu1 }
 0x23a   : > { %v1592_v63 = vpack.c.bf16 %v1588_v62, %v1584_v59  ;;  %v5578_v62 = vld [vmem:[%s6647_s16 + $0x28] sm:$0xff]  }
 0x23c   : > { %5240 = vmatprep.subr.bf16.mxu1 %v1592_v63 }
 0x23d   : > { %v6743_v1 = vpop.f32.mrb[60].mxu0  ;;  %5241 = vmatpush3.bf16.msra.mxu1 %v1592_v63 }
 0x23e   : > { %v6746_v3 = vpop.f32.mrb[61].mxu0 }
 0x23f   : > { %8325 = vst [vmem:[#allocation32_spill] sm:$0xff] %v6746_v3  ;;  %v6748_v4 = vpop.f32.mrb[62].mxu0 }
 0x240   : > { %v6750_v5 = vpop.f32.mrb[63].mxu0  ;;  %5243 = vmatmul.mubr.msk.bf16.vlgmr.msra.gmra.mrb[56].mxu1 %vm528_vm0, %v5574_v0  ;;  %v5579_v0 = vld [vmem:[%s6647_s16 + $0x30] sm:$0xff]  }
 0x241   : > { %8326 = vst [vmem:[#allocation33_spill] sm:$0xff] %v6750_v5  ;;  %5246 = vmatprep.mubr.msk.bf16.mxu1 %vm528_vm0, %v5575_v2 }
 0x245   : > { %v6755_v31 = vpop.f32.mrb[64].mxu0 }
 0x246   : > { %v6758_v53 = vpop.f32.mrb[65].mxu0 }
 0x247   : > { %8327 = vst [vmem:[#allocation34_spill] sm:$0xff] %v6758_v53  ;;  %v6760_v54 = vpop.f32.mrb[66].mxu0 }
 0x248   : > { %v6762_v59 = vpop.f32.mrb[67].mxu0  ;;  %5247 = vmatmul.mubr.msk.bf16.gmra.mrb[60].mxu1 %vm528_vm0, %v5576_v7 }
 0x249   : > { %8328 = vst [vmem:[#allocation35_spill] sm:$0xff] %v6762_v59  ;;  %5250 = vmatprep.mubr.msk.bf16.mxu1 %vm528_vm0, %v5577_v48  ;;  %v5580_v59 = vld [vmem:[%s6647_s16 + $0x38] sm:$0xff]   ;;  %v5581_v48 = vld [vmem:[%s6647_s16 + $0x40] sm:$0xff]  }
 0x24d   : > { %v6767_v63 = vpop.f32.mrb[68].mxu0 }
 0x24e   : > { %v6770_v2 = vpop.f32.mrb[69].mxu0 }
 0x24f   : > { %8329 = vst [vmem:[#allocation36_spill] sm:$0xff] %v6770_v2  ;;  %v6772_v17 = vpop.f32.mrb[70].mxu0 }
 0x250   : > { %v6774_v5 = vpop.f32.mrb[71].mxu0  ;;  %5251 = vmatmul.mubr.msk.bf16.gmra.mrb[64].mxu1 %vm528_vm0, %v5578_v62 }
 0x251   : > { %8330 = vst [vmem:[#allocation37_spill] sm:$0xff] %v6774_v5  ;;  %5254 = vmatprep.mubr.msk.bf16.mxu1 %vm528_vm0, %v5579_v0  ;;  %v5582_v5 = vld [vmem:[%s6647_s16 + $0x48] sm:$0xff]   ;;  %v5583_v0 = vld [vmem:[%s6647_s16 + $0x50] sm:$0xff]  }
 0x255   : > { %v6779_v7 = vpop.f32.mrb[72].mxu0 }
 0x256   : > { %v6782_v53 = vpop.f32.mrb[73].mxu0 }
 0x257   : > { %8331 = vst [vmem:[#allocation38_spill] sm:$0xff] %v6782_v53  ;;  %v6784_v3 = vpop.f32.mrb[74].mxu0 }
 0x258   : > { %v6786_v60 = vpop.f32.mrb[75].mxu0  ;;  %5255 = vmatmul.mubr.msk.bf16.gmra.mrb[68].mxu1 %vm528_vm0, %v5580_v59  ;;  %v5584_v59 = vld [vmem:[%s6647_s16 + $0x58] sm:$0xff]  }
 0x259   : > { %8332 = vst [vmem:[#allocation39_spill] sm:$0xff] %v6786_v60  ;;  %5258 = vmatprep.mubr.msk.bf16.mxu1 %vm528_vm0, %v5581_v48  ;;  %v5585_v48 = vld [vmem:[%s6647_s16 + $0x60] sm:$0xff]  }
 0x25d   : > { %v6791_v62 = vpop.f32.mrb[76].mxu0 }
 0x25e   : > { %v6794_v2 = vpop.f32.mrb[77].mxu0 }
 0x25f   : > { %8333 = vst [vmem:[#allocation40_spill] sm:$0xff] %v6794_v2  ;;  %v6796_v56 = vpop.f32.mrb[78].mxu0  ;;  %v5587_v2 = vld [vmem:[%s6647_s16 + $0x70] sm:$0xff]  }
 0x260   : > { %8334 = vst [vmem:[#allocation41_spill] sm:$0xff] %v6796_v56  ;;  %v6798_v53 = vpop.f32.mrb[79].mxu0  ;;  %5259 = vmatmul.mubr.msk.bf16.gmra.mrb[72].mxu1 %vm528_vm0, %v5582_v5  ;;  %v5588_v5 = vld [vmem:[%s6647_s16 + $0x78] sm:$0xff]  }
 0x261   : > { %8335 = vst [vmem:[#allocation42_spill] sm:$0xff] %v6798_v53  ;;  %5262 = vmatprep.mubr.msk.bf16.mxu1 %vm528_vm0, %v5583_v0  ;;  %v5586_v53 = vld [vmem:[%s6647_s16 + $0x68] sm:$0xff]   ;;  %v6200_v0 = vmov 1966171168  }
 0x265   : > { %v6803_v60 = vpop.f32.mrb[80].mxu0 }
 0x266   : > { %v6806_v50 = vpop.f32.mrb[81].mxu0 }
 0x267   : > { %8336 = vst [vmem:[#allocation43_spill] sm:$0xff] %v6806_v50  ;;  %v6808_v45 = vpop.f32.mrb[82].mxu0  ;;  %v1599_v50 = vunpack.c.l.s4 %v6200_v0 }
 0x268   : > { %8337 = vst [vmem:[#allocation44_spill] sm:$0xff] %v6808_v45  ;;  %v6810_v43 = vpop.f32.mrb[83].mxu0  ;;  %5263 = vmatmul.mubr.msk.bf16.gmra.mrb[76].mxu1 %vm528_vm0, %v5584_v59 }
 0x269   : > { %8338 = vst [vmem:[#allocation45_spill] sm:$0xff] %v6810_v43  ;;  %5266 = vmatprep.mubr.msk.bf16.mxu1 %vm528_vm0, %v5585_v48  ;;  %v907_v43 = vlaneseq  ;;  %v1600_v41 = vunpack.c.0.s8 %v1599_v50 }
 0x26b   : > { %v6822_v59 = vshrl.u32 %v907_v43, 7 }
 0x26d   : > { %8339 = vst [vmem:[#allocation46_spill] sm:$0xff] %v6822_v59  ;;  %v6825_v48 = vsub.s32 %v1600_v41, %v6822_v59  ;;  %v6828_v39 = vsub.s32 0, %v6822_v59 }
 0x270   : > { %5267 = vmatmul.mubr.msk.bf16.gmra.mrb[80].mxu1 %vm528_vm0, %v5586_v53  ;;  %v905_v53 = vld [vmem:[%s8273_s10] sm:$0x7] }
 0x271   : > { %5270 = vmatprep.mubr.msk.bf16.mxu1 %vm528_vm0, %v5587_v2  ;;  %v5591_v2 = vld [vmem:[%s6443_s18 + $0x4] ss:$8 sps:$4 sm:$0xff]   ;;  %v6839_v43 = vrot.slane %v905_v53, %v6828_v39 }
 0x272   : > { %2534 = vmatprep.mubr.bf16.mxu0 %v5591_v2 }
 0x273   : > { %v6844_v0 = vadd.f32 %v6654_v29, %v6839_v43  ;;  %v6848_v37 = vadd.f32 %v6658_v51, %v6839_v43  ;;  %v6852_v35 = vadd.f32 %v6662_v8, %v6839_v43  ;;  %v6860_v53 = vadd.f32 %v6670_v12, %v6839_v43 }
 0x274   : > { %v6864_v29 = vadd.f32 %v6674_v14, %v6839_v43  ;;  %v1653_v51 = vrot.slane %v6728_v52, %v6825_v48  ;;  %v6873_v8 = vadd.f32 %v6678_v16, %v6839_v43  ;;  %v6881_v12 = vadd.f32 %v6686_v21, %v6839_v43 }
 0x275   : > { %v1646_v14 = vcombine.high %v6728_v52, %v6728_v52  ;;  %v6901_v21 = vadd.f32 %v6698_v34, %v6839_v43  ;;  %v6905_v52 = vadd.f32 %v6702_v36, %v6839_v43  ;;  %v6921_v30 = vadd.f32 %v6714_v42, %v6839_v43 }
 0x276   : > { %v6925_v36 = vadd.f32 %v6718_v44, %v6839_v43  ;;  %v6932_v22 = vadd.f32 %v6724_v47, %v6839_v43  ;;  %v6942_v44 = vrot.slane %v1653_v51, %v6825_v48  ;;  %v7020_v23 = vadd.f32 %v6743_v1, %v6839_v43 }
 0x278   : > { %5271 = vmatmul.mubr.msk.bf16.gmra.mrb[84].mxu1 %vm528_vm0, %v5588_v5  ;;  %v1604_v5 = vrot.slane %v6722_v46, %v6825_v48  ;;  %8340 = vst [vmem:[#allocation47_spill] sm:$0xff] %v6925_v36  ;;  %8341 = vst [vmem:[#allocation48_spill] sm:$0xff] %v6932_v22 }
 0x279   : > { %5278 = vmatprep.mubr.msk.bf16.mxu1 %vm528_vm0, %v6650_v28  ;;  %v1597_v28 = vcombine.high %v6722_v46, %v6722_v46  ;;  %v6856_v46 = vadd.f32 %v6666_v10, %v6839_v43  ;;  %v6877_v10 = vadd.f32 %v6682_v19, %v6839_v43  ;;  %v6897_v19 = vadd.f32 %v6694_v32, %v6839_v43 }
 0x27a   : > { %v1612_v50 = vcombine.high %v1604_v5, %v1604_v5  ;;  %v6867_v2 = vrot.slane %v1604_v5, %v6825_v48  ;;  %v1695_v32 = vcombine.high %v6734_v57, %v6734_v57  ;;  %8344 = vst [vmem:[#allocation51_spill] sm:$0xff] %v7020_v23 }
 0x27b   : > { %v1611_v41 = vrot.slane %v1597_v28, %v6825_v48  ;;  %v6887_v28 = vadd.f32 %v6690_v25, %v6839_v43  ;;  %v6909_v25 = vadd.f32 %v6706_v38, %v6839_v43  ;;  %v1660_v38 = vrot.slane %v1646_v14, %v6825_v48 }
 0x27c   : > { %v6893_v16 = vrot.slane %v1612_v50, %v6825_v48  ;;  %v1661_v50 = vcombine.high %v1653_v51, %v1653_v51  ;;  %v1642_v34 = vcombine.high %v6867_v2, %v6867_v2  ;;  %v1744_v14 = vcombine.high %v6740_v61, %v6740_v61 }
 0x27d   : > { %v1613_v5 = vcombine.high %v1611_v41, %v1611_v41  ;;  %v6890_v33 = vrot.slane %v1611_v41, %v6825_v48  ;;  %v6913_v41 = vadd.f32 %v6710_v40, %v6839_v43  ;;  %v1702_v40 = vrot.slane %v6734_v57, %v6825_v48 }
 0x27e   : > { %v1644_v20 = vcombine.high %v6893_v16, %v6893_v16  ;;  %v1751_v57 = vrot.slane %v6740_v61, %v6825_v48  ;;  %v1796_v47 = vrot.slane %v6867_v2, %v6828_v39  ;;  %v6951_v15 = vrot.slane %v1661_v50, %v6825_v48 }
 0x27f   : > { %v1643_v42 = vcombine.high %v6890_v33, %v6890_v33  ;;  %v6939_v18 = vrot.slane %v1613_v5, %v6825_v48  ;;  %v1709_v13 = vrot.slane %v1695_v32, %v6825_v48  ;;  %v1804_v5 = vrot.slane %v1642_v34, %v6828_v39 }
 0x280   : > { %v1800_v51 = vrot.slane %v6893_v16, %v6828_v39  ;;  %v1662_v11 = vcombine.high %v1660_v38, %v1660_v38  ;;  %v6958_v9 = vrot.slane %v1660_v38, %v6825_v48  ;;  %v6962_v61 = vadd.f32 %v6730_v55, %v6839_v43 }
 0x281   : > { %v1710_v6 = vcombine.high %v1702_v40, %v1702_v40  ;;  %v6966_v2 = vadd.f32 %v6736_v58, %v6839_v43  ;;  %v1808_v50 = vrot.slane %v1644_v20, %v6828_v39  ;;  %v6970_v32 = vrot.slane %v1643_v42, %v6828_v39 }
 0x282   : > { %8342 = vst [vmem:[#allocation49_spill] sm:$0xff] %v6962_v61  ;;  %v1645_v16 = vcombine.high %v6939_v18, %v6939_v18  ;;  %v6975_v34 = vrot.slane %v1702_v40, %v6825_v48  ;;  %v6978_v38 = vrot.slane %v1744_v14, %v6825_v48  ;;  %v1759_v55 = vcombine.high %v1751_v57, %v1751_v57 }
 0x283   : > { %8343 = vst [vmem:[#allocation50_spill] sm:$0xff] %v6966_v2  ;;  %v1711_v58 = vcombine.high %v1709_v13, %v1709_v13  ;;  %v6983_v59 = vrot.slane %v1709_v13, %v6825_v48  ;;  %v1691_v20 = vcombine.high %v6942_v44, %v6942_v44  ;;  %v1693_v42 = vcombine.high %v6951_v15, %v6951_v15 }
 0x284   : > { %v6990_v40 = vrot.slane %v1710_v6, %v6825_v48  ;;  %v6993_v14 = vrot.slane %v1751_v57, %v6825_v48  ;;  %v1692_v49 = vcombine.high %v6958_v9, %v6958_v9  ;;  %v1824_v13 = vrot.slane %v1645_v16, %v6828_v39 }
 0x285   : > { %v7005_v6 = vrot.slane %v1662_v11, %v6825_v48  ;;  %v1760_v57 = vcombine.high %v6978_v38, %v6978_v38  ;;  %v7011_v24 = vrot.slane %v6978_v38, %v6825_v48  ;;  %v7014_v26 = vrot.slane %v1759_v55, %v6825_v48 }
 0x286   : > { %v1740_v16 = vcombine.high %v6975_v34, %v6975_v34  ;;  %v7024_v11 = vadd.f32 %v6748_v4, %v6839_v43  ;;  %v7027_v56 = vrot.slane %v1691_v20, %v6828_v39  ;;  %v7030_v38 = vrot.slane %v1693_v42, %v6828_v39 }
 0x287   : > { %v7033_v2 = vrot.slane %v1692_v49, %v6828_v39  ;;  %v1742_v23 = vcombine.high %v6990_v40, %v6990_v40  ;;  %v1694_v20 = vcombine.high %v7005_v6, %v7005_v6  ;;  %v1741_v45 = vcombine.high %v6983_v59, %v6983_v59 }
 0x288   : > { %8345 = vst [vmem:[#allocation52_spill] sm:$0xff] %v7024_v11  ;;  %v7047_v1 = vrot.slane %v1740_v16, %v6828_v39  ;;  %v7055_v42 = vrot.slane %v1711_v58, %v6825_v48 }
 0x313   : > { %v5244_v27 = vpop.f32.mrb[56].mxu1 }
 0x314   : > { %v2124_v55 = vadd.f32 %v5244_v27, %v1804_v5  ;;  %v2115_v22 = vpop.f32.mrb[57].mxu1 }
 0x315   : > { %v2116_v4 = vadd.f32 %v2115_v22, %v1796_v47  ;;  %v5245_v11 = vpop.f32.mrb[58].mxu1 }
 0x316   : > { %v2244_v49 = vadd.f32 %v2124_v55, %v6852_v35  ;;  %v2127_v5 = vadd.f32 %v5245_v11, %v1808_v50  ;;  %v2118_v36 = vpop.f32.mrb[59].mxu1  ;;  %v7059_v50 = vrot.slane %v1742_v23, %v6828_v39  ;;  %v1791_v23 = vcombine.high %v7014_v26, %v7014_v26 }
 0x317   : > { %v2242_v47 = vadd.f32 %v2116_v4, %v6844_v0  ;;  %v2119_v61 = vadd.f32 %v2118_v36, %v1800_v51  ;;  %v7065_v0 = vrot.slane %v1694_v20, %v6828_v39  ;;  %v1789_v36 = vcombine.high %v6993_v14, %v6993_v14 }
 0x318   : > { %v2276_v27 = vsub.f32 0.0, %v2244_v49  ;;  %v2245_v35 = vadd.f32 %v2127_v5, %v6856_v46 }
 0x319   : > { %v2274_v11 = vsub.f32 0.0, %v2242_v47  ;;  %v2243_v55 = vadd.f32 %v2119_v61, %v6848_v37  ;;  %v7074_v47 = vrot.slane %v1741_v45, %v6828_v39  ;;  %v1743_v37 = vcombine.high %v7055_v42, %v7055_v42 }
 0x31a   : > { %v2310_v51 = vmul.f32 1.442695, %v2276_v27  ;;  %v2277_v58 = vsub.f32 0.0, %v2245_v35  ;;  %v1880_v35 = vrot.slane %v7055_v42, %v6828_v39  ;;  %v7085_v45 = vrot.slane %v1760_v57, %v6825_v48 }
 0x31b   : > { %v2306_v4 = vmul.f32 1.442695, %v2274_v11  ;;  %v2275_v49 = vsub.f32 0.0, %v2243_v55  ;;  %v5248_v5 = vpop.f32.mrb[60].mxu1  ;;  %v8346_v11 = vrot.slane %v6890_v33, %v6828_v39  ;;  %v7098_v57 = vadd.f32 %v6755_v31, %v6839_v43 }
 0x31c   : > { %5643 = vpow2.f32 %v2310_v51  ;;  %v2312_v61 = vmul.f32 1.442695, %v2277_v58  ;;  %v2140_v20 = vadd.f32 %v5248_v5, %v6970_v32  ;;  %v2131_v27 = vpop.f32.mrb[61].mxu1  ;;  %v1896_v32 = vrot.slane %v7014_v26, %v6828_v39 }
 0x31d   : > { %5645 = vpow2.f32 %v2306_v4  ;;  %v2308_v46 = vmul.f32 1.442695, %v2275_v49  ;;  %v2132_v55 = vadd.f32 %v2131_v27, %v8346_v11  ;;  %v5249_v16 = vpop.f32.mrb[62].mxu1  ;;  %v8347_v49 = vrot.slane %v6939_v18, %v6828_v39 }
 0x31e   : > { %5647 = vpow2.f32 %v2312_v61  ;;  %v2248_v51 = vadd.f32 %v2140_v20, %v6873_v8  ;;  %v2143_v58 = vadd.f32 %v5249_v16, %v1824_v13  ;;  %v2134_v22 = vpop.f32.mrb[63].mxu1  ;;  %v1790_v5 = vcombine.high %v7011_v24, %v7011_v24 }
 0x31f   : > { %5649 = vpow2.f32 %v2308_v46  ;;  %v2246_v4 = vadd.f32 %v2132_v55, %v6860_v53  ;;  %v2135_v33 = vadd.f32 %v2134_v22, %v8347_v49  ;;  %v7102_v16 = vrot.slane %v1789_v36, %v6828_v39 }
 0x320   : > { %v2280_v8 = vsub.f32 0.0, %v2248_v51  ;;  %v2249_v13 = vadd.f32 %v2143_v58, %v6877_v10  ;;  %v7106_v61 = vrot.slane %v1791_v23, %v6828_v39  ;;  %v1792_v18 = vcombine.high %v7085_v45, %v7085_v45 }
 0x321   : > { %v2278_v46 = vsub.f32 0.0, %v2246_v4  ;;  %v2247_v53 = vadd.f32 %v2135_v33, %v6864_v29  ;;  %v7111_v31 = vrot.slane %v1743_v37, %v6828_v39  ;;  %v1908_v10 = vrot.slane %v7011_v24, %v6828_v39 }
 0x322   : > { %v2318_v22 = vmul.f32 1.442695, %v2280_v8  ;;  %v2281_v20 = vsub.f32 0.0, %v2249_v13  ;;  %v7117_v36 = vadd.f32 %v6760_v54, %v6839_v43  ;;  %v7120_v23 = vrot.slane %v1790_v5, %v6828_v39 }
 0x323   : > { %v2314_v27 = vmul.f32 1.442695, %v2278_v46  ;;  %v2279_v29 = vsub.f32 0.0, %v2247_v53  ;;  %v5252_v11 = vpop.f32.mrb[64].mxu1  ;;  %v1912_v37 = vrot.slane %v7085_v45, %v6828_v39  ;;  %v8348_v54 = vrot.slane %v6942_v44, %v6828_v39 }
 0x324   : > { %5651 = vpow2.f32 %v2318_v22  ;;  %v2320_v55 = vmul.f32 1.442695, %v2281_v20  ;;  %v2156_v51 = vadd.f32 %v5252_v11, %v7027_v56  ;;  %v2147_v58 = vpop.f32.mrb[65].mxu1  ;;  %v7129_v8 = vrot.slane %v1792_v18, %v6828_v39 }
 0x325   : > { %5653 = vpow2.f32 %v2314_v27  ;;  %v2316_v4 = vmul.f32 1.442695, %v2279_v29  ;;  %v2148_v49 = vadd.f32 %v2147_v58, %v8348_v54  ;;  %v5253_v33 = vpop.f32.mrb[66].mxu1  ;;  %v7133_v13 = vadd.f32 %v6767_v63, %v6839_v43 }
 0x326   : > { %v5644_v5 = vpop.eup %5643  ;;  %5655 = vpow2.f32 %v2320_v55  ;;  %v2252_v56 = vadd.f32 %v2156_v51, %v6897_v19  ;;  %v2159_v46 = vadd.f32 %v5253_v33, %v7030_v38  ;;  %v2150_v53 = vpop.f32.mrb[67].mxu1  ;;  %v8349_v18 = vrot.slane %v6951_v15, %v6828_v39 }
 0x327   : > { %v5646_v22 = vpop.eup %5645  ;;  %v2372_v20 = vadd.f32 1.0, %v5644_v5  ;;  %5657 = vpow2.f32 %v2316_v4  ;;  %v2250_v44 = vadd.f32 %v2148_v49, %v6881_v12  ;;  %v7143_v63 = vadd.f32 %v6772_v17, %v6839_v43 }
 0x328   : > { %v2151_v27 = vadd.f32 %v2150_v53, %v8349_v18  ;;  %v5648_v29 = vpop.eup %5647  ;;  %v2370_v11 = vadd.f32 1.0, %v5646_v22  ;;  %v2284_v55 = vsub.f32 0.0, %v2252_v56  ;;  %v2253_v19 = vadd.f32 %v2159_v46, %v6901_v21 }
 0x329   : > { %v5650_v38 = vpop.eup %5649  ;;  %5659 = vrcp.f32 %v2372_v20  ;;  %v2373_v51 = vadd.f32 1.0, %v5648_v29  ;;  %v2282_v58 = vsub.f32 0.0, %v2250_v44  ;;  %v7149_v49 = vadd.f32 %v6779_v7, %v6839_v43 }
 0x32a   : > { %v2251_v4 = vadd.f32 %v2151_v27, %v6887_v28  ;;  %5661 = vrcp.f32 %v2370_v11  ;;  %v2371_v12 = vadd.f32 1.0, %v5650_v38  ;;  %v2326_v54 = vmul.f32 1.442695, %v2284_v55 }
 0x32b   : > { %v2285_v15 = vsub.f32 0.0, %v2253_v19  ;;  %5663 = vrcp.f32 %v2373_v51  ;;  %v2322_v17 = vmul.f32 1.442695, %v2282_v58  ;;  %v5256_v5 = vpop.f32.mrb[68].mxu1  ;;  %v7153_v21 = vadd.f32 %v6784_v3, %v6839_v43 }
 0x32c   : > { %v2283_v33 = vsub.f32 0.0, %v2251_v4  ;;  %5665 = vrcp.f32 %v2371_v12  ;;  %v2172_v28 = vadd.f32 %v5256_v5, %v7033_v2  ;;  %v2163_v46 = vpop.f32.mrb[69].mxu1  ;;  %v7158_v53 = vadd.f32 %v6791_v62, %v6839_v43 }
 0x32d   : > { %v2328_v56 = vmul.f32 1.442695, %v2285_v15  ;;  %5667 = vpow2.f32 %v2326_v54  ;;  %v8350_v22 = vrot.slane %v6958_v9, %v6828_v39  ;;  %v5257_v44 = vpop.f32.mrb[70].mxu1  ;;  %v7165_v3 = vadd.f32 %v6803_v60, %v6839_v43 }
 0x32e   : > { %v2324_v7 = vmul.f32 1.442695, %v2283_v33  ;;  %v5652_v18 = vpop.eup %5651  ;;  %5669 = vpow2.f32 %v2322_v17  ;;  %v2256_v2 = vadd.f32 %v2172_v28, %v6913_v41  ;;  %v2175_v27 = vadd.f32 %v5257_v44, %v7065_v0  ;;  %v2166_v29 = vpop.f32.mrb[71].mxu1 }
 0x32f   : > { %v2164_v20 = vadd.f32 %v2163_v46, %v8350_v22  ;;  %v5654_v62 = vpop.eup %5653  ;;  %v2376_v11 = vadd.f32 1.0, %v5652_v18  ;;  %5671 = vpow2.f32 %v2328_v56  ;;  %v8351_v9 = vrot.slane %v7005_v6, %v6828_v39  ;;  %v8352_v6 = vld [vmem:[#allocation44_spill] sm:$0xff] }
 0x330   : > { %v5656_v38 = vpop.eup %5655  ;;  %v2374_v51 = vadd.f32 1.0, %v5654_v62  ;;  %5673 = vpow2.f32 %v2324_v7  ;;  %v2288_v60 = vsub.f32 0.0, %v2256_v2  ;;  %v2257_v58 = vadd.f32 %v2175_v27, %v6921_v30 }
 0x331   : > { %v2254_v55 = vadd.f32 %v2164_v20, %v6905_v52  ;;  %v2167_v19 = vadd.f32 %v2166_v29, %v8351_v9  ;;  %v5658_v4 = vpop.eup %5657  ;;  %5675 = vrcp.f32 %v2376_v11  ;;  %v2377_v41 = vadd.f32 1.0, %v5656_v38  ;;  %v8354_v11 = vld [vmem:[#allocation49_spill] sm:$0xff] }
 0x332   : > { %5677 = vrcp.f32 %v2374_v51  ;;  %v2375_v54 = vadd.f32 1.0, %v5658_v4  ;;  %v2334_v15 = vmul.f32 1.442695, %v2288_v60  ;;  %v2289_v52 = vsub.f32 0.0, %v2257_v58  ;;  %v8355_v51 = vld [vmem:[#allocation47_spill] sm:$0xff] }
 0x333   : > { %v2286_v0 = vsub.f32 0.0, %v2254_v55  ;;  %v2255_v12 = vadd.f32 %v2167_v19, %v6909_v25  ;;  %v5660_v17 = vpop.eup %5659  ;;  %v7177_v33 = vadd.f32 %v8352_v6, %v6839_v43  ;;  %5679 = vrcp.f32 %v2377_v41  ;;  %v5260_v28 = vpop.f32.mrb[72].mxu1  ;;  %v8358_v6 = vld [vmem:[#allocation48_spill] sm:$0xff] }
 0x334   : > { %v5662_v30 = vpop.eup %5661  ;;  %5681 = vrcp.f32 %v2375_v54  ;;  %v2336_v46 = vmul.f32 1.442695, %v2289_v52  ;;  %v2188_v7 = vadd.f32 %v5260_v28, %v7047_v1  ;;  %v2179_v22 = vpop.f32.mrb[73].mxu1  ;;  %v7180_v25 = vmul.f32 %v5660_v17, %v5660_v17  ;;  %v8357_v54 = vld [vmem:[#allocation50_spill] sm:$0xff] }
 0x335   : > { %v2330_v5 = vmul.f32 1.442695, %v2286_v0  ;;  %v2287_v56 = vsub.f32 0.0, %v2255_v12  ;;  %v5664_v20 = vpop.eup %5663  ;;  %5683 = vpow2.f32 %v2334_v15  ;;  %v8353_v18 = vrot.slane %v6975_v34, %v6828_v39  ;;  %v5261_v27 = vpop.f32.mrb[74].mxu1 }
 0x336   : > { %v7185_v29 = vmul.f32 %v5662_v30, %v5662_v30  ;;  %v5666_v62 = vpop.eup %5665  ;;  %v2260_v55 = vadd.f32 %v2188_v7, %v8354_v11  ;;  %v2191_v9 = vadd.f32 %v5261_v27, %v7059_v50  ;;  %v2182_v1 = vpop.f32.mrb[75].mxu1  ;;  %v7189_v19 = vmul.f32 %v5664_v20, %v5664_v20 }
 0x337   : > { %v2332_v44 = vmul.f32 1.442695, %v2287_v56  ;;  %v2180_v2 = vadd.f32 %v2179_v22, %v8353_v18  ;;  %5685 = vpow2.f32 %v2330_v5  ;;  %v5668_v38 = vpop.eup %5667  ;;  %v8356_v34 = vrot.slane %v6990_v40, %v6828_v39 }
 0x338   : > { %5687 = vpow2.f32 %v2336_v46  ;;  %v7195_v4 = vmul.f32 %v5666_v62, %v5666_v62  ;;  %v5670_v41 = vpop.eup %5669  ;;  %v2380_v0 = vadd.f32 1.0, %v5668_v38  ;;  %v2292_v12 = vsub.f32 0.0, %v2260_v55 }
 0x339   : > { %v2258_v60 = vadd.f32 %v2180_v2, %v8355_v51  ;;  %v2183_v58 = vadd.f32 %v2182_v1, %v8356_v34  ;;  %5689 = vpow2.f32 %v2332_v44  ;;  %v2261_v15 = vadd.f32 %v2191_v9, %v8357_v54  ;;  %v5672_v50 = vpop.eup %5671 }
 0x33a   : > { %v2378_v52 = vadd.f32 1.0, %v5670_v41  ;;  %v2466_v56 = vpack.c.bf16 %v7195_v4, %v7185_v29  ;;  %v5674_v28 = vpop.eup %5673  ;;  %5691 = vrcp.f32 %v2380_v0  ;;  %v2381_v40 = vadd.f32 1.0, %v5672_v50 }
 0x33b   : > { %v2290_v17 = vsub.f32 0.0, %v2258_v60  ;;  %v2259_v5 = vadd.f32 %v2183_v58, %v8358_v6  ;;  %v2342_v30 = vmul.f32 1.442695, %v2292_v12  ;;  %v2293_v46 = vsub.f32 0.0, %v2261_v15  ;;  %v5676_v7 = vpop.eup %5675  ;;  %v5264_v18 = vpop.f32.mrb[76].mxu1  ;;  %v8360_v15 = vld [vmem:[#allocation51_spill] sm:$0xff] }
 0x33c   : > { %5693 = vrcp.f32 %v2378_v52  ;;  %v2379_v22 = vadd.f32 1.0, %v5674_v28  ;;  %v5678_v2 = vpop.eup %5677  ;;  %v2204_v62 = vadd.f32 %v5264_v18, %v7074_v47  ;;  %v2195_v11 = vpop.f32.mrb[77].mxu1  ;;  %v2467_v55 = vpack.c.bf16 %v7189_v19, %v7180_v25 }
 0x33d   : > { %v2338_v20 = vmul.f32 1.442695, %v2290_v17  ;;  %v2291_v44 = vsub.f32 0.0, %v2259_v5  ;;  %5695 = vrcp.f32 %v2381_v40  ;;  %v2344_v27 = vmul.f32 1.442695, %v2293_v46  ;;  %v5680_v9 = vpop.eup %5679  ;;  %v5265_v60 = vpop.f32.mrb[78].mxu1 }
 0x33e   : > { %5697 = vrcp.f32 %v2379_v22  ;;  %v8359_v38 = vrot.slane %v6983_v59, %v6828_v39  ;;  %v7207_v34 = vmul.f32 %v5678_v2, %v5678_v2  ;;  %v5682_v58 = vpop.eup %5681  ;;  %v2264_v41 = vadd.f32 %v2204_v62, %v7098_v57  ;;  %v2198_v0 = vpop.f32.mrb[79].mxu1 }
 0x33f   : > { %v2340_v1 = vmul.f32 1.442695, %v2291_v44  ;;  %5699 = vpow2.f32 %v2342_v30  ;;  %v2207_v47 = vadd.f32 %v5265_v60, %v7111_v31  ;;  %v7211_v12 = vmul.f32 %v5676_v7, %v5676_v7  ;;  %v5684_v54 = vpop.eup %5683  ;;  %v8361_v30 = vld [vmem:[#allocation52_spill] sm:$0xff] }
 0x340   : > { %v2196_v51 = vadd.f32 %v2195_v11, %v8359_v38  ;;  %5701 = vpow2.f32 %v2338_v20  ;;  %v2199_v59 = vadd.f32 %v2198_v0, %v1880_v35  ;;  %v7217_v52 = vmul.f32 %v5682_v58, %v5682_v58 }
 0x341   : > { %v5686_v17 = vpop.eup %5685  ;;  %v2384_v6 = vadd.f32 1.0, %v5684_v54  ;;  %5703 = vpow2.f32 %v2344_v27  ;;  %v2296_v5 = vsub.f32 0.0, %v2264_v41  ;;  %v2265_v57 = vadd.f32 %v2207_v47, %v7117_v36 }
 0x342   : > { %v2262_v50 = vadd.f32 %v2196_v51, %v8360_v15  ;;  %v5688_v31 = vpop.eup %5687  ;;  %v2382_v28 = vadd.f32 1.0, %v5686_v17  ;;  %5705 = vpow2.f32 %v2340_v1  ;;  %v2263_v46 = vadd.f32 %v2199_v59, %v8361_v30 }
 0x343   : > { %v5690_v7 = vpop.eup %5689  ;;  %5707 = vrcp.f32 %v2384_v6  ;;  %v2385_v22 = vadd.f32 1.0, %v5688_v31  ;;  %v2350_v20 = vmul.f32 1.442695, %v2296_v5  ;;  %v2297_v42 = vsub.f32 0.0, %v2265_v57  ;;  %v5268_v2 = vpop.f32.mrb[80].mxu1 }
 0x344   : > { %v2294_v40 = vsub.f32 0.0, %v2262_v50  ;;  %5709 = vrcp.f32 %v2382_v28  ;;  %v2383_v35 = vadd.f32 1.0, %v5690_v7  ;;  %v2295_v18 = vsub.f32 0.0, %v2263_v46  ;;  %v5692_v27 = vpop.eup %5691  ;;  %v2211_v11 = vpop.f32.mrb[81].mxu1 }
 0x345   : > { %5711 = vrcp.f32 %v2385_v22  ;;  %v2352_v62 = vmul.f32 1.442695, %v2297_v42  ;;  %v2220_v36 = vadd.f32 %v5268_v2, %v7102_v16  ;;  %v2468_v1 = vpack.c.bf16 %v7217_v52, %v7207_v34  ;;  %v5269_v41 = vpop.f32.mrb[82].mxu1 }
 0x346   : > { %v2346_v44 = vmul.f32 1.442695, %v2294_v40  ;;  %v5694_v38 = vpop.eup %5693  ;;  %5713 = vrcp.f32 %v2383_v35  ;;  %v2348_v51 = vmul.f32 1.442695, %v2295_v18  ;;  %v8362_v60 = vrot.slane %v6993_v14, %v6828_v39  ;;  %v2214_v15 = vpop.f32.mrb[83].mxu1 }
 0x347   : > { %v7227_v47 = vmul.f32 %v5680_v9, %v5680_v9  ;;  %v5696_v0 = vpop.eup %5695  ;;  %5715 = vpow2.f32 %v2350_v20  ;;  %v2268_v54 = vadd.f32 %v2220_v36, %v7149_v49  ;;  %v2223_v16 = vadd.f32 %v5269_v41, %v7106_v61 }
 0x348   : > { %v2212_v58 = vadd.f32 %v2211_v11, %v8362_v60  ;;  %v7231_v50 = vmul.f32 %v5694_v38, %v5694_v38  ;;  %v5698_v59 = vpop.eup %5697  ;;  %5717 = vpow2.f32 %v2346_v44  ;;  %v2215_v14 = vadd.f32 %v2214_v15, %v1896_v32  ;;  %v8363_v15 = vld [vmem:[#allocation41_spill] sm:$0xff] }
 0x349   : > { %v2469_v9 = vpack.c.bf16 %v7227_v47, %v7211_v12  ;;  %v5700_v6 = vpop.eup %5699  ;;  %5719 = vpow2.f32 %v2352_v62  ;;  %v2300_v5 = vsub.f32 0.0, %v2268_v54  ;;  %v2269_v49 = vadd.f32 %v2223_v16, %v7153_v21 }
 0x34a   : > { %v2266_v17 = vadd.f32 %v2212_v58, %v7133_v13  ;;  %v7240_v61 = vmul.f32 %v5698_v59, %v5698_v59  ;;  %v5702_v57 = vpop.eup %5701  ;;  %v2388_v31 = vadd.f32 1.0, %v5700_v6  ;;  %5721 = vpow2.f32 %v2348_v51 }
 0x34b   : > { %v2267_v13 = vadd.f32 %v2215_v14, %v7143_v63  ;;  %v5704_v40 = vpop.eup %5703  ;;  %v2386_v30 = vadd.f32 1.0, %v5702_v57  ;;  %v2358_v26 = vmul.f32 1.442695, %v2300_v5  ;;  %v2301_v32 = vsub.f32 0.0, %v2269_v49  ;;  %v5272_v42 = vpop.f32.mrb[84].mxu1 }
 0x34c   : > { %v2298_v28 = vsub.f32 0.0, %v2266_v17  ;;  %v2470_v46 = vpack.c.bf16 %v7240_v61, %v7231_v50  ;;  %v5706_v7 = vpop.eup %5705  ;;  %5723 = vrcp.f32 %v2388_v31  ;;  %v2389_v22 = vadd.f32 1.0, %v5704_v40  ;;  %v2227_v63 = vpop.f32.mrb[85].mxu1  ;;  %v5589_v50 = vld [vmem:[%s6443_s18] ss:$8 sps:$4 sm:$0xff]  }
 0x34d   : > { %v2299_v21 = vsub.f32 0.0, %v2267_v13  ;;  %v5708_v35 = vpop.eup %5707  ;;  %5725 = vrcp.f32 %v2386_v30  ;;  %v2387_v44 = vadd.f32 1.0, %v5706_v7  ;;  %v2360_v18 = vmul.f32 1.442695, %v2301_v32  ;;  %v5273_v38 = vpop.f32.mrb[86].mxu1 }
 0x34e   : > { %v2354_v20 = vmul.f32 1.442695, %v2298_v28  ;;  %v2236_v2 = vadd.f32 %v5272_v42, %v7120_v23  ;;  %v5710_v62 = vpop.eup %5709  ;;  %5727 = vrcp.f32 %v2389_v22  ;;  %v2228_v11 = vadd.f32 %v2227_v63, %v1908_v10  ;;  %v2230_v54 = vpop.f32.mrb[87].mxu1  ;;  %v5592_v61 = vld [vmem:[%s6443_s18 + $0x14] ss:$8 sps:$4 sm:$0xff]  }
 0x34f   : > { %v2356_v36 = vmul.f32 1.442695, %v2299_v21  ;;  %v7249_v51 = vmul.f32 %v5692_v27, %v5692_v27  ;;  %v5712_v60 = vpop.eup %5711  ;;  %5729 = vrcp.f32 %v2387_v44  ;;  %v2239_v41 = vadd.f32 %v5273_v38, %v7129_v8 }
 0x350   : > { %v2272_v58 = vadd.f32 %v2236_v2, %v7165_v3  ;;  %v7253_v16 = vmul.f32 %v5696_v0, %v5696_v0  ;;  %v5714_v23 = vpop.eup %5713  ;;  %v1229_v59 = vadd.f32 %v8363_v15, %v6839_v43  ;;  %5731 = vpow2.f32 %v2358_v26 }
 0x351   : > { %v2270_v24 = vadd.f32 %v2228_v11, %v7158_v53  ;;  %v2231_v10 = vadd.f32 %v2230_v54, %v1912_v37  ;;  %v5716_v27 = vpop.eup %5715  ;;  %5733 = vpow2.f32 %v2354_v20  ;;  %v2273_v3 = vadd.f32 %v2239_v41, %v7177_v33 }
 0x352   : > { %v2304_v17 = vsub.f32 0.0, %v2272_v58  ;;  %v2471_v8 = vpack.c.bf16 %v7253_v16, %v7249_v51  ;;  %v5718_v0 = vpop.eup %5717  ;;  %v2392_v14 = vadd.f32 1.0, %v5716_v27  ;;  %5735 = vpow2.f32 %v2360_v18  ;;  %v5597_v16 = vld [vmem:[%s8271_s8 + $0x84] ss:$8 sps:$4 sm:$0xff]  }
 0x353   : > { %v2302_v6 = vsub.f32 0.0, %v2270_v24  ;;  %v2271_v43 = vadd.f32 %v2231_v10, %v1229_v59  ;;  %v5720_v5 = vpop.eup %5719  ;;  %v2390_v49 = vadd.f32 1.0, %v5718_v0  ;;  %5737 = vpow2.f32 %v2356_v36 }
 0x354   : > { %v2305_v53 = vsub.f32 0.0, %v2273_v3  ;;  %v7264_v57 = vmul.f32 %v5710_v62, %v5710_v62  ;;  %v5722_v45 = vpop.eup %5721  ;;  %5739 = vrcp.f32 %v2392_v14  ;;  %v2393_v37 = vadd.f32 1.0, %v5720_v5 }
 0x355   : > { %v2366_v31 = vmul.f32 1.442695, %v2304_v17  ;;  %v2303_v28 = vsub.f32 0.0, %v2271_v43  ;;  %5741 = vrcp.f32 %v2390_v49  ;;  %v2391_v33 = vadd.f32 1.0, %v5722_v45 }
 0x356   : > { %v2362_v13 = vmul.f32 1.442695, %v2302_v6  ;;  %v7266_v40 = vmul.f32 %v5714_v23, %v5714_v23  ;;  %v5724_v30 = vpop.eup %5723  ;;  %5743 = vrcp.f32 %v2393_v37  ;;  %v2368_v26 = vmul.f32 1.442695, %v2305_v53 }
 0x357   : > { %v7268_v32 = vmul.f32 %v5708_v35, %v5708_v35  ;;  %v7270_v7 = vmul.f32 %v5712_v60, %v5712_v60  ;;  %v5726_v22 = vpop.eup %5725  ;;  %5745 = vrcp.f32 %v2391_v33  ;;  %v2364_v20 = vmul.f32 1.442695, %v2303_v28 }
 0x358   : > { %v2472_v21 = vpack.c.bf16 %v7266_v40, %v7264_v57  ;;  %v5728_v42 = vpop.eup %5727  ;;  %5747 = vpow2.f32 %v2366_v31  ;;  %v2452_v2 = vmul.f32 %v5724_v30, %v5724_v30  ;;  %v2450_v35 = vmul.f32 %v5726_v22, %v5726_v22  ;;  %v5600_v57 = vld [vmem:[%s8271_s8 + $0x94] ss:$8 sps:$4 sm:$0xff]   ;;  %v5598_v40 = vld [vmem:[%s8271_s8 + $0x90] ss:$8 sps:$4 sm:$0xff]  }
 0x359   : > { %v2473_v44 = vpack.c.bf16 %v7270_v7, %v7268_v32  ;;  %v5730_v18 = vpop.eup %5729  ;;  %5749 = vpow2.f32 %v2362_v13  ;;  %v2453_v63 = vmul.f32 %v5728_v42, %v5728_v42  ;;  %v8364_v51 = vmov 0   ;;  %v5603_v32 = vld [vmem:[%s8271_s8 + $0xa4] ss:$8 sps:$4 sm:$0xff]   ;;  %v5601_v7 = vld [vmem:[%s8271_s8 + $0xa0] ss:$8 sps:$4 sm:$0xff]  }
 0x35a   : > { %v5732_v62 = vpop.eup %5731  ;;  %5751 = vpow2.f32 %v2368_v26  ;;  %v2451_v36 = vmul.f32 %v5730_v18, %v5730_v18 }
 0x35b   : > { %v5734_v11 = vpop.eup %5733  ;;  %v2396_v38 = vadd.f32 1.0, %v5732_v62  ;;  %5753 = vpow2.f32 %v2364_v20  ;;  %v2475_v60 = vpack.c.bf16 %v2453_v63, %v2452_v2  ;;  %v5609_v62 = vld [vmem:[%s8271_s8 + $0xc4] ss:$8 sps:$4 sm:$0xff]  }
 0x35c   : > { %v5736_v58 = vpop.eup %5735  ;;  %v2394_v41 = vadd.f32 1.0, %v5734_v11  ;;  %v2474_v54 = vpack.c.bf16 %v2451_v36, %v2450_v35  ;;  %v5607_v35 = vld [vmem:[%s8271_s8 + $0xc0] ss:$8 sps:$4 sm:$0xff]   ;;  %v5612_v36 = vld [vmem:[%s8271_s8 + $0xd4] ss:$8 sps:$4 sm:$0xff]  }
 0x35d   : > { %v5738_v23 = vpop.eup %5737  ;;  %5755 = vrcp.f32 %v2396_v38  ;;  %v2397_v15 = vadd.f32 1.0, %v5736_v58  ;;  %v5610_v11 = vld [vmem:[%s8271_s8 + $0xd0] ss:$8 sps:$4 sm:$0xff]   ;;  %v5615_v38 = vld [vmem:[%s8271_s8 + $0xe4] ss:$8 sps:$4 sm:$0xff]  }
 0x35e   : > { %v5740_v59 = vpop.eup %5739  ;;  %5757 = vrcp.f32 %v2394_v41  ;;  %v2395_v24 = vadd.f32 1.0, %v5738_v23  ;;  %5028 = vmatprep.subr.bf16.mxu0 %v2474_v54  ;;  %v5618_v58 = vld [vmem:[%s8271_s8 + $0xf4] ss:$8 sps:$4 sm:$0xff]   ;;  %v5616_v41 = vld [vmem:[%s8271_s8 + $0xf0] ss:$8 sps:$4 sm:$0xff]   ;;  %v2552_v54 = vstv %s2551_s1 }
 0x35f   : > { %v5742_v10 = vpop.eup %5741  ;;  %5759 = vrcp.f32 %v2397_v15  ;;  %5029 = vmatpush3.bf16.msra.mxu0 %v2466_v56  ;;  %v2456_v3 = vmul.f32 %v5740_v59, %v5740_v59  ;;  %v8365_v59 = vld [vmem:[#allocation10_spill] sm:$0xff] }
 0x360   : > { %v5744_v27 = vpop.eup %5743  ;;  %5761 = vrcp.f32 %v2395_v24  ;;  %5030 = vmatprep.subr.bf16.mxu0 %v2475_v60  ;;  %v2454_v6 = vmul.f32 %v5742_v10, %v5742_v10  ;;  %v5613_v60 = vld [vmem:[%s8271_s8 + $0xe0] ss:$8 sps:$4 sm:$0xff]   ;;  %v2553_v24 = vmul.f32 %v2552_v54, %v8365_v59 }
 0x361   : > { %v5746_v17 = vpop.eup %5745  ;;  %v2457_v0 = vmul.f32 %v5744_v27, %v5744_v27 }
 0x362   : > { %v5748_v14 = vpop.eup %5747  ;;  %v2455_v43 = vmul.f32 %v5746_v17, %v5746_v17 }
 0x363   : > { %v5750_v5 = vpop.eup %5749  ;;  %v2400_v49 = vadd.f32 1.0, %v5748_v14  ;;  %5031 = vmatpush3.bf16.msra.mxu0 %v2467_v55  ;;  %v2477_v53 = vpack.c.bf16 %v2457_v0, %v2456_v3  ;;  %v8366_v3 = vld [vmem:[#allocation11_spill] sm:$0xff] }
 0x364   : > { %v5752_v45 = vpop.eup %5751  ;;  %v2398_v37 = vadd.f32 1.0, %v5750_v5  ;;  %v2476_v29 = vpack.c.bf16 %v2455_v43, %v2454_v6  ;;  %v2554_v0 = vmul.f32 %v2552_v54, %v8366_v3 }
 0x365   : > { %v5754_v4 = vpop.eup %5753  ;;  %5763 = vrcp.f32 %v2400_v49  ;;  %v2401_v56 = vadd.f32 1.0, %v5752_v45 }
 0x366   : > { %5765 = vrcp.f32 %v2398_v37  ;;  %v2399_v31 = vadd.f32 1.0, %v5754_v4  ;;  %5032 = vmatprep.subr.bf16.mxu0 %v2476_v29  ;;  %v8367_v29 = vld [vmem:[#allocation8_spill] sm:$0xff] }
 0x367   : > { %v5756_v28 = vpop.eup %5755  ;;  %5767 = vrcp.f32 %v2401_v56  ;;  %5033 = vmatpush3.bf16.msra.mxu0 %v2468_v1  ;;  %v2555_v4 = vmul.f32 %v2552_v54, %v8367_v29  ;;  %v6081_v29 = vld [vmem:[%s6647_s16 + $0x30] sm:$0xff]  }
 0x368   : > { %v5758_v33 = vpop.eup %5757  ;;  %5769 = vrcp.f32 %v2399_v31  ;;  %5034 = vmatprep.subr.bf16.mxu0 %v2477_v53  ;;  %v2460_v55 = vmul.f32 %v5756_v28, %v5756_v28 }
 0x369   : > { %v5760_v25 = vpop.eup %5759  ;;  %v2458_v30 = vmul.f32 %v5758_v33, %v5758_v33 }
 0x36a   : > { %v5762_v19 = vpop.eup %5761  ;;  %v2461_v13 = vmul.f32 %v5760_v25, %v5760_v25  ;;  %v8368_v25 = vld [vmem:[#allocation9_spill] sm:$0xff] }
 0x36b   : > { %5035 = vmatpush3.bf16.msra.mxu0 %v2469_v9  ;;  %v2459_v26 = vmul.f32 %v5762_v19, %v5762_v19  ;;  %v2556_v19 = vmul.f32 %v2552_v54, %v8368_v25  ;;  %v6087_v25 = vld [vmem:[%s6647_s16 + $0x60] sm:$0xff]  }
 0x36c   : > { %v2479_v22 = vpack.c.bf16 %v2461_v13, %v2460_v55 }
 0x36d   : > { %v2478_v20 = vpack.c.bf16 %v2459_v26, %v2458_v30 }
 0x36f   : > { %v5764_v42 = vpop.eup %5763  ;;  %5036 = vmatprep.subr.bf16.mxu0 %v2478_v20 }
 0x370   : > { %v5766_v34 = vpop.eup %5765  ;;  %5037 = vmatpush3.bf16.msra.mxu0 %v2470_v46  ;;  %v2464_v18 = vmul.f32 %v5764_v42, %v5764_v42  ;;  %v5594_v46 = vld [vmem:[%s6443_s18 + $0x10] ss:$8 sps:$4 sm:$0xff]  }
 0x371   : > { %v5768_v52 = vpop.eup %5767  ;;  %5038 = vmatprep.subr.bf16.mxu0 %v2479_v22  ;;  %v2462_v47 = vmul.f32 %v5766_v34, %v5766_v34 }
 0x372   : > { %v5770_v1 = vpop.eup %5769  ;;  %v2465_v12 = vmul.f32 %v5768_v52, %v5768_v52 }
 0x373   : > { %v2463_v9 = vmul.f32 %v5770_v1, %v5770_v1 }
 0x374   : > { %5039 = vmatpush3.bf16.msra.mxu0 %v2471_v8  ;;  %v2481_v2 = vpack.c.bf16 %v2465_v12, %v2464_v18  ;;  %v5595_v8 = vld [vmem:[%s8271_s8 + $0x80] ss:$8 sps:$4 sm:$0xff]  }
 0x375   : > { %v2480_v63 = vpack.c.bf16 %v2463_v9, %v2462_v47 }
 0x377   : > { %5040 = vmatprep.subr.bf16.mxu0 %v2480_v63 }
 0x378   : > { %5041 = vmatpush3.bf16.msra.mxu0 %v2472_v21  ;;  %v5606_v21 = vld [vmem:[%s8271_s8 + $0xb4] ss:$8 sps:$4 sm:$0xff]  }
 0x379   : > { %5042 = vmatprep.subr.bf16.mxu0 %v2481_v2 }
 0x37c   : > { %5043 = vmatpush3.bf16.msra.mxu0 %v2473_v44  ;;  %v5604_v44 = vld [vmem:[%s8271_s8 + $0xb0] ss:$8 sps:$4 sm:$0xff]  }
 0x37d   : > { %2696 = vmatprep.subr.bf16.mxu0 %v5597_v16 }
 0x37f   : > { %2535 = vmatmul.mubr.bf16.vlgmr.msra.gmra.mrb[84].mxu0 %v5589_v50 }
 0x380   : > { %2542 = vmatprep.mubr.bf16.mxu0 %v5592_v61  ;;  %2697 = vmatpush1.bf16.msra.mxu0 %v5595_v8 }
 0x381   : > { %2698 = vmatprep.subr.bf16.mxu0 %v5600_v57 }
 0x384   : > { %2699 = vmatpush1.bf16.msra.mxu0 %v5598_v40 }
 0x385   : > { %2700 = vmatprep.subr.bf16.mxu0 %v5603_v32 }
 0x387   : > { %2543 = vmatmul.mubr.bf16.gmra.mrb[88].mxu0 %v5594_v46 }
 0x388   : > { %2728 = vmatprep.mubr.bf16.mxu0 %v8364_v51  ;;  %2701 = vmatpush1.bf16.msra.mxu0 %v5601_v7 }
 0x389   : > { %2702 = vmatprep.subr.bf16.mxu0 %v5606_v21 }
 0x38c   : > { %2703 = vmatpush1.bf16.msra.mxu0 %v5604_v44 }
 0x38d   : > { %2704 = vmatprep.subr.bf16.mxu0 %v5609_v62 }
 0x390   : > { %2705 = vmatpush1.bf16.msra.mxu0 %v5607_v35 }
 0x391   : > { %2706 = vmatprep.subr.bf16.mxu0 %v5612_v36 }
 0x394   : > { %2707 = vmatpush1.bf16.msra.mxu0 %v5610_v11 }
 0x395   : > { %2708 = vmatprep.subr.bf16.mxu0 %v5615_v38 }
 0x398   : > { %2709 = vmatpush1.bf16.msra.mxu0 %v5613_v60 }
 0x399   : > { %2710 = vmatprep.subr.bf16.mxu0 %v5618_v58 }
 0x39c   : > { %2711 = vmatpush1.bf16.msra.mxu0 %v5616_v41 }
 0x452   : > { %v5044_v23 = vpop.f32.mrb[84].mxu0 }
 0x453   : > { %v5045_v15 = vpop.f32.mrb[85].mxu0 }
 0x454   : > { %v5046_v10 = vadd.f32 %v5045_v15, %v5044_v23  ;;  %v5047_v27 = vpop.f32.mrb[86].mxu0  ;;  %v6075_v15 = vld [vmem:[%s6443_s18 + $0x4] ss:$8 sps:$4 sm:$0xff]  }
 0x455   : > { %v5048_v17 = vpop.f32.mrb[87].mxu0 }
 0x456   : > { %v2557_v14 = vadd.f32 %v5046_v10, %v2553_v24  ;;  %v5049_v6 = vadd.f32 %v5048_v17, %v5047_v27 }
 0x458   : > { %v2565_v43 = vand.u32 2147483647, %v2557_v14  ;;  %v2558_v5 = vadd.f32 %v5049_v6, %v2554_v0  ;;  %v2561_v40 = vmax.f32 %v2557_v14, 0.0 }
 0x45a   : > { %v2569_v49 = vsub.f32 0.0, %v2565_v43  ;;  %v2566_v53 = vand.u32 2147483647, %v2558_v5  ;;  %v5050_v45 = vpop.f32.mrb[88].mxu0  ;;  %v2562_v32 = vmax.f32 %v2558_v5, 0.0  ;;  %v6076_v5 = vld [vmem:[%s6647_s16 + $0x8] sm:$0xff]  }
 0x45b   : > { %v5051_v37 = vpop.f32.mrb[89].mxu0 }
 0x45c   : > { %v2573_v56 = vmul.f32 1.442695, %v2569_v49  ;;  %v2570_v31 = vsub.f32 0.0, %v2566_v53  ;;  %v5052_v28 = vadd.f32 %v5051_v37, %v5050_v45  ;;  %v5053_v33 = vpop.f32.mrb[90].mxu0  ;;  %v6077_v49 = vld [vmem:[%s6647_s16 + $0x10] sm:$0xff]   ;;  %v6078_v53 = vld [vmem:[%s6647_s16 + $0x18] sm:$0xff]  }
 0x45d   : > { %v5054_v55 = vpop.f32.mrb[91].mxu0  ;;  %v6079_v45 = vld [vmem:[%s6647_s16 + $0x20] sm:$0xff]   ;;  %v6080_v37 = vld [vmem:[%s6647_s16 + $0x28] sm:$0xff]  }
 0x45e   : > { %5771 = vpow2.f32 %v2573_v56  ;;  %v2575_v13 = vmul.f32 1.442695, %v2570_v31  ;;  %v2559_v30 = vadd.f32 %v5052_v28, %v2555_v4  ;;  %v5055_v26 = vadd.f32 %v5054_v55, %v5053_v33  ;;  %v6082_v4 = vld [vmem:[%s6647_s16 + $0x38] sm:$0xff]   ;;  %v6083_v56 = vld [vmem:[%s6647_s16 + $0x40] sm:$0xff]   ;;  %v6084_v31 = vld [vmem:[%s6647_s16 + $0x48] sm:$0xff]  }
 0x45f   : > { %v6085_v28 = vld [vmem:[%s6647_s16 + $0x50] sm:$0xff]   ;;  %v6086_v33 = vld [vmem:[%s6647_s16 + $0x58] sm:$0xff]  }
 0x460   : > { %5773 = vpow2.f32 %v2575_v13  ;;  %v2567_v22 = vand.u32 2147483647, %v2559_v30  ;;  %v2560_v20 = vadd.f32 %v5055_v26, %v2556_v19  ;;  %v2563_v38 = vmax.f32 %v2559_v30, 0.0  ;;  %v6088_v19 = vld [vmem:[%s6647_s16 + $0x68] sm:$0xff]   ;;  %v6089_v55 = vld [vmem:[%s6647_s16 + $0x70] sm:$0xff]   ;;  %v6090_v13 = vld [vmem:[%s6647_s16 + $0x78] sm:$0xff]  }
 0x461   : > { %v6091_v30 = vld [vmem:[%s6647_s16] sm:$0xff]   ;;  %v8373_v26 = vld [vmem:[#allocation46_spill] sm:$0xff] }
 0x462   : > { %v2571_v42 = vsub.f32 0.0, %v2567_v22  ;;  %v2568_v34 = vand.u32 2147483647, %v2560_v20  ;;  %v2564_v60 = vmax.f32 %v2560_v20, 0.0  ;;  %v913_v22 = vsub.s32 1, %v8373_v26 }
 0x463   : > { %v6092_v20 = vld [vmem:[%s8273_s10] sm:$0x7] }
 0x464   : > { %v2577_v52 = vmul.f32 1.442695, %v2571_v42  ;;  %v2572_v1 = vsub.f32 0.0, %v2568_v34  ;;  %v7412_v42 = vrot.slane %v6092_v20, %v913_v22  ;;  %v8397_v20 = vld [vmem:[#allocation34_spill] sm:$0xff] }
 0x466   : > { %5775 = vpow2.f32 %v2577_v52  ;;  %v2579_v18 = vmul.f32 1.442695, %v2572_v1  ;;  %8374 = vst [vmem:[#allocation48_spill] sm:$0xff] %v7412_v42  ;;  %v8375_v52 = vld [vmem:[#allocation12_spill] sm:$0xff] }
 0x467   : > { %v7416_v1 = vadd.f32 %v8375_v52, %v7412_v42 }
 0x468   : > { %v5772_v12 = vpop.eup %5771  ;;  %5777 = vpow2.f32 %v2579_v18  ;;  %v8376_v18 = vld [vmem:[#allocation13_spill] sm:$0xff] }
 0x469   : > { %v2581_v47 = vadd.f32 1.0, %v5772_v12  ;;  %v7420_v12 = vadd.f32 %v8376_v18, %v7412_v42 }
 0x46a   : > { %v5774_v9 = vpop.eup %5773 }
 0x46b   : > { %5779 = vlog2.f32 %v2581_v47  ;;  %v2582_v2 = vadd.f32 1.0, %v5774_v9  ;;  %v8377_v9 = vld [vmem:[#allocation14_spill] sm:$0xff] }
 0x46d   : > { %5781 = vlog2.f32 %v2582_v2  ;;  %v7425_v2 = vadd.f32 %v8377_v9, %v7412_v42  ;;  %v8399_v9 = vld [vmem:[#allocation36_spill] sm:$0xff] }
 0x470   : > { %v5776_v63 = vpop.eup %5775 }
 0x471   : > { %v2583_v50 = vadd.f32 1.0, %v5776_v63  ;;  %v8378_v63 = vld [vmem:[#allocation15_spill] sm:$0xff] }
 0x472   : > { %v5778_v61 = vpop.eup %5777 }
 0x473   : > { %5783 = vlog2.f32 %v2583_v50  ;;  %v2584_v46 = vadd.f32 1.0, %v5778_v61  ;;  %v7429_v50 = vadd.f32 %v8378_v63, %v7412_v42  ;;  %v8379_v61 = vld [vmem:[#allocation16_spill] sm:$0xff]  ;;  %v7519_v63 = vadd.f32 %v8399_v9, %v7412_v42 }
 0x475   : > { %v5780_v16 = vpop.eup %5779  ;;  %5785 = vlog2.f32 %v2584_v46  ;;  %v7433_v46 = vadd.f32 %v8379_v61, %v7412_v42 }
 0x476   : > { %v2586_v8 = vmul.f32 0.6931472, %v5780_v16  ;;  %v8380_v16 = vld [vmem:[#allocation17_spill] sm:$0xff] }
 0x477   : > { %v5782_v57 = vpop.eup %5781 }
 0x478   : > { %v2588_v7 = vmul.f32 0.6931472, %v5782_v57  ;;  %v7356_v21 = vadd.f32 %v2586_v8, %v2561_v40  ;;  %v7437_v8 = vadd.f32 %v8380_v16, %v7412_v42  ;;  %v8381_v57 = vld [vmem:[#allocation18_spill] sm:$0xff] }
 0x479   : > { %v7441_v40 = vadd.f32 %v8381_v57, %v7412_v42 }
 0x47a   : > { %8369 = vst [vmem:[#allocation44_spill] sm:$0xff] %v7356_v21  ;;  %v7358_v44 = vadd.f32 %v2588_v7, %v2562_v32  ;;  %v8382_v32 = vld [vmem:[#allocation19_spill] sm:$0xff] }
 0x47b   : > { %v7445_v7 = vadd.f32 %v8382_v32, %v7412_v42  ;;  %v8400_v32 = vld [vmem:[#allocation37_spill] sm:$0xff] }
 0x47c   : > { %8370 = vst [vmem:[#allocation49_spill] sm:$0xff] %v7358_v44  ;;  %v2614_v62 = vpack.c.bf16 %v7358_v44, %v7356_v21 }
 0x47d   : > { %v5784_v35 = vpop.eup %5783 }
 0x47e   : > { %2729 = vmatmul.mubr.bf16.vlgmr.msra.gmra.mrb[92].mxu0 %v2614_v62  ;;  %v2590_v36 = vmul.f32 0.6931472, %v5784_v35  ;;  %v8383_v62 = vld [vmem:[#allocation20_spill] sm:$0xff] }
 0x47f   : > { %v5786_v11 = vpop.eup %5785  ;;  %2738 = vmatprep.mubr.bf16.mxu0 %v8364_v51  ;;  %v7449_v35 = vadd.f32 %v8383_v62, %v7412_v42  ;;  %v7527_v62 = vadd.f32 %v8400_v32, %v7412_v42 }
 0x480   : > { %v2592_v58 = vmul.f32 0.6931472, %v5786_v11  ;;  %v7363_v41 = vadd.f32 %v2590_v36, %v2563_v38  ;;  %v8384_v11 = vld [vmem:[#allocation21_spill] sm:$0xff] }
 0x481   : > { %v7454_v38 = vadd.f32 %v8384_v11, %v7412_v42  ;;  %8401 = vst [vmem:[#allocation51_spill] sm:$0xff] %v7527_v62  ;;  %v8402_v11 = vld [vmem:[#allocation38_spill] sm:$0xff] }
 0x482   : > { %8371 = vst [vmem:[#allocation47_spill] sm:$0xff] %v7363_v41  ;;  %v7365_v54 = vadd.f32 %v2592_v58, %v2564_v60  ;;  %v8385_v60 = vld [vmem:[#allocation22_spill] sm:$0xff] }
 0x483   : > { %v7458_v58 = vadd.f32 %v8385_v60, %v7412_v42  ;;  %v7531_v60 = vadd.f32 %v8402_v11, %v7412_v42 }
 0x484   : > { %8372 = vst [vmem:[#allocation50_spill] sm:$0xff] %v7365_v54  ;;  %v2615_v23 = vpack.c.bf16 %v7365_v54, %v7363_v41 }
 0x486   : > { %2739 = vmatmul.mubr.bf16.gmra.mrb[96].mxu0 %v2615_v23  ;;  %v8386_v23 = vld [vmem:[#allocation23_spill] sm:$0xff] }
 0x487   : > { %3544 = vmatprep.mubr.bf16.mxu0 %v6075_v15  ;;  %v7462_v15 = vadd.f32 %v8386_v23, %v7412_v42 }
 0x551   : > { %v2730_v59 = vpop.f32.mrb[92].mxu0 }
 0x552   : > { %v2732_v24 = vpop.f32.mrb[93].mxu0  ;;  %v2755_v34 = vcombine.high %v2730_v59, %v2730_v59  ;;  %v2762_v47 = vrot.slane %v2730_v59, %v6825_v48  ;;  %v8387_v59 = vld [vmem:[#allocation24_spill] sm:$0xff] }
 0x553   : > { %v7370_v10 = vpop.f32.mrb[94].mxu0 }
 0x554   : > { %v2736_v27 = vpop.f32.mrb[95].mxu0  ;;  %v2769_v36 = vrot.slane %v2755_v34, %v6825_v48  ;;  %v8398_v34 = vld [vmem:[#allocation35_spill] sm:$0xff]  ;;  %v2778_v18 = vrot.slane %v2762_v47, %v6825_v48 }
 0x555   : > { %v2749_v17 = vpack.c.bf16 %v2736_v27, %v2732_v24  ;;  %v7466_v24 = vadd.f32 %v8387_v59, %v7412_v42  ;;  %v8388_v27 = vld [vmem:[#allocation25_spill] sm:$0xff]  ;;  %v7514_v52 = vadd.f32 %v8398_v34, %v7412_v42  ;;  %v8403_v59 = vld [vmem:[#allocation39_spill] sm:$0xff] }
 0x556   : > { %v7522_v61 = vrot.slane %v2769_v36, %v6825_v48  ;;  %v2954_v32 = vrot.slane %v2778_v18, %v6828_v39 }
 0x557   : > { %5274 = vmatprep.subr.bf16.mxu1 %v2749_v17 }
 0x558   : > { %5275 = vmatpush3.bf16.msra.mxu1 %v2749_v17  ;;  %v7470_v17 = vadd.f32 %v8388_v27, %v7412_v42  ;;  %v8404_v27 = vld [vmem:[#allocation40_spill] sm:$0xff] }
 0x559   : > { %v7372_v3 = vpop.f32.mrb[96].mxu0 }
 0x55a   : > { %v2742_v0 = vpop.f32.mrb[97].mxu0  ;;  %v2853_v23 = vcombine.high %v7372_v3, %v7372_v3 }
 0x55b   : > { %v7374_v14 = vpop.f32.mrb[98].mxu0 }
 0x55c   : > { %v2746_v6 = vpop.f32.mrb[99].mxu0  ;;  %v7568_v9 = vrot.slane %v2853_v23, %v6825_v48 }
 0x55d   : > { %v2750_v43 = vpack.c.bf16 %v2746_v6, %v2742_v0  ;;  %v8389_v0 = vld [vmem:[#allocation26_spill] sm:$0xff] }
 0x55e   : > { %v7474_v6 = vadd.f32 %v8389_v0, %v7412_v42  ;;  %v7542_v0 = vadd.f32 %v8404_v27, %v7412_v42 }
 0x55f   : > { %5276 = vmatprep.subr.bf16.mxu1 %v2750_v43 }
 0x560   : > { %5277 = vmatpush3.bf16.msra.mxu1 %v2750_v43  ;;  %v2770_v43 = vcombine.high %v2762_v47, %v2762_v47  ;;  %8405 = vst [vmem:[#allocation52_spill] sm:$0xff] %v7542_v0 }
 0x562   : > { %v2792_v16 = vrot.slane %v2770_v43, %v6825_v48  ;;  %v2860_v43 = vrot.slane %v7372_v3, %v6825_v48 }
 0x563   : > { %5279 = vmatmul.mubr.msk.bf16.vlgmr.msra.gmra.mrb[88].mxu1 %vm528_vm0, %v6076_v5  ;;  %v2811_v5 = vrot.slane %v7370_v10, %v6825_v48 }
 0x564   : > { %5282 = vmatprep.mubr.msk.bf16.mxu1 %vm528_vm0, %v6077_v49  ;;  %v8390_v49 = vld [vmem:[#allocation27_spill] sm:$0xff] }
 0x565   : > { %v2819_v57 = vcombine.high %v2811_v5, %v2811_v5 }
 0x567   : > { %v7563_v3 = vrot.slane %v2819_v57, %v6825_v48  ;;  %v2958_v57 = vrot.slane %v2792_v16, %v6828_v39 }
 0x569   : > { %v2851_v26 = vcombine.high %v7563_v3, %v7563_v3 }
 0x56b   : > { %5283 = vmatmul.mubr.msk.bf16.gmra.mrb[92].mxu1 %vm528_vm0, %v6078_v53  ;;  %v7480_v53 = vadd.f32 %v8390_v49, %v7412_v42 }
 0x56c   : > { %5286 = vmatprep.mubr.msk.bf16.mxu1 %vm528_vm0, %v6079_v45  ;;  %v8391_v45 = vld [vmem:[#allocation28_spill] sm:$0xff] }
 0x573   : > { %5287 = vmatmul.mubr.msk.bf16.gmra.mrb[96].mxu1 %vm528_vm0, %v6080_v37  ;;  %v7484_v37 = vadd.f32 %v8391_v45, %v7412_v42  ;;  %v8406_v45 = vld [vmem:[#allocation43_spill] sm:$0xff] }
 0x574   : > { %5290 = vmatprep.mubr.msk.bf16.mxu1 %vm528_vm0, %v6081_v29  ;;  %v8392_v29 = vld [vmem:[#allocation29_spill] sm:$0xff] }
 0x57b   : > { %5291 = vmatmul.mubr.msk.bf16.gmra.mrb[100].mxu1 %vm528_vm0, %v6082_v4  ;;  %v7488_v4 = vadd.f32 %v8392_v29, %v7412_v42  ;;  %v7551_v29 = vadd.f32 %v8406_v45, %v7412_v42 }
 0x57c   : > { %5294 = vmatprep.mubr.msk.bf16.mxu1 %vm528_vm0, %v6083_v56  ;;  %v2804_v56 = vcombine.high %v7370_v10, %v7370_v10  ;;  %v7510_v10 = vadd.f32 %v8397_v20, %v7412_v42  ;;  %v2801_v20 = vcombine.high %v7522_v61, %v7522_v61 }
 0x57d   : > { %8407 = vst [vmem:[#allocation41_spill] sm:$0xff] %v7551_v29 }
 0x57e   : > { %v2818_v47 = vrot.slane %v2804_v56, %v6825_v48  ;;  %v7554_v56 = vrot.slane %v2811_v5, %v6825_v48  ;;  %v2909_v5 = vrot.slane %v7374_v14, %v6825_v48 }
 0x580   : > { %v2820_v34 = vcombine.high %v2818_v47, %v2818_v47  ;;  %v7574_v11 = vrot.slane %v2818_v47, %v6825_v48  ;;  %v2978_v47 = vrot.slane %v2801_v20, %v6828_v39 }
 0x583   : > { %5295 = vmatmul.mubr.msk.bf16.gmra.mrb[104].mxu1 %vm528_vm0, %v6084_v31  ;;  %v8393_v31 = vld [vmem:[#allocation30_spill] sm:$0xff] }
 0x584   : > { %5298 = vmatprep.mubr.msk.bf16.mxu1 %vm528_vm0, %v6085_v28  ;;  %v7494_v28 = vadd.f32 %v8393_v31, %v7412_v42  ;;  %v2902_v31 = vcombine.high %v7374_v14, %v7374_v14  ;;  %v2849_v14 = vcombine.high %v7554_v56, %v7554_v56 }
 0x586   : > { %v7580_v45 = vrot.slane %v2902_v31, %v6825_v48  ;;  %v2869_v31 = vcombine.high %v7568_v9, %v7568_v9 }
 0x588   : > { %v7615_v21 = vrot.slane %v7580_v45, %v6825_v48 }
 0x58b   : > { %5299 = vmatmul.mubr.msk.bf16.gmra.mrb[108].mxu1 %vm528_vm0, %v6086_v33  ;;  %v8394_v33 = vld [vmem:[#allocation31_spill] sm:$0xff] }
 0x58c   : > { %5302 = vmatprep.mubr.msk.bf16.mxu1 %vm528_vm0, %v6087_v25  ;;  %v7498_v25 = vadd.f32 %v8394_v33, %v7412_v42  ;;  %v2800_v33 = vcombine.high %v2778_v18, %v2778_v18 }
 0x58e   : > { %v2962_v23 = vrot.slane %v2800_v33, %v6828_v39  ;;  %v7596_v33 = vrot.slane %v2860_v43, %v6825_v48 }
 0x593   : > { %5303 = vmatmul.mubr.msk.bf16.gmra.mrb[112].mxu1 %vm528_vm0, %v6088_v19  ;;  %v8395_v19 = vld [vmem:[#allocation32_spill] sm:$0xff] }
 0x594   : > { %5306 = vmatprep.mubr.msk.bf16.mxu1 %vm528_vm0, %v6089_v55  ;;  %v7502_v55 = vadd.f32 %v8395_v19, %v7412_v42  ;;  %v8408_v19 = vld [vmem:[#allocation45_spill] sm:$0xff] }
 0x59b   : > { %5307 = vmatmul.mubr.msk.bf16.gmra.mrb[116].mxu1 %vm528_vm0, %v6090_v13  ;;  %v2771_v13 = vcombine.high %v2769_v36, %v2769_v36  ;;  %v7538_v36 = vadd.f32 %v8403_v59, %v7412_v42  ;;  %v2868_v59 = vcombine.high %v2860_v43, %v2860_v43  ;;  %v2850_v43 = vcombine.high %v7574_v11, %v7574_v11 }
 0x59c   : > { %5314 = vmatprep.mubr.msk.bf16.mxu1 %vm528_vm0, %v6091_v30  ;;  %v8396_v30 = vld [vmem:[#allocation33_spill] sm:$0xff] }
 0x59d   : > { %v7506_v22 = vadd.f32 %v8396_v30, %v7412_v42  ;;  %v7547_v49 = vrot.slane %v2771_v13, %v6825_v48  ;;  %v7560_v30 = vadd.f32 %v8408_v19, %v7412_v42  ;;  %v2802_v13 = vcombine.high %v2792_v16, %v2792_v16 }
 0x59e   : > { %v2970_v19 = vrot.slane %v7522_v61, %v6828_v39  ;;  %v2917_v61 = vcombine.high %v2909_v5, %v2909_v5  ;;  %v7605_v20 = vrot.slane %v2868_v59, %v6825_v48  ;;  %v7608_v16 = vrot.slane %v2909_v5, %v6825_v48 }
 0x59f   : > { %8409 = vst [vmem:[#allocation10_spill] sm:$0xff] %v7560_v30  ;;  %v2803_v27 = vcombine.high %v7547_v49, %v7547_v49  ;;  %v2966_v18 = vrot.slane %v2802_v13, %v6828_v39  ;;  %v2974_v54 = vrot.slane %v7547_v49, %v6828_v39  ;;  %v7602_v13 = vrot.slane %v7568_v9, %v6825_v48 }
 0x5a0   : > { %v7618_v9 = vrot.slane %v2849_v14, %v6828_v39  ;;  %v7621_v5 = vrot.slane %v2851_v26, %v6828_v39  ;;  %v7628_v0 = vrot.slane %v2917_v61, %v6825_v48  ;;  %v7632_v14 = vrot.slane %v2820_v34, %v6825_v48 }
 0x5a1   : > { %v2982_v44 = vrot.slane %v2803_v27, %v6828_v39  ;;  %v2898_v27 = vcombine.high %v7596_v33, %v7596_v33 }
 0x636   : > { %v5280_v41 = vpop.f32.mrb[88].mxu1 }
 0x637   : > { %v3154_v49 = vadd.f32 %v5280_v41, %v2962_v23  ;;  %v3145_v51 = vpop.f32.mrb[89].mxu1 }
 0x638   : > { %v3146_v59 = vadd.f32 %v3145_v51, %v2954_v32  ;;  %v5281_v30 = vpop.f32.mrb[90].mxu1 }
 0x639   : > { %v3274_v41 = vadd.f32 %v3154_v49, %v7425_v2  ;;  %v3157_v23 = vadd.f32 %v5281_v30, %v2966_v18  ;;  %v3148_v42 = vpop.f32.mrb[91].mxu1  ;;  %v2900_v30 = vcombine.high %v7605_v20, %v7605_v20 }
 0x63a   : > { %v3272_v51 = vadd.f32 %v3146_v59, %v7416_v1  ;;  %v3149_v26 = vadd.f32 %v3148_v42, %v2958_v57  ;;  %v7646_v42 = vrot.slane %v2850_v43, %v6828_v39 }
 0x63b   : > { %v3306_v29 = vsub.f32 0.0, %v3274_v41  ;;  %v3275_v61 = vadd.f32 %v3157_v23, %v7429_v50  ;;  %v2852_v50 = vcombine.high %v7632_v14, %v7632_v14 }
 0x63c   : > { %v3304_v34 = vsub.f32 0.0, %v3272_v51  ;;  %v3273_v18 = vadd.f32 %v3149_v26, %v7420_v12  ;;  %v7655_v51 = vrot.slane %v2898_v27, %v6828_v39  ;;  %v2899_v12 = vcombine.high %v7602_v13, %v7602_v13 }
 0x63d   : > { %v3340_v57 = vmul.f32 1.442695, %v3306_v29  ;;  %v3307_v49 = vsub.f32 0.0, %v3275_v61  ;;  %v7660_v61 = vrot.slane %v2900_v30, %v6828_v39  ;;  %v2947_v30 = vcombine.high %v7608_v16, %v7608_v16 }
 0x63e   : > { %v3336_v41 = vmul.f32 1.442695, %v3304_v34  ;;  %v3305_v23 = vsub.f32 0.0, %v3273_v18  ;;  %v5284_v2 = vpop.f32.mrb[92].mxu1  ;;  %v7663_v34 = vrot.slane %v2869_v31, %v6825_v48  ;;  %v7673_v31 = vrot.slane %v2852_v50, %v6828_v39 }
 0x63f   : > { %5787 = vpow2.f32 %v3340_v57  ;;  %v3342_v43 = vmul.f32 1.442695, %v3307_v49  ;;  %v3170_v26 = vadd.f32 %v5284_v2, %v2978_v47  ;;  %v3161_v29 = vpop.f32.mrb[93].mxu1  ;;  %v3034_v57 = vrot.slane %v7602_v13, %v6828_v39 }
 0x640   : > { %5789 = vpow2.f32 %v3336_v41  ;;  %v3338_v1 = vmul.f32 1.442695, %v3305_v23  ;;  %v3162_v32 = vadd.f32 %v3161_v29, %v2970_v19  ;;  %v5285_v59 = vpop.f32.mrb[94].mxu1 }
 0x641   : > { %5791 = vpow2.f32 %v3342_v43  ;;  %v3278_v27 = vadd.f32 %v3170_v26, %v7441_v40  ;;  %v3173_v18 = vadd.f32 %v5285_v59, %v2982_v44  ;;  %v3164_v62 = vpop.f32.mrb[95].mxu1  ;;  %v7676_v40 = vrot.slane %v2899_v12, %v6828_v39 }
 0x642   : > { %5793 = vpow2.f32 %v3338_v1  ;;  %v3276_v47 = vadd.f32 %v3162_v32, %v7433_v46  ;;  %v3165_v2 = vadd.f32 %v3164_v62, %v2974_v54  ;;  %v2901_v1 = vcombine.high %v7663_v34, %v7663_v34 }
 0x643   : > { %v3310_v19 = vsub.f32 0.0, %v3278_v27  ;;  %v3279_v49 = vadd.f32 %v3173_v18, %v7445_v7  ;;  %v3050_v54 = vrot.slane %v7608_v16, %v6828_v39  ;;  %v3038_v7 = vrot.slane %v7663_v34, %v6828_v39 }
 0x644   : > { %v3308_v44 = vsub.f32 0.0, %v3276_v47  ;;  %v3277_v59 = vadd.f32 %v3165_v2, %v7437_v8  ;;  %v2949_v32 = vcombine.high %v7628_v0, %v7628_v0  ;;  %v7688_v12 = vrot.slane %v2947_v30, %v6828_v39 }
 0x645   : > { %v3348_v46 = vmul.f32 1.442695, %v3310_v19  ;;  %v3311_v62 = vsub.f32 0.0, %v3279_v49  ;;  %v3054_v8 = vrot.slane %v7628_v0, %v6828_v39  ;;  %v2948_v27 = vcombine.high %v7615_v21, %v7615_v21 }
 0x646   : > { %v3344_v50 = vmul.f32 1.442695, %v3308_v44  ;;  %v3309_v41 = vsub.f32 0.0, %v3277_v59  ;;  %v5288_v23 = vpop.f32.mrb[96].mxu1  ;;  %v8410_v47 = vrot.slane %v7554_v56, %v6828_v39  ;;  %v3066_v30 = vrot.slane %v7615_v21, %v6828_v39 }
 0x647   : > { %5795 = vpow2.f32 %v3348_v46  ;;  %v3350_v43 = vmul.f32 1.442695, %v3311_v62  ;;  %v3186_v26 = vadd.f32 %v5288_v23, %v7618_v9  ;;  %v3177_v29 = vpop.f32.mrb[97].mxu1  ;;  %v8411_v46 = vcombine.high %v7580_v45, %v7580_v45 }
 0x648   : > { %5797 = vpow2.f32 %v3344_v50  ;;  %v3346_v18 = vmul.f32 1.442695, %v3309_v41  ;;  %v3178_v2 = vadd.f32 %v3177_v29, %v8410_v47  ;;  %v5289_v19 = vpop.f32.mrb[98].mxu1  ;;  %v8412_v23 = vrot.slane %v7563_v3, %v6828_v39 }
 0x649   : > { %v5788_v49 = vpop.eup %5787  ;;  %5799 = vpow2.f32 %v3350_v43  ;;  %v3282_v44 = vadd.f32 %v3186_v26, %v7458_v58  ;;  %v3189_v9 = vadd.f32 %v5289_v19, %v7621_v5  ;;  %v3180_v59 = vpop.f32.mrb[99].mxu1  ;;  %v7706_v62 = vrot.slane %v8411_v46, %v6825_v48 }
 0x64a   : > { %v5790_v50 = vpop.eup %5789  ;;  %v3402_v56 = vadd.f32 1.0, %v5788_v49  ;;  %5801 = vpow2.f32 %v3346_v18  ;;  %v3280_v41 = vadd.f32 %v3178_v2, %v7449_v35  ;;  %v3181_v43 = vadd.f32 %v3180_v59, %v8412_v23 }
 0x64b   : > { %v5792_v29 = vpop.eup %5791  ;;  %v3400_v58 = vadd.f32 1.0, %v5790_v50  ;;  %v3314_v26 = vsub.f32 0.0, %v3282_v44  ;;  %v3283_v5 = vadd.f32 %v3189_v9, %v7462_v15  ;;  %v7714_v47 = vrot.slane %v2901_v1, %v6828_v39 }
 0x64c   : > { %v5794_v45 = vpop.eup %5793  ;;  %5803 = vrcp.f32 %v3402_v56  ;;  %v3403_v19 = vadd.f32 1.0, %v5792_v29  ;;  %v3312_v46 = vsub.f32 0.0, %v3280_v41  ;;  %v3281_v18 = vadd.f32 %v3181_v43, %v7454_v38 }
 0x64d   : > { %5805 = vrcp.f32 %v3400_v58  ;;  %v3401_v35 = vadd.f32 1.0, %v5794_v45  ;;  %v3356_v2 = vmul.f32 1.442695, %v3314_v26  ;;  %v3315_v49 = vsub.f32 0.0, %v3283_v5 }
 0x64e   : > { %5807 = vrcp.f32 %v3403_v19  ;;  %v3352_v3 = vmul.f32 1.442695, %v3312_v46  ;;  %v3313_v59 = vsub.f32 0.0, %v3281_v18  ;;  %v5292_v50 = vpop.f32.mrb[100].mxu1  ;;  %v7718_v44 = vrot.slane %v2949_v32, %v6828_v39 }
 0x64f   : > { %5809 = vrcp.f32 %v3401_v35  ;;  %v3358_v15 = vmul.f32 1.442695, %v3315_v49  ;;  %v3202_v1 = vadd.f32 %v5292_v50, %v7646_v42  ;;  %v3193_v9 = vpop.f32.mrb[101].mxu1  ;;  %v7722_v56 = vrot.slane %v2948_v27, %v6828_v39 }
 0x650   : > { %5811 = vpow2.f32 %v3356_v2  ;;  %v3354_v38 = vmul.f32 1.442695, %v3313_v59  ;;  %v8413_v41 = vrot.slane %v7574_v11, %v6828_v39  ;;  %v5293_v43 = vpop.f32.mrb[102].mxu1  ;;  %v2950_v29 = vcombine.high %v7706_v62, %v7706_v62 }
 0x651   : > { %v5796_v32 = vpop.eup %5795  ;;  %5813 = vpow2.f32 %v3352_v3  ;;  %v3286_v58 = vadd.f32 %v3202_v1, %v7474_v6  ;;  %v3205_v42 = vadd.f32 %v5293_v43, %v7673_v31  ;;  %v3196_v26 = vpop.f32.mrb[103].mxu1  ;;  %v3070_v27 = vrot.slane %v7706_v62, %v6828_v39 }
 0x652   : > { %v3194_v23 = vadd.f32 %v3193_v9, %v8413_v41  ;;  %v5798_v5 = vpop.eup %5797  ;;  %v3406_v45 = vadd.f32 1.0, %v5796_v32  ;;  %5815 = vpow2.f32 %v3358_v15  ;;  %v8414_v19 = vrot.slane %v7632_v14, %v6828_v39 }
 0x653   : > { %v5800_v18 = vpop.eup %5799  ;;  %v3404_v35 = vadd.f32 1.0, %v5798_v5  ;;  %5817 = vpow2.f32 %v3354_v38  ;;  %v3318_v2 = vsub.f32 0.0, %v3286_v58  ;;  %v3287_v6 = vadd.f32 %v3205_v42, %v7480_v53 }
 0x654   : > { %v3284_v11 = vadd.f32 %v3194_v23, %v7466_v24  ;;  %v3197_v46 = vadd.f32 %v3196_v26, %v8414_v19  ;;  %v5802_v31 = vpop.eup %5801  ;;  %5819 = vrcp.f32 %v3406_v45  ;;  %v3407_v49 = vadd.f32 1.0, %v5800_v18 }
 0x655   : > { %5821 = vrcp.f32 %v3404_v35  ;;  %v3405_v50 = vadd.f32 1.0, %v5802_v31  ;;  %v3364_v15 = vmul.f32 1.442695, %v3318_v2  ;;  %v3319_v24 = vsub.f32 0.0, %v3287_v6 }
 0x656   : > { %v3316_v3 = vsub.f32 0.0, %v3284_v11  ;;  %v3285_v59 = vadd.f32 %v3197_v46, %v7470_v17  ;;  %v5804_v1 = vpop.eup %5803  ;;  %5823 = vrcp.f32 %v3407_v49  ;;  %v5296_v41 = vpop.f32.mrb[104].mxu1  ;;  %v7740_v38 = vrot.slane %v2950_v29, %v6828_v39 }
 0x657   : > { %v5806_v23 = vpop.eup %5805  ;;  %5825 = vrcp.f32 %v3405_v50  ;;  %v3366_v53 = vmul.f32 1.442695, %v3319_v24  ;;  %v3218_v43 = vadd.f32 %v5296_v41, %v7655_v51  ;;  %v3209_v32 = vpop.f32.mrb[105].mxu1  ;;  %v7743_v58 = vmul.f32 %v5804_v1, %v5804_v1 }
 0x658   : > { %v3360_v14 = vmul.f32 1.442695, %v3316_v3  ;;  %v3317_v9 = vsub.f32 0.0, %v3285_v59  ;;  %v5808_v17 = vpop.eup %5807  ;;  %5827 = vpow2.f32 %v3364_v15  ;;  %v8415_v26 = vrot.slane %v7596_v33, %v6828_v39  ;;  %v5297_v45 = vpop.f32.mrb[106].mxu1 }
 0x659   : > { %v7748_v11 = vmul.f32 %v5806_v23, %v5806_v23  ;;  %v5810_v29 = vpop.eup %5809  ;;  %v3290_v19 = vadd.f32 %v3218_v43, %v7494_v28  ;;  %v3221_v46 = vadd.f32 %v5297_v45, %v7660_v61  ;;  %v3212_v51 = vpop.f32.mrb[107].mxu1  ;;  %v7752_v18 = vmul.f32 %v5808_v17, %v5808_v17 }
 0x65a   : > { %v3362_v42 = vmul.f32 1.442695, %v3317_v9  ;;  %v3210_v5 = vadd.f32 %v3209_v32, %v8415_v26  ;;  %5829 = vpow2.f32 %v3360_v14  ;;  %v5812_v35 = vpop.eup %5811  ;;  %v8416_v33 = vrot.slane %v7605_v20, %v6828_v39 }
 0x65b   : > { %5831 = vpow2.f32 %v3366_v53  ;;  %v7758_v31 = vmul.f32 %v5810_v29, %v5810_v29  ;;  %v5814_v49 = vpop.eup %5813  ;;  %v3410_v3 = vadd.f32 1.0, %v5812_v35  ;;  %v3322_v59 = vsub.f32 0.0, %v3290_v19 }
 0x65c   : > { %v3288_v2 = vadd.f32 %v3210_v5, %v7484_v37  ;;  %v3213_v6 = vadd.f32 %v3212_v51, %v8416_v33  ;;  %5833 = vpow2.f32 %v3362_v42  ;;  %v3291_v28 = vadd.f32 %v3221_v46, %v7498_v25  ;;  %v5816_v61 = vpop.eup %5815 }
 0x65d   : > { %v3408_v50 = vadd.f32 1.0, %v5814_v49  ;;  %v3496_v37 = vpack.c.bf16 %v7758_v31, %v7748_v11  ;;  %v5818_v1 = vpop.eup %5817  ;;  %5835 = vrcp.f32 %v3410_v3  ;;  %v3411_v20 = vadd.f32 1.0, %v5816_v61 }
 0x65e   : > { %v3320_v15 = vsub.f32 0.0, %v3288_v2  ;;  %v3289_v24 = vadd.f32 %v3213_v6, %v7488_v4  ;;  %v3372_v14 = vmul.f32 1.442695, %v3322_v59  ;;  %v3323_v9 = vsub.f32 0.0, %v3291_v28  ;;  %v5820_v41 = vpop.eup %5819  ;;  %v5300_v32 = vpop.f32.mrb[108].mxu1 }
 0x65f   : > { %5837 = vrcp.f32 %v3408_v50  ;;  %v3409_v23 = vadd.f32 1.0, %v5818_v1  ;;  %v5822_v25 = vpop.eup %5821  ;;  %v3234_v42 = vadd.f32 %v5300_v32, %v7676_v40  ;;  %v3225_v4 = vpop.f32.mrb[109].mxu1  ;;  %v3497_v26 = vpack.c.bf16 %v7752_v18, %v7743_v58 }
 0x660   : > { %v3368_v53 = vmul.f32 1.442695, %v3320_v15  ;;  %v3321_v43 = vsub.f32 0.0, %v3289_v24  ;;  %5839 = vrcp.f32 %v3411_v20  ;;  %v3374_v17 = vmul.f32 1.442695, %v3323_v9  ;;  %v5824_v5 = vpop.eup %5823  ;;  %v5301_v19 = vpop.f32.mrb[110].mxu1 }
 0x661   : > { %5841 = vrcp.f32 %v3409_v23  ;;  %v3226_v29 = vadd.f32 %v3225_v4, %v3034_v57  ;;  %v7770_v46 = vmul.f32 %v5822_v25, %v5822_v25  ;;  %v5826_v51 = vpop.eup %5825  ;;  %v3294_v35 = vadd.f32 %v3234_v42, %v7510_v10  ;;  %v3228_v2 = vpop.f32.mrb[111].mxu1 }
 0x662   : > { %v3370_v45 = vmul.f32 1.442695, %v3321_v43  ;;  %5843 = vpow2.f32 %v3372_v14  ;;  %v3237_v40 = vadd.f32 %v5301_v19, %v7714_v47  ;;  %v7774_v33 = vmul.f32 %v5820_v41, %v5820_v41  ;;  %v5828_v6 = vpop.eup %5827 }
 0x663   : > { %5845 = vpow2.f32 %v3368_v53  ;;  %v3292_v49 = vadd.f32 %v3226_v29, %v7502_v55  ;;  %v3229_v13 = vadd.f32 %v3228_v2, %v3038_v7  ;;  %v7780_v57 = vmul.f32 %v5826_v51, %v5826_v51 }
 0x664   : > { %v5830_v3 = vpop.eup %5829  ;;  %v3414_v59 = vadd.f32 1.0, %v5828_v6  ;;  %5847 = vpow2.f32 %v3374_v17  ;;  %v3326_v28 = vsub.f32 0.0, %v3294_v35  ;;  %v3295_v10 = vadd.f32 %v3237_v40, %v7514_v52 }
 0x665   : > { %v5832_v47 = vpop.eup %5831  ;;  %v3412_v61 = vadd.f32 1.0, %v5830_v3  ;;  %5849 = vpow2.f32 %v3370_v45  ;;  %v3324_v50 = vsub.f32 0.0, %v3292_v49  ;;  %v3293_v15 = vadd.f32 %v3229_v13, %v7506_v22  ;;  %v8417_v13 = vld [vmem:[#allocation51_spill] sm:$0xff] }
 0x666   : > { %v5834_v24 = vpop.eup %5833  ;;  %5851 = vrcp.f32 %v3414_v59  ;;  %v3415_v55 = vadd.f32 1.0, %v5832_v47  ;;  %v3380_v1 = vmul.f32 1.442695, %v3326_v28  ;;  %v3327_v34 = vsub.f32 0.0, %v3295_v10  ;;  %v5304_v9 = vpop.f32.mrb[112].mxu1 }
 0x667   : > { %5853 = vrcp.f32 %v3412_v61  ;;  %v3413_v7 = vadd.f32 1.0, %v5834_v24  ;;  %v3376_v20 = vmul.f32 1.442695, %v3324_v50  ;;  %v3325_v14 = vsub.f32 0.0, %v3293_v15  ;;  %v5836_v41 = vpop.eup %5835  ;;  %v3241_v53 = vpop.f32.mrb[113].mxu1 }
 0x668   : > { %5855 = vrcp.f32 %v3415_v55  ;;  %v3382_v23 = vmul.f32 1.442695, %v3327_v34  ;;  %v3250_v52 = vadd.f32 %v5304_v9, %v7688_v12  ;;  %v3498_v43 = vpack.c.bf16 %v7780_v57, %v7770_v46  ;;  %v5305_v17 = vpop.f32.mrb[114].mxu1 }
 0x669   : > { %v5838_v22 = vpop.eup %5837  ;;  %5857 = vrcp.f32 %v3413_v7  ;;  %v3378_v32 = vmul.f32 1.442695, %v3325_v14  ;;  %v3242_v25 = vadd.f32 %v3241_v53, %v3050_v54  ;;  %v7790_v42 = vmul.f32 %v5824_v5, %v5824_v5  ;;  %v3244_v29 = vpop.f32.mrb[115].mxu1  ;;  %v8418_v53 = vld [vmem:[#allocation41_spill] sm:$0xff] }
 0x66a   : > { %v5840_v4 = vpop.eup %5839  ;;  %5859 = vpow2.f32 %v3380_v1  ;;  %v3298_v45 = vadd.f32 %v3250_v52, %v7531_v60  ;;  %v3253_v12 = vadd.f32 %v5305_v17, %v7718_v44  ;;  %v7794_v19 = vmul.f32 %v5838_v22, %v5838_v22 }
 0x66b   : > { %v5842_v51 = vpop.eup %5841  ;;  %5861 = vpow2.f32 %v3376_v20  ;;  %v3296_v35 = vadd.f32 %v3242_v25, %v7519_v63  ;;  %v3245_v16 = vadd.f32 %v3244_v29, %v3054_v8  ;;  %v3499_v54 = vpack.c.bf16 %v7790_v42, %v7774_v33 }
 0x66c   : > { %v5844_v5 = vpop.eup %5843  ;;  %5863 = vpow2.f32 %v3382_v23  ;;  %v3330_v40 = vsub.f32 0.0, %v3298_v45  ;;  %v3299_v60 = vadd.f32 %v3253_v12, %v7538_v36  ;;  %v7803_v44 = vmul.f32 %v5842_v51, %v5842_v51  ;;  %v8419_v45 = vld [vmem:[#allocation48_spill] sm:$0xff]  ;;  %v8420_v12 = vld [vmem:[#allocation42_spill] sm:$0xff] }
 0x66d   : > { %v5846_v2 = vpop.eup %5845  ;;  %v3418_v6 = vadd.f32 1.0, %v5844_v5  ;;  %5865 = vpow2.f32 %v3378_v32  ;;  %v3328_v49 = vsub.f32 0.0, %v3296_v35  ;;  %v3297_v63 = vadd.f32 %v3245_v16, %v8417_v13  ;;  %v8421_v51 = vld [vmem:[#allocation52_spill] sm:$0xff]  ;;  %v8422_v16 = vld [vmem:[#allocation10_spill] sm:$0xff] }
 0x66e   : > { %v5848_v3 = vpop.eup %5847  ;;  %v3416_v59 = vadd.f32 1.0, %v5846_v2  ;;  %v3388_v0 = vmul.f32 1.442695, %v3330_v40  ;;  %v3331_v8 = vsub.f32 0.0, %v3299_v60  ;;  %v3500_v28 = vpack.c.bf16 %v7803_v44, %v7794_v19  ;;  %v5308_v50 = vpop.f32.mrb[116].mxu1 }
 0x66f   : > { %v5850_v10 = vpop.eup %5849  ;;  %5867 = vrcp.f32 %v3418_v6  ;;  %v3419_v47 = vadd.f32 1.0, %v5848_v3  ;;  %v3384_v61 = vmul.f32 1.442695, %v3328_v49  ;;  %v3329_v36 = vsub.f32 0.0, %v3297_v63  ;;  %v3257_v34 = vpop.f32.mrb[117].mxu1 }
 0x670   : > { %v5852_v15 = vpop.eup %5851  ;;  %5869 = vrcp.f32 %v3416_v59  ;;  %v3417_v24 = vadd.f32 1.0, %v5850_v10  ;;  %v3390_v55 = vmul.f32 1.442695, %v3331_v8  ;;  %v3266_v1 = vadd.f32 %v5308_v50, %v7722_v56  ;;  %v5309_v9 = vpop.f32.mrb[118].mxu1  ;;  %v6093_v19 = vld [vmem:[%s6443_s18] ss:$8 sps:$4 sm:$0xff]  }
 0x671   : > { %v5854_v7 = vpop.eup %5853  ;;  %5871 = vrcp.f32 %v3419_v47  ;;  %v3386_v20 = vmul.f32 1.442695, %v3329_v36  ;;  %v3258_v14 = vadd.f32 %v3257_v34, %v3066_v30  ;;  %v7812_v23 = vmul.f32 %v5836_v41, %v5836_v41  ;;  %v3260_v25 = vpop.f32.mrb[119].mxu1  ;;  %v7865_v44 = vld [vmem:[%s6443_s18 + $0x14] ss:$8 sps:$4 sm:$0xff]  }
 0x672   : > { %v5856_v52 = vpop.eup %5855  ;;  %5873 = vrcp.f32 %v3417_v24  ;;  %v3302_v22 = vadd.f32 %v3266_v1, %v8418_v53  ;;  %v3269_v32 = vadd.f32 %v5309_v9, %v7740_v38  ;;  %v7816_v17 = vmul.f32 %v5840_v4, %v5840_v4 }
 0x673   : > { %v5858_v56 = vpop.eup %5857  ;;  %v1231_v29 = vadd.f32 %v8420_v12, %v8419_v45  ;;  %5875 = vpow2.f32 %v3388_v0  ;;  %v3300_v21 = vadd.f32 %v3258_v14, %v8421_v51  ;;  %v3261_v30 = vadd.f32 %v3260_v25, %v3070_v27 }
 0x674   : > { %v5860_v41 = vpop.eup %5859  ;;  %5877 = vpow2.f32 %v3384_v61  ;;  %v3334_v35 = vsub.f32 0.0, %v3302_v22  ;;  %v3303_v5 = vadd.f32 %v3269_v32, %v8422_v16  ;;  %v3501_v38 = vpack.c.bf16 %v7816_v17, %v7812_v23  ;;  %v5621_v17 = vld [vmem:[%s8271_s8 + $0x104] ss:$8 sps:$4 sm:$0xff]  }
 0x675   : > { %v5862_v4 = vpop.eup %5861  ;;  %v3422_v40 = vadd.f32 1.0, %v5860_v41  ;;  %5879 = vpow2.f32 %v3390_v55  ;;  %v3332_v60 = vsub.f32 0.0, %v3300_v21  ;;  %v3301_v2 = vadd.f32 %v3261_v30, %v1231_v29 }
 0x676   : > { %v5864_v6 = vpop.eup %5863  ;;  %v3420_v49 = vadd.f32 1.0, %v5862_v4  ;;  %5881 = vpow2.f32 %v3386_v20  ;;  %v3335_v13 = vsub.f32 0.0, %v3303_v5  ;;  %v7827_v63 = vmul.f32 %v5854_v7, %v5854_v7 }
 0x677   : > { %v5866_v62 = vpop.eup %5865  ;;  %5883 = vrcp.f32 %v3422_v40  ;;  %v3423_v27 = vadd.f32 1.0, %v5864_v6  ;;  %v3396_v3 = vmul.f32 1.442695, %v3334_v35  ;;  %v3333_v59 = vsub.f32 0.0, %v3301_v2 }
 0x678   : > { %5885 = vrcp.f32 %v3420_v49  ;;  %v3421_v0 = vadd.f32 1.0, %v5866_v62  ;;  %v3392_v8 = vmul.f32 1.442695, %v3332_v60  ;;  %v7829_v10 = vmul.f32 %v5858_v56, %v5858_v56 }
 0x679   : > { %v5868_v47 = vpop.eup %5867  ;;  %5887 = vrcp.f32 %v3423_v27  ;;  %v3398_v61 = vmul.f32 1.442695, %v3335_v13  ;;  %v7831_v36 = vmul.f32 %v5852_v15, %v5852_v15  ;;  %v7833_v50 = vmul.f32 %v5856_v52, %v5856_v52 }
 0x67a   : > { %v5870_v24 = vpop.eup %5869  ;;  %5889 = vrcp.f32 %v3421_v0  ;;  %v3394_v55 = vmul.f32 1.442695, %v3333_v59  ;;  %v3502_v1 = vpack.c.bf16 %v7829_v10, %v7827_v63  ;;  %v3482_v14 = vmul.f32 %v5868_v47, %v5868_v47  ;;  %v5624_v63 = vld [vmem:[%s8271_s8 + $0x114] ss:$8 sps:$4 sm:$0xff]   ;;  %v5622_v10 = vld [vmem:[%s8271_s8 + $0x110] ss:$8 sps:$4 sm:$0xff]  }
 0x67b   : > { %v5872_v34 = vpop.eup %5871  ;;  %5891 = vpow2.f32 %v3396_v3  ;;  %v3503_v7 = vpack.c.bf16 %v7833_v50, %v7831_v36  ;;  %v3480_v15 = vmul.f32 %v5870_v24, %v5870_v24  ;;  %v8423_v23 = vmov 0   ;;  %v5627_v36 = vld [vmem:[%s8271_s8 + $0x124] ss:$8 sps:$4 sm:$0xff]   ;;  %v5625_v50 = vld [vmem:[%s8271_s8 + $0x120] ss:$8 sps:$4 sm:$0xff]  }
 0x67c   : > { %v5874_v20 = vpop.eup %5873  ;;  %5893 = vpow2.f32 %v3392_v8  ;;  %v3483_v9 = vmul.f32 %v5872_v34, %v5872_v34 }
 0x67d   : > { %v5876_v53 = vpop.eup %5875  ;;  %5895 = vpow2.f32 %v3398_v61  ;;  %v3481_v52 = vmul.f32 %v5874_v20, %v5874_v20 }
 0x67e   : > { %v5878_v22 = vpop.eup %5877  ;;  %v3426_v32 = vadd.f32 1.0, %v5876_v53  ;;  %5897 = vpow2.f32 %v3394_v55  ;;  %v3505_v25 = vpack.c.bf16 %v3483_v9, %v3482_v14  ;;  %v5633_v53 = vld [vmem:[%s8271_s8 + $0x144] ss:$8 sps:$4 sm:$0xff]  }
 0x67f   : > { %v5880_v56 = vpop.eup %5879  ;;  %v3424_v45 = vadd.f32 1.0, %v5878_v22  ;;  %v3504_v12 = vpack.c.bf16 %v3481_v52, %v3480_v15  ;;  %v5631_v15 = vld [vmem:[%s8271_s8 + $0x140] ss:$8 sps:$4 sm:$0xff]   ;;  %v5636_v52 = vld [vmem:[%s8271_s8 + $0x154] ss:$8 sps:$4 sm:$0xff]  }
 0x680   : > { %v5882_v29 = vpop.eup %5881  ;;  %5899 = vrcp.f32 %v3426_v32  ;;  %v3427_v51 = vadd.f32 1.0, %v5880_v56  ;;  %v5634_v22 = vld [vmem:[%s8271_s8 + $0x150] ss:$8 sps:$4 sm:$0xff]   ;;  %v5639_v32 = vld [vmem:[%s8271_s8 + $0x164] ss:$8 sps:$4 sm:$0xff]  }
 0x681   : > { %v5884_v21 = vpop.eup %5883  ;;  %5901 = vrcp.f32 %v3424_v45  ;;  %v3425_v30 = vadd.f32 1.0, %v5882_v29  ;;  %5074 = vmatprep.subr.bf16.mxu0 %v3504_v12  ;;  %v5642_v56 = vld [vmem:[%s8271_s8 + $0x174] ss:$8 sps:$4 sm:$0xff]   ;;  %v5640_v45 = vld [vmem:[%s8271_s8 + $0x170] ss:$8 sps:$4 sm:$0xff]   ;;  %v3562_v12 = vstv %s4908_s28 }
 0x682   : > { %v5886_v41 = vpop.eup %5885  ;;  %5903 = vrcp.f32 %v3427_v51  ;;  %5075 = vmatpush3.bf16.msra.mxu0 %v3496_v37  ;;  %v3486_v5 = vmul.f32 %v5884_v21, %v5884_v21 }
 0x683   : > { %v5888_v35 = vpop.eup %5887  ;;  %5905 = vrcp.f32 %v3425_v30  ;;  %5076 = vmatprep.subr.bf16.mxu0 %v3505_v25  ;;  %v3484_v60 = vmul.f32 %v5886_v41, %v5886_v41  ;;  %v5637_v25 = vld [vmem:[%s8271_s8 + $0x160] ss:$8 sps:$4 sm:$0xff]  }
 0x684   : > { %v5890_v16 = vpop.eup %5889  ;;  %v3487_v4 = vmul.f32 %v5888_v35, %v5888_v35  ;;  %v8424_v30 = vld [vmem:[#allocation44_spill] sm:$0xff] }
 0x685   : > { %v5892_v40 = vpop.eup %5891  ;;  %v3485_v2 = vmul.f32 %v5890_v16, %v5890_v16  ;;  %v3563_v41 = vmul.f32 %v3562_v12, %v8424_v30 }
 0x686   : > { %v5894_v6 = vpop.eup %5893  ;;  %v3430_v49 = vadd.f32 1.0, %v5892_v40  ;;  %5077 = vmatpush3.bf16.msra.mxu0 %v3497_v26  ;;  %v3507_v13 = vpack.c.bf16 %v3487_v4, %v3486_v5  ;;  %v8425_v40 = vld [vmem:[#allocation49_spill] sm:$0xff] }
 0x687   : > { %v5896_v62 = vpop.eup %5895  ;;  %v3428_v27 = vadd.f32 1.0, %v5894_v6  ;;  %v3506_v11 = vpack.c.bf16 %v3485_v2, %v3484_v60  ;;  %v3564_v60 = vmul.f32 %v3562_v12, %v8425_v40 }
 0x688   : > { %v5898_v31 = vpop.eup %5897  ;;  %5907 = vrcp.f32 %v3430_v49  ;;  %v3431_v37 = vadd.f32 1.0, %v5896_v62 }
 0x689   : > { %5909 = vrcp.f32 %v3428_v27  ;;  %v3429_v3 = vadd.f32 1.0, %v5898_v31  ;;  %5078 = vmatprep.subr.bf16.mxu0 %v3506_v11 }
 0x68a   : > { %v5900_v59 = vpop.eup %5899  ;;  %5911 = vrcp.f32 %v3431_v37  ;;  %5079 = vmatpush3.bf16.msra.mxu0 %v3498_v43 }
 0x68b   : > { %v5902_v0 = vpop.eup %5901  ;;  %5913 = vrcp.f32 %v3429_v3  ;;  %5080 = vmatprep.subr.bf16.mxu0 %v3507_v13  ;;  %v3490_v26 = vmul.f32 %v5900_v59, %v5900_v59  ;;  %v8426_v3 = vld [vmem:[#allocation47_spill] sm:$0xff] }
 0x68c   : > { %v5904_v58 = vpop.eup %5903  ;;  %v3488_v47 = vmul.f32 %v5902_v0, %v5902_v0  ;;  %v3565_v59 = vmul.f32 %v3562_v12, %v8426_v3  ;;  %v6105_v3 = vld [vmem:[%s6647_s16 + $0x48] sm:$0xff]  }
 0x68d   : > { %v5906_v18 = vpop.eup %5905  ;;  %v3491_v8 = vmul.f32 %v5904_v58, %v5904_v58 }
 0x68e   : > { %5081 = vmatpush3.bf16.msra.mxu0 %v3499_v54  ;;  %v3489_v61 = vmul.f32 %v5906_v18, %v5906_v18  ;;  %v8427_v18 = vld [vmem:[#allocation50_spill] sm:$0xff] }
 0x68f   : > { %v3509_v24 = vpack.c.bf16 %v3491_v8, %v3490_v26  ;;  %v3566_v26 = vmul.f32 %v3562_v12, %v8427_v18  ;;  %v6109_v18 = vld [vmem:[%s6647_s16 + $0x68] sm:$0xff]  }
 0x690   : > { %v3508_v55 = vpack.c.bf16 %v3489_v61, %v3488_v47 }
 0x692   : > { %v5908_v34 = vpop.eup %5907  ;;  %5082 = vmatprep.subr.bf16.mxu0 %v3508_v55 }
 0x693   : > { %v5910_v20 = vpop.eup %5909  ;;  %5083 = vmatpush3.bf16.msra.mxu0 %v3500_v28  ;;  %v3494_v43 = vmul.f32 %v5908_v34, %v5908_v34  ;;  %v6095_v28 = vld [vmem:[%s6443_s18 + $0x10] ss:$8 sps:$4 sm:$0xff]  }
 0x694   : > { %v5912_v46 = vpop.eup %5911  ;;  %5084 = vmatprep.subr.bf16.mxu0 %v3509_v24  ;;  %v3492_v42 = vmul.f32 %v5910_v20, %v5910_v20 }
 0x695   : > { %v5914_v57 = vpop.eup %5913  ;;  %v3495_v33 = vmul.f32 %v5912_v46, %v5912_v46 }
 0x696   : > { %v3493_v54 = vmul.f32 %v5914_v57, %v5914_v57 }
 0x697   : > { %5085 = vmatpush3.bf16.msra.mxu0 %v3501_v38  ;;  %v3511_v14 = vpack.c.bf16 %v3495_v33, %v3494_v43  ;;  %v5619_v38 = vld [vmem:[%s8271_s8 + $0x100] ss:$8 sps:$4 sm:$0xff]  }
 0x698   : > { %v3510_v9 = vpack.c.bf16 %v3493_v54, %v3492_v42 }
 0x69a   : > { %5086 = vmatprep.subr.bf16.mxu0 %v3510_v9 }
 0x69b   : > { %5087 = vmatpush3.bf16.msra.mxu0 %v3502_v1  ;;  %v5630_v1 = vld [vmem:[%s8271_s8 + $0x134] ss:$8 sps:$4 sm:$0xff]  }
 0x69c   : > { %5088 = vmatprep.subr.bf16.mxu0 %v3511_v14 }
 0x69f   : > { %5089 = vmatpush3.bf16.msra.mxu0 %v3503_v7  ;;  %v5628_v7 = vld [vmem:[%s8271_s8 + $0x130] ss:$8 sps:$4 sm:$0xff]  }
 0x6a0   : > { %3706 = vmatprep.subr.bf16.mxu0 %v5621_v17 }
 0x6a2   : > { %3545 = vmatmul.mubr.bf16.vlgmr.msra.gmra.mrb[100].mxu0 %v6093_v19 }
 0x6a3   : > { %3552 = vmatprep.mubr.bf16.mxu0 %v7865_v44  ;;  %3707 = vmatpush1.bf16.msra.mxu0 %v5619_v38 }
 0x6a4   : > { %3708 = vmatprep.subr.bf16.mxu0 %v5624_v63 }
 0x6a7   : > { %3709 = vmatpush1.bf16.msra.mxu0 %v5622_v10 }
 0x6a8   : > { %3710 = vmatprep.subr.bf16.mxu0 %v5627_v36 }
 0x6aa   : > { %3553 = vmatmul.mubr.bf16.gmra.mrb[104].mxu0 %v6095_v28 }
 0x6ab   : > { %3738 = vmatprep.mubr.bf16.mxu0 %v8423_v23  ;;  %3711 = vmatpush1.bf16.msra.mxu0 %v5625_v50 }
 0x6ac   : > { %3712 = vmatprep.subr.bf16.mxu0 %v5630_v1 }
 0x6af   : > { %3713 = vmatpush1.bf16.msra.mxu0 %v5628_v7 }
 0x6b0   : > { %3714 = vmatprep.subr.bf16.mxu0 %v5633_v53 }
 0x6b3   : > { %3715 = vmatpush1.bf16.msra.mxu0 %v5631_v15 }
 0x6b4   : > { %3716 = vmatprep.subr.bf16.mxu0 %v5636_v52 }
 0x6b7   : > { %3717 = vmatpush1.bf16.msra.mxu0 %v5634_v22 }
 0x6b8   : > { %3718 = vmatprep.subr.bf16.mxu0 %v5639_v32 }
 0x6bb   : > { %3719 = vmatpush1.bf16.msra.mxu0 %v5637_v25 }
 0x6bc   : > { %3720 = vmatprep.subr.bf16.mxu0 %v5642_v56 }
 0x6bf   : > { %3721 = vmatpush1.bf16.msra.mxu0 %v5640_v45 }
 0x775   : > { %v5090_v29 = vpop.f32.mrb[100].mxu0 }
 0x776   : > { %v5091_v51 = vpop.f32.mrb[101].mxu0 }
 0x777   : > { %v5092_v21 = vadd.f32 %v5091_v51, %v5090_v29  ;;  %v5093_v35 = vpop.f32.mrb[102].mxu0 }
 0x778   : > { %v5094_v16 = vpop.f32.mrb[103].mxu0 }
 0x779   : > { %v3567_v5 = vadd.f32 %v5092_v21, %v3563_v41  ;;  %v5095_v4 = vadd.f32 %v5094_v16, %v5093_v35  ;;  %v6096_v21 = vld [vmem:[%s6443_s18 + $0x4] ss:$8 sps:$4 sm:$0xff]  }
 0x77b   : > { %v3575_v2 = vand.u32 2147483647, %v3567_v5  ;;  %v3568_v6 = vadd.f32 %v5095_v4, %v3564_v60  ;;  %v3571_v36 = vmax.f32 %v3567_v5, 0.0 }
 0x77d   : > { %v3579_v49 = vsub.f32 0.0, %v3575_v2  ;;  %v3576_v13 = vand.u32 2147483647, %v3568_v6  ;;  %v5096_v62 = vpop.f32.mrb[104].mxu0  ;;  %v3572_v50 = vmax.f32 %v3568_v6, 0.0  ;;  %v6097_v6 = vld [vmem:[%s6647_s16 + $0x8] sm:$0xff]  }
 0x77e   : > { %v5097_v27 = vpop.f32.mrb[105].mxu0 }
 0x77f   : > { %v3583_v11 = vmul.f32 1.442695, %v3579_v49  ;;  %v3580_v31 = vsub.f32 0.0, %v3576_v13  ;;  %v5098_v37 = vadd.f32 %v5097_v27, %v5096_v62  ;;  %v5099_v0 = vpop.f32.mrb[106].mxu0  ;;  %v6098_v49 = vld [vmem:[%s6647_s16 + $0x10] sm:$0xff]   ;;  %v6099_v13 = vld [vmem:[%s6647_s16 + $0x18] sm:$0xff]  }
 0x780   : > { %v5100_v58 = vpop.f32.mrb[107].mxu0  ;;  %v6100_v62 = vld [vmem:[%s6647_s16 + $0x20] sm:$0xff]   ;;  %v6101_v27 = vld [vmem:[%s6647_s16 + $0x28] sm:$0xff]  }
 0x781   : > { %5915 = vpow2.f32 %v3583_v11  ;;  %v3585_v8 = vmul.f32 1.442695, %v3580_v31  ;;  %v3569_v47 = vadd.f32 %v5098_v37, %v3565_v59  ;;  %v5101_v61 = vadd.f32 %v5100_v58, %v5099_v0  ;;  %v6102_v11 = vld [vmem:[%s6647_s16 + $0x30] sm:$0xff]   ;;  %v6103_v31 = vld [vmem:[%s6647_s16 + $0x38] sm:$0xff]   ;;  %v6104_v37 = vld [vmem:[%s6647_s16 + $0x40] sm:$0xff]  }
 0x782   : > { %v6106_v59 = vld [vmem:[%s6647_s16 + $0x50] sm:$0xff]   ;;  %v6107_v0 = vld [vmem:[%s6647_s16 + $0x58] sm:$0xff]   ;;  %v6108_v58 = vld [vmem:[%s6647_s16 + $0x60] sm:$0xff]  }
 0x783   : > { %5917 = vpow2.f32 %v3585_v8  ;;  %v3577_v24 = vand.u32 2147483647, %v3569_v47  ;;  %v3570_v55 = vadd.f32 %v5101_v61, %v3566_v26  ;;  %v3573_v25 = vmax.f32 %v3569_v47, 0.0  ;;  %v6110_v26 = vld [vmem:[%s6647_s16 + $0x70] sm:$0xff]   ;;  %v6111_v8 = vld [vmem:[%s6647_s16 + $0x78] sm:$0xff]   ;;  %s6201_s16 = smov [#allocation5]  }
 0x784   : > { %s6134_s19 = sshll.u32 %s6201_s16, 4  ;;  %s6135_s19 = int_to_ptr.vmem [resolvable:$false] %s6134_s19 }
 0x785   : > { %v3581_v34 = vsub.f32 0.0, %v3577_v24  ;;  %v3578_v20 = vand.u32 2147483647, %v3570_v55  ;;  %v3574_v56 = vmax.f32 %v3570_v55, 0.0 }
 0x787   : > { %v3587_v46 = vmul.f32 1.442695, %v3581_v34  ;;  %v3582_v57 = vsub.f32 0.0, %v3578_v20 }
 0x789   : > { %5919 = vpow2.f32 %v3587_v46  ;;  %v3589_v43 = vmul.f32 1.442695, %v3582_v57 }
 0x78b   : > { %v5916_v33 = vpop.eup %5915  ;;  %5921 = vpow2.f32 %v3589_v43 }
 0x78c   : > { %v3591_v42 = vadd.f32 1.0, %v5916_v33 }
 0x78d   : > { %v5918_v54 = vpop.eup %5917 }
 0x78e   : > { %5923 = vlog2.f32 %v3591_v42  ;;  %v3592_v14 = vadd.f32 1.0, %v5918_v54 }
 0x790   : > { %5925 = vlog2.f32 %v3592_v14  ;;  %v8428_v14 = vld [vmem:[#allocation46_spill] sm:$0xff] }
 0x793   : > { %v5920_v9 = vpop.eup %5919 }
 0x794   : > { %v3593_v19 = vadd.f32 1.0, %v5920_v9 }
 0x795   : > { %v5922_v28 = vpop.eup %5921 }
 0x796   : > { %5927 = vlog2.f32 %v3593_v19  ;;  %v3594_v17 = vadd.f32 1.0, %v5922_v28 }
 0x798   : > { %v5924_v38 = vpop.eup %5923  ;;  %5929 = vlog2.f32 %v3594_v17 }
 0x799   : > { %v3596_v63 = vmul.f32 0.6931472, %v5924_v38 }
 0x79a   : > { %v5926_v10 = vpop.eup %5925 }
 0x79b   : > { %v3598_v1 = vmul.f32 0.6931472, %v5926_v10  ;;  %v7922_v7 = vadd.f32 %v3596_v63, %v3571_v36 }
 0x79d   : > { %v7924_v53 = vadd.f32 %v3598_v1, %v3572_v50 }
 0x79f   : > { %v3624_v15 = vpack.c.bf16 %v7924_v53, %v7922_v7 }
 0x7a0   : > { %v5928_v52 = vpop.eup %5927 }
 0x7a1   : > { %3739 = vmatmul.mubr.bf16.vlgmr.msra.gmra.mrb[108].mxu0 %v3624_v15  ;;  %v3600_v22 = vmul.f32 0.6931472, %v5928_v52  ;;  %v6112_v15 = vld [vmem:[%s8273_s10] sm:$0x7] }
 0x7a2   : > { %v5930_v32 = vpop.eup %5929  ;;  %3748 = vmatprep.mubr.bf16.mxu0 %v8423_v23 }
 0x7a3   : > { %v3602_v45 = vmul.f32 0.6931472, %v5930_v32  ;;  %v7929_v12 = vadd.f32 %v3600_v22, %v3573_v25 }
 0x7a5   : > { %v7931_v29 = vadd.f32 %v3602_v45, %v3574_v56 }
 0x7a7   : > { %v3625_v51 = vpack.c.bf16 %v7931_v29, %v7929_v12 }
 0x7a9   : > { %3749 = vmatmul.mubr.bf16.gmra.mrb[112].mxu0 %v3625_v51 }
 0x7aa   : > { %4554 = vmatprep.mubr.bf16.mxu0 %v6096_v21 }
 0x874   : > { %v3740_v30 = vpop.f32.mrb[108].mxu0 }
 0x875   : > { %v3742_v41 = vpop.f32.mrb[109].mxu0  ;;  %v3772_v47 = vrot.slane %v3740_v30, %v6825_v48  ;;  %v3765_v61 = vcombine.high %v3740_v30, %v3740_v30 }
 0x876   : > { %v3744_v35 = vpop.f32.mrb[110].mxu0 }
 0x877   : > { %v3746_v23 = vpop.f32.mrb[111].mxu0  ;;  %v3780_v24 = vcombine.high %v3772_v47, %v3772_v47  ;;  %v3779_v55 = vrot.slane %v3765_v61, %v6825_v48  ;;  %v3788_v34 = vrot.slane %v3772_v47, %v6825_v48  ;;  %v3814_v20 = vcombine.high %v3744_v35, %v3744_v35 }
 0x878   : > { %v3759_v16 = vpack.c.bf16 %v3746_v23, %v3742_v41  ;;  %v3821_v57 = vrot.slane %v3744_v35, %v6825_v48 }
 0x879   : > { %v3802_v46 = vrot.slane %v3780_v24, %v6825_v48  ;;  %v3795_v43 = vrot.slane %v3779_v55, %v6825_v48  ;;  %v3781_v42 = vcombine.high %v3779_v55, %v3779_v55  ;;  %v3810_v54 = vcombine.high %v3788_v34, %v3788_v34 }
 0x87a   : > { %5310 = vmatprep.subr.bf16.mxu1 %v3759_v16  ;;  %v3828_v9 = vrot.slane %v3814_v20, %v6825_v48  ;;  %v3829_v19 = vcombine.high %v3821_v57, %v3821_v57  ;;  %v7978_v28 = vrot.slane %v3821_v57, %v6825_v48  ;;  %v3964_v56 = vrot.slane %v3788_v34, %v6828_v39 }
 0x87b   : > { %5311 = vmatpush3.bf16.msra.mxu1 %v3759_v16  ;;  %v3812_v38 = vcombine.high %v3802_v46, %v3802_v46  ;;  %v3811_v36 = vcombine.high %v3795_v43, %v3795_v43  ;;  %v3809_v50 = vrot.slane %v3781_v42, %v6825_v48  ;;  %v3972_v22 = vrot.slane %v3810_v54, %v6828_v39 }
 0x87c   : > { %v3750_v5 = vpop.f32.mrb[112].mxu0  ;;  %v3830_v32 = vcombine.high %v3828_v9, %v3828_v9  ;;  %v7994_v25 = vrot.slane %v3828_v9, %v6825_v48  ;;  %v3968_v45 = vrot.slane %v3802_v46, %v6828_v39  ;;  %v3851_v51 = vrot.slane %v3829_v19, %v6825_v48 }
 0x87d   : > { %v3752_v4 = vpop.f32.mrb[113].mxu0  ;;  %v3863_v33 = vcombine.high %v3750_v5, %v3750_v5  ;;  %v3870_v63 = vrot.slane %v3750_v5, %v6825_v48  ;;  %v3859_v21 = vcombine.high %v7978_v28, %v7978_v28  ;;  %v3976_v41 = vrot.slane %v3812_v38, %v6828_v39 }
 0x87e   : > { %v7936_v40 = vpop.f32.mrb[114].mxu0  ;;  %v3988_v5 = vrot.slane %v3811_v36, %v6828_v39  ;;  %v3996_v46 = vrot.slane %v7978_v28, %v6828_v39  ;;  %v3861_v54 = vcombine.high %v3851_v51, %v3851_v51  ;;  %v4000_v19 = vrot.slane %v3851_v51, %v6828_v39 }
 0x87f   : > { %v3756_v60 = vpop.f32.mrb[115].mxu0  ;;  %v3912_v17 = vcombine.high %v7936_v40, %v7936_v40  ;;  %v3877_v10 = vrot.slane %v3863_v33, %v6825_v48  ;;  %v3919_v1 = vrot.slane %v7936_v40, %v6825_v48  ;;  %v3878_v35 = vcombine.high %v3870_v63, %v3870_v63 }
 0x880   : > { %v3760_v2 = vpack.c.bf16 %v3756_v60, %v3752_v4  ;;  %v8004_v16 = vrot.slane %v3870_v63, %v6825_v48  ;;  %v4004_v20 = vrot.slane %v3859_v21, %v6828_v39 }
 0x881   : > { %v3926_v30 = vrot.slane %v3912_v17, %v6825_v48  ;;  %v3879_v23 = vcombine.high %v3877_v10, %v3877_v10  ;;  %v3927_v4 = vcombine.high %v3919_v1, %v3919_v1  ;;  %v8008_v40 = vrot.slane %v3919_v1, %v6825_v48 }
 0x882   : > { %5312 = vmatprep.subr.bf16.mxu1 %v3760_v2  ;;  %v3860_v17 = vcombine.high %v7994_v25, %v7994_v25 }
 0x883   : > { %5313 = vmatpush3.bf16.msra.mxu1 %v3760_v2  ;;  %v3813_v2 = vcombine.high %v3809_v50, %v3809_v50 }
 0x885   : > { %v3992_v61 = vrot.slane %v3813_v2, %v6828_v39 }
 0x886   : > { %5315 = vmatmul.mubr.msk.bf16.vlgmr.msra.gmra.mrb[16].mxu1 %vm528_vm0, %v6097_v6  ;;  %v8012_v6 = vrot.slane %v3830_v32, %v6825_v48  ;;  %v4008_v32 = vrot.slane %v3861_v54, %v6828_v39 }
 0x887   : > { %5318 = vmatprep.mubr.msk.bf16.mxu1 %vm528_vm0, %v6098_v49 }
 0x88e   : > { %5319 = vmatmul.mubr.msk.bf16.gmra.mrb[20].mxu1 %vm528_vm0, %v6099_v13 }
 0x88f   : > { %5322 = vmatprep.mubr.msk.bf16.mxu1 %vm528_vm0, %v6100_v62  ;;  %v3980_v62 = vrot.slane %v3795_v43, %v6828_v39 }
 0x896   : > { %5323 = vmatmul.mubr.msk.bf16.gmra.mrb[24].mxu1 %vm528_vm0, %v6101_v27  ;;  %v8018_v27 = vrot.slane %v3877_v10, %v6825_v48 }
 0x897   : > { %5326 = vmatprep.mubr.msk.bf16.mxu1 %vm528_vm0, %v6102_v11  ;;  %v3928_v11 = vcombine.high %v3926_v30, %v3926_v30 }
 0x899   : > { %v8045_v57 = vrot.slane %v3928_v11, %v6825_v48 }
 0x89e   : > { %5327 = vmatmul.mubr.msk.bf16.gmra.mrb[28].mxu1 %vm528_vm0, %v6103_v31 }
 0x89f   : > { %5330 = vmatprep.mubr.msk.bf16.mxu1 %vm528_vm0, %v6104_v37  ;;  %v3984_v37 = vrot.slane %v3809_v50, %v6828_v39 }
 0x8a6   : > { %5331 = vmatmul.mubr.msk.bf16.gmra.mrb[32].mxu1 %vm528_vm0, %v6105_v3  ;;  %v8023_v3 = vrot.slane %v3878_v35, %v6825_v48  ;;  %v4016_v35 = vrot.slane %v8012_v6, %v6828_v39 }
 0x8a7   : > { %5334 = vmatprep.mubr.msk.bf16.mxu1 %vm528_vm0, %v6106_v59  ;;  %v8026_v59 = vrot.slane %v3879_v23, %v6825_v48 }
 0x8ae   : > { %5335 = vmatmul.mubr.msk.bf16.gmra.mrb[36].mxu1 %vm528_vm0, %v6107_v0  ;;  %v3908_v0 = vcombine.high %v8004_v16, %v8004_v16 }
 0x8af   : > { %5338 = vmatprep.mubr.msk.bf16.mxu1 %vm528_vm0, %v6108_v58 }
 0x8b6   : > { %5339 = vmatmul.mubr.msk.bf16.gmra.mrb[40].mxu1 %vm528_vm0, %v6109_v18  ;;  %v8032_v18 = vrot.slane %v3926_v30, %v6825_v48 }
 0x8b7   : > { %5342 = vmatprep.mubr.msk.bf16.mxu1 %vm528_vm0, %v6110_v26  ;;  %v8035_v26 = vrot.slane %v3927_v4, %v6825_v48  ;;  %v4012_v48 = vrot.slane %v7994_v25, %v6828_v39  ;;  %v4020_v25 = vrot.slane %v3860_v17, %v6828_v39  ;;  %v4036_v4 = vrot.slane %v3908_v0, %v6828_v39 }
 0x8b8   : > { %v3911_v17 = vcombine.high %v8026_v59, %v8026_v59 }
 0x8be   : > { %5343 = vmatmul.mubr.msk.bf16.gmra.mrb[44].mxu1 %vm528_vm0, %v6111_v8  ;;  %v3957_v8 = vcombine.high %v8008_v40, %v8008_v40 }
 0x8bf   : > { %4562 = vmatprep.mubr.bf16.mxu1 %v7865_v44  ;;  %v917_v44 = vsub.s32 2, %v8428_v14 }
 0x8c1   : > { %v7990_v52 = vrot.slane %v6112_v15, %v917_v44 }
 0x8c3   : > { %v5364_v60 = vadd.f32 %v3972_v22, %v7990_v52  ;;  %v5366_v49 = vadd.f32 %v3964_v56, %v7990_v52  ;;  %v5370_v13 = vadd.f32 %v3968_v45, %v7990_v52  ;;  %v5368_v31 = vadd.f32 %v3976_v41, %v7990_v52 }
 0x8c4   : > { %v5372_v58 = vadd.f32 %v3988_v5, %v7990_v52  ;;  %v5374_v34 = vadd.f32 %v3980_v62, %v7990_v52  ;;  %v5378_v42 = vadd.f32 %v3984_v37, %v7990_v52  ;;  %v5376_v28 = vadd.f32 %v3992_v61, %v7990_v52 }
 0x8c5   : > { %v5380_v50 = vadd.f32 %v4004_v20, %v7990_v52  ;;  %v5382_v1 = vadd.f32 %v3996_v46, %v7990_v52  ;;  %v3862_v56 = vcombine.high %v8012_v6, %v8012_v6  ;;  %v8060_v51 = vadd.f32 %v4000_v19, %v7990_v52 }
 0x8c6   : > { %v8064_v41 = vadd.f32 %v4012_v48, %v7990_v52  ;;  %v4028_v6 = vrot.slane %v8004_v16, %v6828_v39  ;;  %v5388_v61 = vadd.f32 %v4020_v25, %v7990_v52  ;;  %v8082_v20 = vadd.f32 %v4036_v4, %v7990_v52 }
 0x8c7   : > { %v4024_v62 = vrot.slane %v3862_v56, %v6828_v39  ;;  %v4044_v19 = vrot.slane %v8018_v27, %v6828_v39 }
 0x8c8   : > { %v8091_v54 = vadd.f32 %v4028_v6, %v7990_v52  ;;  %v3959_v6 = vcombine.high %v8035_v26, %v8035_v26 }
 0x8c9   : > { %v8086_v16 = vadd.f32 %v4024_v62, %v7990_v52 }
 0x959   : > { %v5316_v47 = vpop.f32.mrb[16].mxu1 }
 0x95a   : > { %v5365_v24 = vadd.f32 %v5364_v60, %v5316_v47  ;;  %v4155_v55 = vpop.f32.mrb[17].mxu1  ;;  %v3910_v60 = vcombine.high %v8023_v3, %v8023_v3 }
 0x95b   : > { %v5367_v43 = vadd.f32 %v5366_v49, %v4155_v55  ;;  %v5317_v33 = vpop.f32.mrb[18].mxu1 }
 0x95c   : > { %v4316_v14 = vsub.f32 0.0, %v5365_v24  ;;  %v5369_v44 = vadd.f32 %v5368_v31, %v5317_v33  ;;  %v4158_v9 = vpop.f32.mrb[19].mxu1  ;;  %v8079_v24 = vadd.f32 %v4016_v35, %v7990_v52  ;;  %v4040_v46 = vrot.slane %v3910_v60, %v6828_v39 }
 0x95d   : > { %v4314_v38 = vsub.f32 0.0, %v5367_v43  ;;  %v5371_v63 = vadd.f32 %v5370_v13, %v4158_v9  ;;  %v5384_v13 = vadd.f32 %v4008_v32, %v7990_v52 }
 0x95e   : > { %v4350_v10 = vmul.f32 1.442695, %v4316_v14  ;;  %v4317_v36 = vsub.f32 0.0, %v5369_v44  ;;  %v8101_v48 = vadd.f32 %v4040_v46, %v7990_v52 }
 0x95f   : > { %v4346_v15 = vmul.f32 1.442695, %v4314_v38  ;;  %v4315_v22 = vsub.f32 0.0, %v5371_v63 }
 0x960   : > { %5931 = vpow2.f32 %v4350_v10  ;;  %v4352_v45 = vmul.f32 1.442695, %v4317_v36  ;;  %v4048_v10 = vrot.slane %v8026_v59, %v6828_v39 }
 0x961   : > { %5933 = vpow2.f32 %v4346_v15  ;;  %v4348_v21 = vmul.f32 1.442695, %v4315_v22  ;;  %v5320_v30 = vpop.f32.mrb[20].mxu1 }
 0x962   : > { %5935 = vpow2.f32 %v4352_v45  ;;  %v5373_v23 = vadd.f32 %v5372_v58, %v5320_v30  ;;  %v4171_v5 = vpop.f32.mrb[21].mxu1  ;;  %v4032_v58 = vrot.slane %v8023_v3, %v6828_v39  ;;  %v3909_v3 = vcombine.high %v8018_v27, %v8018_v27 }
 0x963   : > { %5937 = vpow2.f32 %v4348_v21  ;;  %v5375_v2 = vadd.f32 %v5374_v34, %v4171_v5  ;;  %v5321_v49 = vpop.f32.mrb[22].mxu1 }
 0x964   : > { %v4320_v11 = vsub.f32 0.0, %v5373_v23  ;;  %v5377_v31 = vadd.f32 %v5376_v28, %v5321_v49  ;;  %v4174_v37 = vpop.f32.mrb[23].mxu1  ;;  %v8094_v14 = vadd.f32 %v4032_v58, %v7990_v52  ;;  %v4052_v27 = vrot.slane %v3909_v3, %v6828_v39 }
 0x965   : > { %v4318_v0 = vsub.f32 0.0, %v5375_v2  ;;  %v5379_v47 = vadd.f32 %v5378_v42, %v4174_v37  ;;  %v8118_v37 = vadd.f32 %v4048_v10, %v7990_v52 }
 0x966   : > { %v4358_v55 = vmul.f32 1.442695, %v4320_v11  ;;  %v4321_v34 = vsub.f32 0.0, %v5377_v31  ;;  %v4056_v11 = vrot.slane %v3911_v17, %v6828_v39 }
 0x967   : > { %v4354_v43 = vmul.f32 1.442695, %v4318_v0  ;;  %v4319_v33 = vsub.f32 0.0, %v5379_v47  ;;  %v8123_v47 = vadd.f32 %v4052_v27, %v7990_v52  ;;  %v4064_v27 = vrot.slane %v8035_v26, %v6828_v39 }
 0x968   : > { %5939 = vpow2.f32 %v4358_v55  ;;  %v4360_v42 = vmul.f32 1.442695, %v4321_v34 }
 0x969   : > { %5941 = vpow2.f32 %v4354_v43  ;;  %v4356_v44 = vmul.f32 1.442695, %v4319_v33  ;;  %v5324_v9 = vpop.f32.mrb[24].mxu1 }
 0x96a   : > { %v5932_v38 = vpop.eup %5931  ;;  %5943 = vpow2.f32 %v4360_v42  ;;  %v5381_v63 = vadd.f32 %v5380_v50, %v5324_v9  ;;  %v4187_v28 = vpop.f32.mrb[25].mxu1  ;;  %v4068_v50 = vrot.slane %v3957_v8, %v6828_v39  ;;  %v8114_v8 = vadd.f32 %v4044_v19, %v7990_v52 }
 0x96b   : > { %v5934_v36 = vpop.eup %5933  ;;  %v4412_v15 = vadd.f32 1.0, %v5932_v38  ;;  %5945 = vpow2.f32 %v4356_v44  ;;  %v5383_v22 = vadd.f32 %v5382_v1, %v4187_v28  ;;  %v5325_v32 = vpop.f32.mrb[26].mxu1 }
 0x96c   : > { %v5936_v56 = vpop.eup %5935  ;;  %v4410_v45 = vadd.f32 1.0, %v5934_v36  ;;  %v4324_v25 = vsub.f32 0.0, %v5381_v63  ;;  %v5385_v21 = vadd.f32 %v5384_v13, %v5325_v32  ;;  %v4190_v30 = vpop.f32.mrb[27].mxu1  ;;  %v4060_v13 = vrot.slane %v8008_v40, %v6828_v39 }
 0x96d   : > { %v5938_v35 = vpop.eup %5937  ;;  %5947 = vrcp.f32 %v4412_v15  ;;  %v4413_v59 = vadd.f32 1.0, %v5936_v56  ;;  %v4322_v23 = vsub.f32 0.0, %v5383_v22  ;;  %v5387_v5 = vadd.f32 %v8060_v51, %v4190_v30 }
 0x96e   : > { %5949 = vrcp.f32 %v4410_v45  ;;  %v4411_v1 = vadd.f32 1.0, %v5938_v35  ;;  %v4366_v4 = vmul.f32 1.442695, %v4324_v25  ;;  %v4325_v60 = vsub.f32 0.0, %v5385_v21 }
 0x96f   : > { %5951 = vrcp.f32 %v4413_v59  ;;  %v4362_v2 = vmul.f32 1.442695, %v4322_v23  ;;  %v4323_v49 = vsub.f32 0.0, %v5387_v5  ;;  %v8126_v55 = vadd.f32 %v4068_v50, %v7990_v52 }
 0x970   : > { %5953 = vrcp.f32 %v4411_v1  ;;  %v4368_v62 = vmul.f32 1.442695, %v4325_v60  ;;  %v8130_v3 = vadd.f32 %v4060_v13, %v7990_v52  ;;  %v8137_v45 = vadd.f32 %v4056_v11, %v7990_v52 }
 0x971   : > { %5955 = vpow2.f32 %v4366_v4  ;;  %v4364_v31 = vmul.f32 1.442695, %v4323_v49  ;;  %v5328_v51 = vpop.f32.mrb[28].mxu1  ;;  %v8140_v25 = vrot.slane %v3959_v6, %v6828_v39  ;;  %v3958_v50 = vcombine.high %v8032_v18, %v8032_v18 }
 0x972   : > { %v5940_v58 = vpop.eup %5939  ;;  %5957 = vpow2.f32 %v4362_v2  ;;  %v5389_v0 = vadd.f32 %v5388_v61, %v5328_v51  ;;  %v4203_v40 = vpop.f32.mrb[29].mxu1  ;;  %v4076_v35 = vrot.slane %v8032_v18, %v6828_v39 }
 0x973   : > { %v5942_v34 = vpop.eup %5941  ;;  %v4416_v46 = vadd.f32 1.0, %v5940_v58  ;;  %5959 = vpow2.f32 %v4368_v62  ;;  %v5391_v43 = vadd.f32 %v8064_v41, %v4203_v40  ;;  %v5329_v33 = vpop.f32.mrb[30].mxu1 }
 0x974   : > { %v5944_v42 = vpop.eup %5943  ;;  %v4414_v44 = vadd.f32 1.0, %v5942_v34  ;;  %5961 = vpow2.f32 %v4364_v31  ;;  %v4328_v61 = vsub.f32 0.0, %v5389_v0  ;;  %v5393_v9 = vadd.f32 %v8086_v16, %v5329_v33  ;;  %v4206_v19 = vpop.f32.mrb[31].mxu1 }
 0x975   : > { %v5946_v17 = vpop.eup %5945  ;;  %5963 = vrcp.f32 %v4416_v46  ;;  %v4417_v38 = vadd.f32 1.0, %v5944_v42  ;;  %v4326_v63 = vsub.f32 0.0, %v5391_v43  ;;  %v5395_v28 = vadd.f32 %v8079_v24, %v4206_v19 }
 0x976   : > { %5965 = vrcp.f32 %v4414_v44  ;;  %v4415_v10 = vadd.f32 1.0, %v5946_v17  ;;  %v4374_v41 = vmul.f32 1.442695, %v4328_v61  ;;  %v4329_v36 = vsub.f32 0.0, %v5393_v9 }
 0x977   : > { %v5948_v15 = vpop.eup %5947  ;;  %5967 = vrcp.f32 %v4417_v38  ;;  %v4370_v22 = vmul.f32 1.442695, %v4326_v63  ;;  %v4327_v32 = vsub.f32 0.0, %v5395_v28  ;;  %v8153_v17 = vadd.f32 %v4064_v27, %v7990_v52 }
 0x978   : > { %v5950_v56 = vpop.eup %5949  ;;  %5969 = vrcp.f32 %v4415_v10  ;;  %v4376_v16 = vmul.f32 1.442695, %v4329_v36  ;;  %v4476_v59 = vmul.f32 %v5948_v15, %v5948_v15  ;;  %v4084_v10 = vrot.slane %v3958_v50, %v6828_v39 }
 0x979   : > { %v5952_v24 = vpop.eup %5951  ;;  %5971 = vpow2.f32 %v4374_v41  ;;  %v4372_v21 = vmul.f32 1.442695, %v4327_v32  ;;  %v5332_v30 = vpop.f32.mrb[32].mxu1  ;;  %v4474_v23 = vmul.f32 %v5950_v56, %v5950_v56  ;;  %v3960_v41 = vcombine.high %v8045_v57, %v8045_v57 }
 0x97a   : > { %v5954_v26 = vpop.eup %5953  ;;  %5973 = vpow2.f32 %v4370_v22  ;;  %v5397_v5 = vadd.f32 %v8082_v20, %v5332_v30  ;;  %v4219_v1 = vpop.f32.mrb[33].mxu1  ;;  %v4477_v60 = vmul.f32 %v5952_v24, %v5952_v24 }
 0x97b   : > { %v5956_v4 = vpop.eup %5955  ;;  %v4475_v2 = vmul.f32 %v5954_v26, %v5954_v26  ;;  %5975 = vpow2.f32 %v4376_v16  ;;  %v5399_v49 = vadd.f32 %v8091_v54, %v4219_v1  ;;  %v5333_v13 = vpop.f32.mrb[34].mxu1 }
 0x97c   : > { %v5958_v62 = vpop.eup %5957  ;;  %v4420_v11 = vadd.f32 1.0, %v5956_v4  ;;  %5977 = vpow2.f32 %v4372_v21  ;;  %v4332_v31 = vsub.f32 0.0, %v5397_v5  ;;  %v5401_v51 = vadd.f32 %v8101_v48, %v5333_v13  ;;  %v4222_v6 = vpop.f32.mrb[35].mxu1 }
 0x97d   : > { %v5960_v58 = vpop.eup %5959  ;;  %v4418_v0 = vadd.f32 1.0, %v5958_v62  ;;  %v4330_v40 = vsub.f32 0.0, %v5399_v49  ;;  %v5403_v20 = vadd.f32 %v8094_v14, %v4222_v6  ;;  %v8150_v34 = vpack.c.bf16 %v4475_v2, %v4474_v23 }
 0x97e   : > { %v5962_v46 = vpop.eup %5961  ;;  %5979 = vrcp.f32 %v4420_v11  ;;  %v4421_v43 = vadd.f32 1.0, %v5960_v58  ;;  %v4382_v33 = vmul.f32 1.442695, %v4332_v31  ;;  %v4333_v54 = vsub.f32 0.0, %v5401_v51 }
 0x97f   : > { %v5964_v42 = vpop.eup %5963  ;;  %5981 = vrcp.f32 %v4418_v0  ;;  %v4419_v44 = vadd.f32 1.0, %v5962_v46  ;;  %v4378_v61 = vmul.f32 1.442695, %v4330_v40  ;;  %v4331_v9 = vsub.f32 0.0, %v5403_v20 }
 0x980   : > { %v5966_v19 = vpop.eup %5965  ;;  %5983 = vrcp.f32 %v4421_v43  ;;  %v4384_v48 = vmul.f32 1.442695, %v4333_v54  ;;  %v8155_v38 = vpack.c.bf16 %v4477_v60, %v4476_v59  ;;  %v4480_v15 = vmul.f32 %v5964_v42, %v5964_v42 }
 0x981   : > { %v5968_v14 = vpop.eup %5967  ;;  %5985 = vrcp.f32 %v4419_v44  ;;  %v4380_v63 = vmul.f32 1.442695, %v4331_v9  ;;  %v5336_v28 = vpop.f32.mrb[36].mxu1  ;;  %v4478_v22 = vmul.f32 %v5966_v19, %v5966_v19  ;;  %v5416_v20 = vadd.f32 %v8140_v25, %v7990_v52 }
 0x982   : > { %v5970_v36 = vpop.eup %5969  ;;  %5987 = vpow2.f32 %v4382_v33  ;;  %v5405_v32 = vadd.f32 %v8123_v47, %v5336_v28  ;;  %v4235_v56 = vpop.f32.mrb[37].mxu1  ;;  %v4481_v16 = vmul.f32 %v5968_v14, %v5968_v14  ;;  %v4080_v46 = vrot.slane %v8045_v57, %v6828_v39 }
 0x983   : > { %v5972_v27 = vpop.eup %5971  ;;  %v4479_v24 = vmul.f32 %v5970_v36, %v5970_v36  ;;  %5989 = vpow2.f32 %v4378_v61  ;;  %v5407_v21 = vadd.f32 %v8114_v8, %v4235_v56  ;;  %v5337_v30 = vpop.f32.mrb[38].mxu1  ;;  %v5420_v42 = vadd.f32 %v4084_v10, %v7990_v52 }
 0x984   : > { %v5974_v26 = vpop.eup %5973  ;;  %v4424_v59 = vadd.f32 1.0, %v5972_v27  ;;  %5991 = vpow2.f32 %v4384_v48  ;;  %v4336_v50 = vsub.f32 0.0, %v5405_v32  ;;  %v5409_v23 = vadd.f32 %v8137_v45, %v5337_v30  ;;  %v4238_v5 = vpop.f32.mrb[39].mxu1 }
 0x985   : > { %v5976_v1 = vpop.eup %5975  ;;  %v4422_v4 = vadd.f32 1.0, %v5974_v26  ;;  %5993 = vpow2.f32 %v4380_v63  ;;  %v4334_v60 = vsub.f32 0.0, %v5407_v21  ;;  %v5411_v47 = vadd.f32 %v8118_v37, %v4238_v5 }
 0x986   : > { %v5978_v2 = vpop.eup %5977  ;;  %5995 = vrcp.f32 %v4424_v59  ;;  %v4425_v49 = vadd.f32 1.0, %v5976_v1  ;;  %v4390_v13 = vmul.f32 1.442695, %v4336_v50  ;;  %v4337_v62 = vsub.f32 0.0, %v5409_v23 }
 0x987   : > { %5997 = vrcp.f32 %v4422_v4  ;;  %v4423_v8 = vadd.f32 1.0, %v5978_v2  ;;  %v4386_v11 = vmul.f32 1.442695, %v4334_v60  ;;  %v4335_v31 = vsub.f32 0.0, %v5411_v47 }
 0x988   : > { %v5980_v51 = vpop.eup %5979  ;;  %5999 = vrcp.f32 %v4425_v49  ;;  %v4392_v6 = vmul.f32 1.442695, %v4337_v62  ;;  %v8164_v45 = vpack.c.bf16 %v4479_v24, %v4478_v22  ;;  %v8166_v58 = vpack.c.bf16 %v4481_v16, %v4480_v15 }
 0x989   : > { %v5982_v0 = vpop.eup %5981  ;;  %6001 = vrcp.f32 %v4423_v8  ;;  %v4388_v40 = vmul.f32 1.442695, %v4335_v31  ;;  %v5340_v37 = vpop.f32.mrb[40].mxu1  ;;  %v4088_v44 = vrot.slane %v3960_v41, %v6828_v39  ;;  %v4484_v32 = vmul.f32 %v5980_v51, %v5980_v51 }
 0x98a   : > { %v5984_v43 = vpop.eup %5983  ;;  %6003 = vpow2.f32 %v4390_v13  ;;  %v5413_v33 = vadd.f32 %v8126_v55, %v5340_v37  ;;  %v4251_v54 = vpop.f32.mrb[41].mxu1  ;;  %v4482_v9 = vmul.f32 %v5982_v0, %v5982_v0  ;;  %v5422_v4 = vadd.f32 %v4076_v35, %v7990_v52 }
 0x98b   : > { %v5986_v61 = vpop.eup %5985  ;;  %v4485_v19 = vmul.f32 %v5984_v43, %v5984_v43  ;;  %6005 = vpow2.f32 %v4386_v11  ;;  %v5415_v48 = vadd.f32 %v8130_v3, %v4251_v54  ;;  %v5341_v14 = vpop.f32.mrb[42].mxu1  ;;  %v5426_v60 = vadd.f32 %v4080_v46, %v7990_v52 }
 0x98c   : > { %v5988_v25 = vpop.eup %5987  ;;  %v4483_v63 = vmul.f32 %v5986_v61, %v5986_v61  ;;  %6007 = vpow2.f32 %v4392_v6  ;;  %v4340_v57 = vsub.f32 0.0, %v5413_v33  ;;  %v5417_v28 = vadd.f32 %v5416_v20, %v5341_v14  ;;  %v4254_v36 = vpop.f32.mrb[43].mxu1 }
 0x98d   : > { %v5990_v15 = vpop.eup %5989  ;;  %v4428_v55 = vadd.f32 1.0, %v5988_v25  ;;  %6009 = vpow2.f32 %v4388_v40  ;;  %v4338_v22 = vsub.f32 0.0, %v5415_v48  ;;  %v5419_v10 = vadd.f32 %v8153_v17, %v4254_v36 }
 0x98e   : > { %v5992_v41 = vpop.eup %5991  ;;  %v4426_v56 = vadd.f32 1.0, %v5990_v15  ;;  %v4341_v27 = vsub.f32 0.0, %v5417_v28  ;;  %v8177_v16 = vpack.c.bf16 %v4483_v63, %v4482_v9  ;;  %v4398_v21 = vmul.f32 1.442695, %v4340_v57 }
 0x98f   : > { %v5994_v3 = vpop.eup %5993  ;;  %6011 = vrcp.f32 %v4428_v55  ;;  %v4429_v24 = vadd.f32 1.0, %v5992_v41  ;;  %v4339_v30 = vsub.f32 0.0, %v5419_v10  ;;  %v4394_v50 = vmul.f32 1.442695, %v4338_v22 }
 0x990   : > { %v5996_v26 = vpop.eup %5995  ;;  %6013 = vrcp.f32 %v4426_v56  ;;  %v4427_v59 = vadd.f32 1.0, %v5994_v3  ;;  %v8179_v23 = vpack.c.bf16 %v4485_v19, %v4484_v32  ;;  %v4400_v17 = vmul.f32 1.442695, %v4341_v27 }
 0x991   : > { %v5998_v5 = vpop.eup %5997  ;;  %6015 = vrcp.f32 %v4429_v24  ;;  %v5344_v1 = vpop.f32.mrb[44].mxu1  ;;  %v4396_v2 = vmul.f32 1.442695, %v4339_v30  ;;  %v5424_v62 = vadd.f32 %v4088_v44, %v7990_v52  ;;  %v4488_v11 = vmul.f32 %v5996_v26, %v5996_v26 }
 0x992   : > { %v6000_v47 = vpop.eup %5999  ;;  %6017 = vrcp.f32 %v4427_v59  ;;  %v5421_v49 = vadd.f32 %v5420_v42, %v5344_v1  ;;  %v4267_v13 = vpop.f32.mrb[45].mxu1  ;;  %v4486_v54 = vmul.f32 %v5998_v5, %v5998_v5 }
 0x993   : > { %v6002_v8 = vpop.eup %6001  ;;  %v4489_v31 = vmul.f32 %v6000_v47, %v6000_v47  ;;  %6019 = vpow2.f32 %v4398_v21  ;;  %v5423_v51 = vadd.f32 %v5422_v4, %v4267_v13  ;;  %v5345_v6 = vpop.f32.mrb[46].mxu1 }
 0x994   : > { %v6004_v0 = vpop.eup %6003  ;;  %v4487_v40 = vmul.f32 %v6002_v8, %v6002_v8  ;;  %6021 = vpow2.f32 %v4394_v50  ;;  %v4344_v39 = vsub.f32 0.0, %v5421_v49  ;;  %v5425_v18 = vadd.f32 %v5424_v62, %v5345_v6  ;;  %v4270_v35 = vpop.f32.mrb[47].mxu1 }
 0x995   : > { %v6006_v37 = vpop.eup %6005  ;;  %v4432_v20 = vadd.f32 1.0, %v6004_v0  ;;  %6023 = vpow2.f32 %v4400_v17  ;;  %v4342_v46 = vsub.f32 0.0, %v5423_v51  ;;  %v5427_v43 = vadd.f32 %v5426_v60, %v4270_v35 }
 0x996   : > { %v6008_v33 = vpop.eup %6007  ;;  %v4430_v52 = vadd.f32 1.0, %v6006_v37  ;;  %6025 = vpow2.f32 %v4396_v2  ;;  %v4345_v42 = vsub.f32 0.0, %v5425_v18  ;;  %v4406_v9 = vmul.f32 1.442695, %v4344_v39 }
 0x997   : > { %v6010_v44 = vpop.eup %6009  ;;  %6027 = vrcp.f32 %v4432_v20  ;;  %v4433_v61 = vadd.f32 1.0, %v6008_v33  ;;  %v4343_v19 = vsub.f32 0.0, %v5427_v43  ;;  %v4402_v14 = vmul.f32 1.442695, %v4342_v46 }
 0x998   : > { %6029 = vrcp.f32 %v4430_v52  ;;  %v4431_v48 = vadd.f32 1.0, %v6010_v44  ;;  %v8187_v25 = vpack.c.bf16 %v4487_v40, %v4486_v54  ;;  %v4408_v57 = vmul.f32 1.442695, %v4345_v42 }
 0x999   : > { %v6012_v63 = vpop.eup %6011  ;;  %6031 = vrcp.f32 %v4433_v61  ;;  %v8189_v28 = vpack.c.bf16 %v4489_v31, %v4488_v11  ;;  %v4404_v15 = vmul.f32 1.442695, %v4343_v19 }
 0x99a   : > { %v6014_v36 = vpop.eup %6013  ;;  %6033 = vrcp.f32 %v4431_v48  ;;  %v4492_v10 = vmul.f32 %v6012_v63, %v6012_v63 }
 0x99b   : > { %v6016_v55 = vpop.eup %6015  ;;  %6035 = vpow2.f32 %v4406_v9  ;;  %v4490_v56 = vmul.f32 %v6014_v36, %v6014_v36  ;;  %v6114_v36 = vld [vmem:[%s6443_s18 + $0x10] ss:$8 sps:$4 sm:$0xff]  }
 0x99c   : > { %v6018_v22 = vpop.eup %6017  ;;  %6037 = vpow2.f32 %v4402_v14  ;;  %v4493_v41 = vmul.f32 %v6016_v55, %v6016_v55 }
 0x99d   : > { %v6020_v32 = vpop.eup %6019  ;;  %6039 = vpow2.f32 %v4408_v57  ;;  %v4491_v27 = vmul.f32 %v6018_v22, %v6018_v22 }
 0x99e   : > { %v6022_v3 = vpop.eup %6021  ;;  %v4436_v24 = vadd.f32 1.0, %v6020_v32  ;;  %6041 = vpow2.f32 %v4404_v15  ;;  %v4515_v21 = vpack.c.bf16 %v4493_v41, %v4492_v10 }
 0x99f   : > { %v6024_v30 = vpop.eup %6023  ;;  %v4434_v26 = vadd.f32 1.0, %v6022_v3  ;;  %v4514_v59 = vpack.c.bf16 %v4491_v27, %v4490_v56 }
 0x9a0   : > { %v6026_v50 = vpop.eup %6025  ;;  %6043 = vrcp.f32 %v4436_v24  ;;  %v4437_v5 = vadd.f32 1.0, %v6024_v30 }
 0x9a1   : > { %v6028_v17 = vpop.eup %6027  ;;  %6045 = vrcp.f32 %v4434_v26  ;;  %v4435_v1 = vadd.f32 1.0, %v6026_v50  ;;  %5120 = vmatprep.subr.bf16.mxu0 %v4514_v59  ;;  %5348 = vmatprep.subr.bf16.mxu1 %v4514_v59 }
 0x9a2   : > { %v6030_v4 = vpop.eup %6029  ;;  %6047 = vrcp.f32 %v4437_v5  ;;  %5121 = vmatpush3.bf16.msra.mxu0 %v8150_v34  ;;  %5356 = vmatpush3.bf16.msra.mxu1 %v8150_v34  ;;  %v4496_v2 = vmul.f32 %v6028_v17, %v6028_v17 }
 0x9a3   : > { %v6032_v60 = vpop.eup %6031  ;;  %6049 = vrcp.f32 %v4435_v1  ;;  %5122 = vmatprep.subr.bf16.mxu0 %v4515_v21  ;;  %5349 = vmatprep.subr.bf16.mxu1 %v4515_v21  ;;  %v4494_v62 = vmul.f32 %v6030_v4, %v6030_v4 }
 0x9a4   : > { %v6034_v47 = vpop.eup %6033  ;;  %v4497_v49 = vmul.f32 %v6032_v60, %v6032_v60 }
 0x9a5   : > { %v6036_v13 = vpop.eup %6035  ;;  %v4495_v8 = vmul.f32 %v6034_v47, %v6034_v47 }
 0x9a6   : > { %v6038_v11 = vpop.eup %6037  ;;  %v4440_v31 = vadd.f32 1.0, %v6036_v13  ;;  %5123 = vmatpush3.bf16.msra.mxu0 %v8155_v38  ;;  %5357 = vmatpush3.bf16.msra.mxu1 %v8155_v38  ;;  %v4517_v51 = vpack.c.bf16 %v4497_v49, %v4496_v2 }
 0x9a7   : > { %v6040_v6 = vpop.eup %6039  ;;  %v4438_v0 = vadd.f32 1.0, %v6038_v11  ;;  %v4516_v34 = vpack.c.bf16 %v4495_v8, %v4494_v62 }
 0x9a8   : > { %v6042_v40 = vpop.eup %6041  ;;  %6051 = vrcp.f32 %v4440_v31  ;;  %v4441_v39 = vadd.f32 1.0, %v6040_v6 }
 0x9a9   : > { %6053 = vrcp.f32 %v4438_v0  ;;  %v4439_v18 = vadd.f32 1.0, %v6042_v40  ;;  %5124 = vmatprep.subr.bf16.mxu0 %v4516_v34  ;;  %5350 = vmatprep.subr.bf16.mxu1 %v4516_v34 }
 0x9aa   : > { %v6044_v35 = vpop.eup %6043  ;;  %6055 = vrcp.f32 %v4441_v39  ;;  %5125 = vmatpush3.bf16.msra.mxu0 %v8164_v45  ;;  %5358 = vmatpush3.bf16.msra.mxu1 %v8164_v45 }
 0x9ab   : > { %v6046_v37 = vpop.eup %6045  ;;  %6057 = vrcp.f32 %v4439_v18  ;;  %5126 = vmatprep.subr.bf16.mxu0 %v4517_v51  ;;  %5351 = vmatprep.subr.bf16.mxu1 %v4517_v51  ;;  %v4500_v46 = vmul.f32 %v6044_v35, %v6044_v35 }
 0x9ac   : > { %v6048_v38 = vpop.eup %6047  ;;  %v4498_v33 = vmul.f32 %v6046_v37, %v6046_v37 }
 0x9ad   : > { %v6050_v20 = vpop.eup %6049  ;;  %v4501_v43 = vmul.f32 %v6048_v38, %v6048_v38 }
 0x9ae   : > { %5127 = vmatpush3.bf16.msra.mxu0 %v8166_v58  ;;  %5359 = vmatpush3.bf16.msra.mxu1 %v8166_v58  ;;  %v4499_v54 = vmul.f32 %v6050_v20, %v6050_v20 }
 0x9af   : > { %v4519_v52 = vpack.c.bf16 %v4501_v43, %v4500_v46 }
 0x9b0   : > { %v4518_v42 = vpack.c.bf16 %v4499_v54, %v4498_v33 }
 0x9b2   : > { %v6052_v44 = vpop.eup %6051  ;;  %5128 = vmatprep.subr.bf16.mxu0 %v4518_v42  ;;  %5352 = vmatprep.subr.bf16.mxu1 %v4518_v42 }
 0x9b3   : > { %v6054_v45 = vpop.eup %6053  ;;  %5129 = vmatpush3.bf16.msra.mxu0 %v8177_v16  ;;  %5360 = vmatpush3.bf16.msra.mxu1 %v8177_v16  ;;  %v4504_v19 = vmul.f32 %v6052_v44, %v6052_v44  ;;  %v6113_v16 = vld [vmem:[%s6443_s18] ss:$8 sps:$4 sm:$0xff]   ;;  %s469_s18 = sand.u32 1, %s6188_s22  }
 0x9b4   : > { %v6056_v61 = vpop.eup %6055  ;;  %5130 = vmatprep.subr.bf16.mxu0 %v4519_v52  ;;  %5353 = vmatprep.subr.bf16.mxu1 %v4519_v52  ;;  %v4502_v58 = vmul.f32 %v6054_v45, %v6054_v45  ;;  %s4751_s17 = sshll.u32 %s469_s18, 5  ;;  %s8222_s25 = scalar_lea.sflag [#allocation3], %s469_s18 }
 0x9b5   : > { %v6058_v9 = vpop.eup %6057  ;;  %v4505_v48 = vmul.f32 %v6056_v61, %v6056_v61  ;;  %s471_s1 = scalar_lea.vmem [#allocation5], %s4751_s17 }
 0x9b6   : > { %v4503_v14 = vmul.f32 %v6058_v9, %v6058_v9  ;;  %s4635_s3 = sshll.u32 %s471_s1, 4  ;;  %s8220_s3 = int_to_ptr.vmem [resolvable:$true] %s4635_s3 }
 0x9b7   : > { %5131 = vmatpush3.bf16.msra.mxu0 %v8179_v23  ;;  %5361 = vmatpush3.bf16.msra.mxu1 %v8179_v23  ;;  %v4521_v63 = vpack.c.bf16 %v4505_v48, %v4504_v19  ;;  %v4572_v23 = vstv %s4957_s20  ;;  %s6130_s28 = scalar_lea.vmem %s8220_s3, 512  ;;  %s6136_s20 = scalar_lea.vmem %s6135_s19, 1024 }
 0x9b8   : > { %v4520_v57 = vpack.c.bf16 %v4503_v14, %v4502_v58  ;;  %v4573_v32 = vmul.f32 %v4572_v23, %v7922_v7  ;;  %v4575_v56 = vmul.f32 %v4572_v23, %v7929_v12  ;;  %v4574_v50 = vmul.f32 %v4572_v23, %v7924_v53  ;;  %p6131_p10 = scmp.ne.s32.totalorder %s8220_s3, %s6130_s28  ;;  %p6137_p0 = scmp.lt.s32.totalorder %s8220_s3, %s6135_s19 }
 0x9b9   : > { %v4576_v5 = vmul.f32 %v4572_v23, %v7931_v29  ;;  %p6138_p1 = scmp.lt.s32.totalorder %s6136_s20, %s6130_s28 }
 0x9ba   : > { %5132 = vmatprep.subr.bf16.mxu0 %v4520_v57  ;;  %5354 = vmatprep.subr.bf16.mxu1 %v4520_v57  ;;  %p6132_p12 = pnand %p6131_p10, %p6307_p5 }
 0x9bb   : > { %5133 = vmatpush3.bf16.msra.mxu0 %v8187_v25  ;;  %5362 = vmatpush3.bf16.msra.mxu1 %v8187_v25  ;;  %p6139_p2 = por %p6138_p1, %p6137_p0 }
 0x9bc   : > { %5134 = vmatprep.subr.bf16.mxu0 %v4521_v63  ;;  %5355 = vmatprep.subr.bf16.mxu1 %v4521_v63  ;;  %p6133_p13 = pneg %p6132_p12 }
 0x9be   : > { %p6140_p3 = pnand %p6139_p2, %p6133_p13 }
 0x9bf   : > { %5135 = vmatpush3.bf16.msra.mxu0 %v8189_v28  ;;  %5363 = vmatpush3.bf16.msra.mxu1 %v8189_v28 }
 0x9c2   : > { %4555 = vmatmul.mubr.bf16.vlgmr.msra.gmra.mrb[116].mxu0 %v6113_v16  ;;  %4563 = vmatmul.mubr.bf16.vlgmr.msra.gmra.mrb[120].mxu1 %v6114_v36 }
 0xa95   : > { %v5136_v15 = vpop.f32.mrb[116].mxu0  ;;  %v5142_v55 = vpop.f32.mrb[120].mxu1 }
 0xa96   : > { %v5137_v22 = vpop.f32.mrb[117].mxu0  ;;  %v5143_v10 = vpop.f32.mrb[121].mxu1 }
 0xa97   : > { %v5138_v41 = vadd.f32 %v5137_v22, %v5136_v15  ;;  %v5144_v25 = vadd.f32 %v5143_v10, %v5142_v55  ;;  %v5139_v27 = vpop.f32.mrb[118].mxu0  ;;  %v5145_v3 = vpop.f32.mrb[122].mxu1 }
 0xa98   : > { %v5140_v24 = vpop.f32.mrb[119].mxu0  ;;  %v5146_v28 = vpop.f32.mrb[123].mxu1 }
 0xa99   : > { %v4577_v21 = vadd.f32 %v5138_v41, %v4573_v32  ;;  %v4579_v30 = vadd.f32 %v5144_v25, %v4575_v56  ;;  %v5141_v26 = vadd.f32 %v5140_v24, %v5139_v27  ;;  %v5147_v59 = vadd.f32 %v5146_v28, %v5145_v3 }
 0xa9b   : > { %v4585_v17 = vand.u32 2147483647, %v4577_v21  ;;  %v4587_v1 = vand.u32 2147483647, %v4579_v30  ;;  %v4578_v4 = vadd.f32 %v5141_v26, %v4574_v50  ;;  %v4580_v60 = vadd.f32 %v5147_v59, %v4576_v5 }
 0xa9c   : > { %v4581_v37 = vmax.f32 %v4577_v21, 0.0  ;;  %v4583_v20 = vmax.f32 %v4579_v30, 0.0 }
 0xa9d   : > { %v4589_v7 = vsub.f32 0.0, %v4585_v17  ;;  %v4591_v47 = vsub.f32 0.0, %v4587_v1  ;;  %v4586_v2 = vand.u32 2147483647, %v4578_v4  ;;  %v4588_v12 = vand.u32 2147483647, %v4580_v60 }
 0xa9e   : > { %v4582_v42 = vmax.f32 %v4578_v4, 0.0  ;;  %v4584_v45 = vmax.f32 %v4580_v60, 0.0 }
 0xa9f   : > { %v4593_v49 = vmul.f32 1.442695, %v4589_v7  ;;  %v4597_v13 = vmul.f32 1.442695, %v4591_v47  ;;  %v4590_v62 = vsub.f32 0.0, %v4586_v2  ;;  %v4592_v8 = vsub.f32 0.0, %v4588_v12 }
 0xaa1   : > { %6059 = vpow2.f32 %v4593_v49  ;;  %v4595_v11 = vmul.f32 1.442695, %v4590_v62  ;;  %v4599_v31 = vmul.f32 1.442695, %v4592_v8 }
 0xaa2   : > { %6061 = vpow2.f32 %v4597_v13 }
 0xaa3   : > { %6063 = vpow2.f32 %v4595_v11 }
 0xaa4   : > { %6065 = vpow2.f32 %v4599_v31 }
 0xaab   : > { %v6060_v53 = vpop.eup %6059 }
 0xaac   : > { %v6062_v29 = vpop.eup %6061  ;;  %v4601_v51 = vadd.f32 1.0, %v6060_v53 }
 0xaad   : > { %v4603_v6 = vadd.f32 1.0, %v6062_v29  ;;  %v6064_v0 = vpop.eup %6063 }
 0xaae   : > { %6067 = vlog2.f32 %v4601_v51  ;;  %v6066_v34 = vpop.eup %6065  ;;  %v4602_v40 = vadd.f32 1.0, %v6064_v0 }
 0xaaf   : > { %6069 = vlog2.f32 %v4603_v6  ;;  %v4604_v39 = vadd.f32 1.0, %v6066_v34 }
 0xab0   : > { %6071 = vlog2.f32 %v4602_v40 }
 0xab1   : > { %6073 = vlog2.f32 %v4604_v39 }
 0xab8   : > { %v6068_v18 = vpop.eup %6067 }
 0xab9   : > { %v6070_v35 = vpop.eup %6069  ;;  %v4606_v38 = vmul.f32 0.6931472, %v6068_v18 }
 0xaba   : > { %v4610_v46 = vmul.f32 0.6931472, %v6070_v35  ;;  %v6072_v43 = vpop.eup %6071 }
 0xabb   : > { %v4613_v33 = vadd.f32 %v4606_v38, %v4581_v37  ;;  %v6074_v54 = vpop.eup %6073  ;;  %v4608_v44 = vmul.f32 0.6931472, %v6072_v43 }
 0xabc   : > { %v4615_v52 = vadd.f32 %v4610_v46, %v4583_v20  ;;  %v4612_v61 = vmul.f32 0.6931472, %v6074_v54 }
 0xabd   : > { %4617 = vst [vmem:[%s471_s1] sm:$0xff] %v4613_v33  ;;  %v4614_v9 = vadd.f32 %v4608_v44, %v4582_v42 }
 0xabe   : > { %4619 = vst [vmem:[%s471_s1 + $0x10] sm:$0xff] %v4615_v52  ;;  %v4616_v19 = vadd.f32 %v4612_v61, %v4584_v45 }
 0xabf   : > { %4618 = vst [vmem:[%s471_s1 + $0x8] sm:$0xff] %v4614_v9 }
 0xac0   : > { %4620 = vst [vmem:[%s471_s1 + $0x18] sm:$0xff] %v4616_v19 }
 0xac1   : > { %6143 = shalt.err (!%p6140_p3)
}
 0xac2   : > { %s6144_s18 = scalar_lea.hbm %s8218_s26, 512  ;;  %s6148_s1 = scalar_lea.hbm %s8275_s12, 1024 }
 0xac3   : > { %p6145_p4 = scmp.ne.s32.totalorder %s8218_s26, %s6144_s18  ;;  %p6149_p11 = scmp.lt.u32.totalorder %s8218_s26, %s8275_s12 }
 0xac4   : > { %p6150_p9 = scmp.lt.u32.totalorder %s6148_s1, %s6144_s18  ;;  %p6152_p12 = scmp.lt.u32.totalorder %s6144_s18, %s8218_s26 }
 0xac5   : > { %p6146_p7 = pnand %p6145_p4, %p6307_p5 }
 0xac6   : > { %p6151_p10 = por %p6150_p9, %p6149_p11 }
 0xac7   : > { %p6147_p8 = pneg %p6146_p7 }
 0xac8   : > { %p6153_p13 = por %p6152_p12, %p6151_p10 }
 0xaca   : > { %p6154_p0 = pnand %p6153_p13, %p6147_p8 }
 0xacc   : > { %6157 = shalt.err (!%p6154_p0)
}
 0xacd   : > { %s6202_s28 = smov 128   ;;  %s6203_s16 = smov 8  }
 0xace   : > { %5464 = dma.vmem_to_hbm [thread:$0]  (%p6307_p5), %s8220_s3, 512, %s8218_s26, %s8222_s25, %s6202_s28, %s6202_s28, %s6203_s16  }
 0xacf PF: > { %p5476_p1 = scmp.ge.s32.totalorder %s6196_s24, 2  ;;  %s4650_s19 = sand.u32 1, %s6184_s21  }
 0xad0   : > { %s4651_s20 = scalar_lea.sflag [#allocation3], %s4650_s19 }
 0xad1   : > { %p5471_p2 = pnand %p5476_p1, %p6311_p6 }
 0xad3   : > { %6179 = dma.done.wait (!%p5471_p2), %s4651_s20, 512  }
 0xad4   : > { %6181 = vsyncadd (!%p5471_p2), %s4651_s20, 4294966784  ;;  %p23_p3 = scmp.ge.s32.totalorder %s6294_s27, 4   ;;  %s8429_s21 = smov %s6188_s22 }
 0xad5   : > { %s8430_s22 = smov %s6192_s23  ;;  %s8431_s23 = smov %s6305_s30 }
 0xad6   : > { %s8432_s24 = smov %s6294_s27  ;;  %25 = sbr.rel (!%p23_p3) target bundleno = 8 (0x8), region = 119 }
 0xadd   :  { %4656 = vsyncpa [#allocation3], 1 }
 0xade   :  { %4658 = vsyncpa [#allocation3 + $0x1], 1 }
 0xadf   :  { %4659 = vsyncpa [#allocation4], 1 }
 0xae0   :  { %4661 = vsyncpa [#allocation4 + $0x1], 1 }

</bundles_post_ra>
